<compile_context>
chip_gen: v5e
topology: v5e:2x2
jax: 0.10.0
libtpu: 0.0.40
codegen_flags: <defaults>
</compile_context>

<pallas_src>
import functools

import jax
import jax.numpy as jnp
from jax import lax
from jax.experimental import pallas as pl
from jax.experimental.pallas import tpu as pltpu

LN_EPS = 1e-5  # PyTorch nn.LayerNorm default


def _round_up(n, m):
    return -(-n // m) * m


# ----------------------------------------------------------------------------
# Kernel
# ----------------------------------------------------------------------------
def _resnn_kernel(n_blocks, n_layers, inv_h, two_stream,
                  x_ref, w_in_ref, b_in_ref,
                  w_blk_ref, b_blk_ref, g_blk_ref, beta_blk_ref,
                  w_out_ref, b_out_ref, o_ref):
    mm_dtype = w_in_ref.dtype  # matmul operand dtype (f32 or bf16); accum is f32

    def linear_ln_relu(out, idx):
        w = w_blk_ref[idx]        # (Hp, Hp)  dynamic first-axis VMEM index
        bias = b_blk_ref[idx]     # (1, Hp)
        gamma = g_blk_ref[idx]    # (1, Hp)   (0 in padded lanes)
        beta = beta_blk_ref[idx]  # (1, Hp)   (0 in padded lanes)

        out = jnp.dot(out.astype(mm_dtype), w,
                      preferred_element_type=jnp.float32) + bias

        # LayerNorm over the last dim with biased variance (PyTorch default).
        # NOTE: the one-pass sum / sum-of-squares form is required here: padded
        # lanes are exact zeros so they contribute 0 to s1/s2 and inv_h = 1/H_true
        # gives the true mean/var.  (A two-pass E[(x-mean)^2] would need masking.)
        s1 = jnp.sum(out, axis=-1, keepdims=True)
        s2 = jnp.sum(out * out, axis=-1, keepdims=True)
        mean = s1 * inv_h
        var = jnp.maximum(s2 * inv_h - mean * mean, 0.0)
        out = (out - mean) * lax.rsqrt(var + LN_EPS)
        out = out * gamma + beta      # padded lanes -> 0
        return jnp.maximum(out, 0.0)

    def out_layer(h):
        return (jnp.dot(h.astype(mm_dtype), w_out_ref[...],
                        preferred_element_type=jnp.float32) + b_out_ref[...])

    # Input layer: Linear + ReLU (f32 accumulation on the MXU).
    h = jnp.dot(x_ref[...], w_in_ref[...], preferred_element_type=jnp.float32)
    h = jnp.maximum(h + b_in_ref[...], 0.0)

    unroll_layers = n_layers <= 4
    unroll_blocks = n_blocks <= 4

    if two_stream:
        # Two independent row-halves: the second half's matmul (MXU) co-issues
        # with the first half's LayerNorm (XLU reductions + EUP rsqrt + VPU).
        half = h.shape[0] // 2
        h0, h1 = h[:half], h[half:]

        def block_body(b, carry):
            r0, r1 = carry
            base = b * n_layers

            def layer_body(l, c):
                o0, o1 = c
                idx = base + l
                return (linear_ln_relu(o0, idx), linear_ln_relu(o1, idx))

            o0, o1 = lax.fori_loop(0, n_layers, layer_body, (r0, r1),
                                   unroll=unroll_layers)
            return (r0 + o0, r1 + o1)  # residual adds

        h0, h1 = lax.fori_loop(0, n_blocks, block_body, (h0, h1),
                               unroll=unroll_blocks)
        o_ref[:half, :] = out_layer(h0)
        o_ref[half:, :] = out_layer(h1)
    else:
        def block_body(b, hh):
            base = b * n_layers

            def layer_body(l, out):
                return linear_ln_relu(out, base + l)

            out = lax.fori_loop(0, n_layers, layer_body, hh,
                                unroll=unroll_layers)
            return hh + out  # residual add

        h = lax.fori_loop(0, n_blocks, block_body, h, unroll=unroll_blocks)
        o_ref[...] = out_layer(h)


# ----------------------------------------------------------------------------
# Capability / hardware queries (cached, one-time)
# ----------------------------------------------------------------------------
def _probe_kernel(x_ref, o_ref):
    o_ref[...] = x_ref[...] * 2.0


@functools.lru_cache(maxsize=1)
def _supports_single_buffering():
    """Capability check: does this jax/libtpu accept pl.Buffered(1) specs?"""
    try:
        spec = pl.BlockSpec((8, 128), lambda i: (0, 0),
                            pipeline_mode=pl.Buffered(1))
        f = pl.pallas_call(
            _probe_kernel,
            out_shape=jax.ShapeDtypeStruct((16, 128), jnp.float32),
            grid=(2,),
            in_specs=[spec],
            out_specs=pl.BlockSpec((8, 128), lambda i: (i, 0)))
        jax.block_until_ready(f(jnp.ones((8, 128), jnp.float32)))
        return True
    except Exception:
        return False


@functools.lru_cache(maxsize=1)
def _vmem_cap_bytes():
    """Generation-aware scoped-VMEM cap: ~75% of physical per-core VMEM.

    v5e/v6e: 128 MiB physical -> ~96 MiB cap.  v7x: 64 MiB -> ~48 MiB cap,
    leaving headroom for Mosaic internal scratch and double-buffered I/O tiles.
    """
    try:
        cap = int(pltpu.get_tpu_info().vmem_capacity_bytes)
    except Exception:
        cap = 64 << 20  # unknown generation: assume the smaller (v7x) VMEM
    return (cap * 3) // 4


# ----------------------------------------------------------------------------
# Wrapper
# ----------------------------------------------------------------------------
def _pick_tb(batch, tb):
    """MXU-friendly batch tile; prefer >=2 grid steps (v7x has 2 TensorCores)."""
    if tb is not None:
        return tb
    cands = (256, 128, 64, 32, 16, 8)
    for c in cands:
        if batch % c == 0 and batch // c >= 2:
            return c
    for c in cands:
        if batch % c == 0:
            return c
    return batch  # odd small batch: single full tile (allowed: equals array dim)


def resnn_forward(x, params, *, tb=None):
    """x: (batch, input_dim). params: dict from init_params. -> (batch, output_dim) f32."""
    w_in, b_in = params["w_in"], params["b_in"]
    w_blk, b_blk = params["w_blk"], params["b_blk"]
    g_blk, beta_blk = params["g_blk"], params["beta_blk"]
    w_out, b_out = params["w_out"], params["b_out"]
    n_blocks, n_layers = params["n_blocks"], params["n_layers"]
    hidden_true = params["hidden_dim"]
    output_true = params["output_dim"]

    batch, input_dim = x.shape
    h_pad = w_in.shape[1]
    o_pad = w_out.shape[1]

    mm_dtype = w_in.dtype
    if x.dtype != mm_dtype:
        x = x.astype(mm_dtype)  # cast once here, not per tile inside the kernel

    tb = _pick_tb(batch, tb)
    assert batch % tb == 0, f"batch {batch} not divisible by tile {tb}"
    grid = (batch // tb,)
    two_stream = (tb % 16 == 0)  # halves stay sublane-aligned (multiple of 8)

    consts = (w_in, b_in, w_blk, b_blk, g_blk, beta_blk, w_out, b_out)

    single_buf = _supports_single_buffering()
    weight_factor = 1 if single_buf else 2  # fallback path double-buffers weights
    weight_bytes = sum(int(a.size) * a.dtype.itemsize for a in consts)
    io_bytes = 2 * (tb * input_dim * x.dtype.itemsize + tb * o_pad * 4)
    scratch_bytes = 8 * tb * h_pad * 4
    est = weight_factor * weight_bytes + io_bytes + scratch_bytes + (4 << 20)
    vmem_limit = int(min(max(est, 32 << 20), _vmem_cap_bytes()))
    # TODO(synk): if weight_factor*weight_bytes exceeds the generation cap (large
    # stacked w_blk, e.g. on v7x's 64 MiB VMEM), keep w_blk in HBM
    # (BlockSpec(memory_space=pl.ANY)) and stream one (H, H) layer weight at a
    # time with a 2-slot pltpu.make_async_copy double buffer (prefetch layer
    # idx+1 while layer idx's matmul+LN runs).

    def const_spec(a):
        nd = a.ndim
        idx = lambda i, nd=nd: (0,) * nd
        if single_buf:
            # Grid-invariant operand: single-buffer (double buffering a
            # constant-index-map operand only doubles its VMEM footprint).
            return pl.BlockSpec(a.shape, idx, pipeline_mode=pl.Buffered(1))
        return pl.BlockSpec(a.shape, idx)

    kernel = functools.partial(_resnn_kernel, n_blocks, n_layers,
                               1.0 / float(hidden_true), two_stream)

    y = pl.pallas_call(
        kernel,
        out_shape=jax.ShapeDtypeStruct((batch, o_pad), jnp.float32),
        grid=grid,
        in_specs=[pl.BlockSpec((tb, input_dim), lambda i: (i, 0))]
                 + [const_spec(a) for a in consts],
        out_specs=pl.BlockSpec((tb, o_pad), lambda i: (i, 0)),
        compiler_params=pltpu.CompilerParams(
            dimension_semantics=("parallel",),
            vmem_limit_bytes=vmem_limit),
    )(x, *consts)

    return y[:, :output_true] if output_true != o_pad else y


# ----------------------------------------------------------------------------
# Parameter construction (padding hoisted here, done once)
# ----------------------------------------------------------------------------
def init_params(key, *, input_dim, hidden_dim, output_dim, hidden_nums,
                block_layer_nums, dtype=jnp.bfloat16):
    """Deterministic synthetic parameters matching ResNN_Reverse's shapes.

    Matmul weights are stored in `dtype` (bf16 default; f32 accumulation in the
    kernel); biases / LayerNorm affine stay f32.  hidden_dim and output_dim are
    zero-padded to multiples of 128 here (lane-dense kernel work); the padded
    hidden lanes remain exact zeros through every layer because gamma/beta are
    0 in the pad region, so LayerNorm semantics over the true H are preserved.
    """
    n_blocks = hidden_nums - 1
    n_layers = block_layer_nums - 1
    nl = max(n_blocks * n_layers, 1)  # keep arrays non-empty for Pallas

    h_pad = _round_up(hidden_dim, 128)
    o_pad = _round_up(output_dim, 128)
    hp = h_pad - hidden_dim
    op = o_pad - output_dim

    ks = jax.random.split(key, 6)
    s_in = 1.0 / (input_dim ** 0.5)
    s_h = 1.0 / (hidden_dim ** 0.5)
    u = lambda k, shape, s: jax.random.uniform(k, shape, jnp.float32, -s, s)

    w_in = u(ks[0], (input_dim, hidden_dim), s_in)
    b_in = u(ks[1], (1, hidden_dim), s_in)
    w_blk = u(ks[2], (nl, hidden_dim, hidden_dim), s_h)
    b_blk = u(ks[3], (nl, 1, hidden_dim), s_h)
    g_blk = jnp.ones((nl, 1, hidden_dim), jnp.float32)       # LN weight init
    beta_blk = jnp.zeros((nl, 1, hidden_dim), jnp.float32)   # LN bias init
    w_out = u(ks[4], (hidden_dim, output_dim), s_h)
    b_out = u(ks[5], (1, output_dim), s_h)

    return {
        "w_in": jnp.pad(w_in, ((0, 0), (0, hp))).astype(dtype),
        "b_in": jnp.pad(b_in, ((0, 0), (0, hp))),
        "w_blk": jnp.pad(w_blk, ((0, 0), (0, hp), (0, hp))).astype(dtype),
        "b_blk": jnp.pad(b_blk, ((0, 0), (0, 0), (0, hp))),
        "g_blk": jnp.pad(g_blk, ((0, 0), (0, 0), (0, hp))),      # gamma=0 in pad
        "beta_blk": jnp.pad(beta_blk, ((0, 0), (0, 0), (0, hp))),  # beta=0 in pad
        "w_out": jnp.pad(w_out, ((0, hp), (0, op))).astype(dtype),
        "b_out": jnp.pad(b_out, ((0, 0), (0, op))),
        "n_blocks": int(n_blocks),
        "n_layers": int(n_layers),
        "hidden_dim": int(hidden_dim),   # true width (for 1/H in LayerNorm)
        "output_dim": int(output_dim),   # true output width (for final slice)
    }


# ----------------------------------------------------------------------------
# Pure-JAX reference (uses the true, unpadded sub-arrays)
# ----------------------------------------------------------------------------
def resnn_forward_ref(x, params):
    H = params["hidden_dim"]
    O = params["output_dim"]
    f32 = lambda a: a.astype(jnp.float32)
    x = x.astype(jnp.float32)
    h = jnp.maximum(x @ f32(params["w_in"])[:, :H] + params["b_in"][:, :H], 0.0)
    for b in range(params["n_blocks"]):
        out = h
        for l in range(params["n_layers"]):
            idx = b * params["n_layers"] + l
            out = out @ f32(params["w_blk"][idx])[:H, :H] + params["b_blk"][idx][:, :H]
            mean = jnp.mean(out, axis=-1, keepdims=True)
            var = jnp.mean((out - mean) ** 2, axis=-1, keepdims=True)
            out = (out - mean) / jnp.sqrt(var + LN_EPS)
            out = out * params["g_blk"][idx][:, :H] + params["beta_blk"][idx][:, :H]
            out = jnp.maximum(out, 0.0)
        h = h + out
    return h @ f32(params["w_out"])[:H, :O] + params["b_out"][:, :O]


if __name__ == "__main__":
    # Small hyperparameters consistent with the module's forward.
    hyperparas = dict(input_dim=16, hidden_dim=32, output_dim=4,
                      hidden_nums=3, block_layer_nums=3)
    batch = 256

    key = jax.random.PRNGKey(0)
    k_x, k_p = jax.random.split(key)
    x = jax.random.normal(k_x, (batch, hyperparas["input_dim"]), jnp.float32)

    # f32 weights, auto tile (tb=128 -> 2 grid steps, two-stream kernel path):
    # strict check against the reference.
    params32 = init_params(k_p, dtype=jnp.float32, **hyperparas)
    y = jax.block_until_ready(resnn_forward(x, params32))
    y_ref = resnn_forward_ref(x, params32)
    assert y.shape == (batch, hyperparas["output_dim"])
    assert jnp.allclose(y, y_ref, atol=1e-4, rtol=1e-4), \
        "Pallas f32 output mismatch vs JAX reference"

    # bf16 matmul weights (default), tiny tile (tb=8 -> single-stream path,
    # 32 pipelined grid steps): relaxed tolerance (bf16 operands, f32 accum/LN).
    params16 = init_params(k_p, **hyperparas)
    y16 = jax.block_until_ready(resnn_forward(x, params16, tb=8))
    y16_ref = resnn_forward_ref(x, params16)
    assert y16.shape == (batch, hyperparas["output_dim"])
    assert jnp.allclose(y16, y16_ref, atol=1e-1, rtol=1e-1), \
        "Pallas bf16 output mismatch vs JAX reference"

    print("KERNEL_OK")
</pallas_src>

<mosaic_0001>
module attributes {stable_mosaic.version = 11 : i64} {
  func.func @_probe_kernel(%arg0: i32, %arg1: memref<8x128xf32, #tpu.memory_space<vmem>>, %arg2: memref<8x128xf32, #tpu.memory_space<vmem>>) attributes {dimension_semantics = [#tpu.dimension_semantics<arbitrary>], iteration_bounds = array<i64: 2>, scalar_prefetch = 0 : i64, scratch_operands = 0 : i64, tpu.core_type = #tpu.core_type<tc>, window_params = [{pipeline_mode = #tpu.pipeline_mode<synchronous>, transform_indices = @transform_0, window_bounds = array<i64: 8, 128>}, {transform_indices = @transform_1, window_bounds = array<i64: 8, 128>}]} {
    %c0 = arith.constant 0 : index
    %c0_0 = arith.constant 0 : index
    %0 = vector.load %arg1[%c0, %c0_0] : memref<8x128xf32, #tpu.memory_space<vmem>>, vector<8x128xf32>
    %cst = arith.constant 2.000000e+00 : f32
    %1 = vector.broadcast %cst : f32 to vector<8x128xf32>
    %2 = arith.mulf %0, %1 : vector<8x128xf32>
    %c0_1 = arith.constant 0 : index
    %c0_2 = arith.constant 0 : index
    %3 = vector.load %arg2[%c0_1, %c0_2] : memref<8x128xf32, #tpu.memory_space<vmem>>, vector<8x128xf32>
    tpu.vector_store %arg2[%c0_1, %c0_2], %2 {strides = array<i32>} : memref<8x128xf32, #tpu.memory_space<vmem>>, vector<8x128xf32>,
    return
  }
  func.func @transform_0(%arg0: i32) -> (i32, i32) {
    %c0_i32 = arith.constant 0 : i32
    %c0_i32_0 = arith.constant 0 : i32
    %c0_i32_1 = arith.constant 0 : i32
    return %c0_i32, %c0_i32_0 : i32, i32
  }
  func.func @transform_1(%arg0: i32) -> (i32, i32) {
    %c0_i32 = arith.constant 0 : i32
    %c0_i32_0 = arith.constant 0 : i32
    return %arg0, %c0_i32 : i32, i32
  }
}

module attributes {stable_mosaic.version = 11 : i64} {
  func.func @_resnn_kernel(%arg0: i32, %arg1: memref<128x16xf32, #tpu.memory_space<vmem>>, %arg2: memref<16x128xf32, #tpu.memory_space<vmem>>, %arg3: memref<1x128xf32, #tpu.memory_space<vmem>>, %arg4: memref<4x128x128xf32, #tpu.memory_space<vmem>>, %arg5: memref<4x1x128xf32, #tpu.memory_space<vmem>>, %arg6: memref<4x1x128xf32, #tpu.memory_space<vmem>>, %arg7: memref<4x1x128xf32, #tpu.memory_space<vmem>>, %arg8: memref<128x128xf32, #tpu.memory_space<vmem>>, %arg9: memref<1x128xf32, #tpu.memory_space<vmem>>, %arg10: memref<128x128xf32, #tpu.memory_space<vmem>>) attributes {dimension_semantics = [#tpu.dimension_semantics<parallel>], iteration_bounds = array<i64: 2>, scalar_prefetch = 0 : i64, scratch_operands = 0 : i64, tpu.core_type = #tpu.core_type<tc>, window_params = [{transform_indices = @transform_0, window_bounds = array<i64: 128, 16>}, {pipeline_mode = #tpu.pipeline_mode<synchronous>, transform_indices = @transform_1, window_bounds = array<i64: 16, 128>}, {pipeline_mode = #tpu.pipeline_mode<synchronous>, transform_indices = @transform_2, window_bounds = array<i64: 1, 128>}, {pipeline_mode = #tpu.pipeline_mode<synchronous>, transform_indices = @transform_3, window_bounds = array<i64: 4, 128, 128>}, {pipeline_mode = #tpu.pipeline_mode<synchronous>, transform_indices = @transform_4, window_bounds = array<i64: 4, 1, 128>}, {pipeline_mode = #tpu.pipeline_mode<synchronous>, transform_indices = @transform_5, window_bounds = array<i64: 4, 1, 128>}, {pipeline_mode = #tpu.pipeline_mode<synchronous>, transform_indices = @transform_6, window_bounds = array<i64: 4, 1, 128>}, {pipeline_mode = #tpu.pipeline_mode<synchronous>, transform_indices = @transform_7, window_bounds = array<i64: 128, 128>}, {pipeline_mode = #tpu.pipeline_mode<synchronous>, transform_indices = @transform_8, window_bounds = array<i64: 1, 128>}, {transform_indices = @transform_9, window_bounds = array<i64: 128, 128>}]} {
    %c0 = arith.constant 0 : index
    %c0_0 = arith.constant 0 : index
    %0 = vector.load %arg1[%c0, %c0_0] : memref<128x16xf32, #tpu.memory_space<vmem>>, vector<128x16xf32>
    %c0_1 = arith.constant 0 : index
    %c0_2 = arith.constant 0 : index
    %1 = vector.load %arg2[%c0_1, %c0_2] : memref<16x128xf32, #tpu.memory_space<vmem>>, vector<16x128xf32>
    %cst = arith.constant dense<0.000000e+00> : vector<128x128xf32>
    %2 = tpu.matmul %0, %1, %cst {dimension_numbers = #tpu.dot_dimension_numbers<[1], [0], [0], [1], [0, 0, 1, 1], [], []>} : vector<128x16xf32>, vector<16x128xf32>, vector<128x128xf32> -> vector<128x128xf32>
    %c0_3 = arith.constant 0 : index
    %c0_4 = arith.constant 0 : index
    %3 = vector.load %arg3[%c0_3, %c0_4] : memref<1x128xf32, #tpu.memory_space<vmem>>, vector<1x128xf32>
    %4 = vector.broadcast %3 : vector<1x128xf32> to vector<128x128xf32>
    %5 = arith.addf %2, %4 : vector<128x128xf32>
    %cst_5 = arith.constant 0.000000e+00 : f32
    %6 = vector.broadcast %cst_5 : f32 to vector<128x128xf32>
    %7 = arith.maximumf %5, %6 : vector<128x128xf32>
    %8 = vector.extract_strided_slice %7 {offsets = [0, 0], sizes = [64, 128], strides = [1, 1]} : vector<128x128xf32> to vector<64x128xf32>
    %9 = vector.extract_strided_slice %7 {offsets = [64, 0], sizes = [64, 128], strides = [1, 1]} : vector<128x128xf32> to vector<64x128xf32>
    %c0_i32 = arith.constant 0 : i32
    %c2_i32 = arith.constant 2 : i32
    %10 = arith.muli %c0_i32, %c2_i32 : i32
    %c0_i32_6 = arith.constant 0 : i32
    %11 = arith.addi %10, %c0_i32_6 : i32
    %12 = arith.index_cast %11 : i32 to index
    %c0_7 = arith.constant 0 : index
    %c0_8 = arith.constant 0 : index
    %13 = vector.load %arg4[%12, %c0_7, %c0_8] : memref<4x128x128xf32, #tpu.memory_space<vmem>>, vector<1x128x128xf32>
    %14 = vector.shape_cast %13 : vector<1x128x128xf32> to vector<128x128xf32>
    %15 = arith.index_cast %11 : i32 to index
    %c0_9 = arith.constant 0 : index
    %c0_10 = arith.constant 0 : index
    %16 = vector.load %arg5[%15, %c0_9, %c0_10] : memref<4x1x128xf32, #tpu.memory_space<vmem>>, vector<1x1x128xf32>
    %17 = vector.shape_cast %16 : vector<1x1x128xf32> to vector<1x128xf32>
    %18 = arith.index_cast %11 : i32 to index
    %c0_11 = arith.constant 0 : index
    %c0_12 = arith.constant 0 : index
    %19 = vector.load %arg6[%18, %c0_11, %c0_12] : memref<4x1x128xf32, #tpu.memory_space<vmem>>, vector<1x1x128xf32>
    %20 = vector.shape_cast %19 : vector<1x1x128xf32> to vector<1x128xf32>
    %21 = arith.index_cast %11 : i32 to index
    %c0_13 = arith.constant 0 : index
    %c0_14 = arith.constant 0 : index
    %22 = vector.load %arg7[%21, %c0_13, %c0_14] : memref<4x1x128xf32, #tpu.memory_space<vmem>>, vector<1x1x128xf32>
    %23 = vector.shape_cast %22 : vector<1x1x128xf32> to vector<1x128xf32>
    %cst_15 = arith.constant dense<0.000000e+00> : vector<64x128xf32>
    %24 = tpu.matmul %8, %14, %cst_15 {dimension_numbers = #tpu.dot_dimension_numbers<[1], [0], [0], [1], [0, 0, 1, 1], [], []>} : vector<64x128xf32>, vector<128x128xf32>, vector<64x128xf32> -> vector<64x128xf32>
    %25 = vector.broadcast %17 : vector<1x128xf32> to vector<64x128xf32>
    %26 = arith.addf %24, %25 : vector<64x128xf32>
    %cst_16 = arith.constant dense<0.000000e+00> : vector<64xf32>
    %27 = vector.multi_reduction <add>, %26, %cst_16 [1] : vector<64x128xf32> to vector<64xf32>
    %28 = vector.shape_cast %27 : vector<64xf32> to vector<64x1xf32>
    %29 = arith.mulf %26, %26 : vector<64x128xf32>
    %cst_17 = arith.constant dense<0.000000e+00> : vector<64xf32>
    %30 = vector.multi_reduction <add>, %29, %cst_17 [1] : vector<64x128xf32> to vector<64xf32>
    %31 = vector.shape_cast %30 : vector<64xf32> to vector<64x1xf32>
    %cst_18 = arith.constant 3.125000e-02 : f32
    %32 = vector.broadcast %cst_18 : f32 to vector<64x1xf32>
    %33 = arith.mulf %28, %32 : vector<64x1xf32>
    %cst_19 = arith.constant 3.125000e-02 : f32
    %34 = vector.broadcast %cst_19 : f32 to vector<64x1xf32>
    %35 = arith.mulf %31, %34 : vector<64x1xf32>
    %36 = arith.mulf %33, %33 : vector<64x1xf32>
    %37 = arith.subf %35, %36 : vector<64x1xf32>
    %cst_20 = arith.constant 0.000000e+00 : f32
    %38 = vector.broadcast %cst_20 : f32 to vector<64x1xf32>
    %39 = arith.maximumf %37, %38 : vector<64x1xf32>
    %40 = vector.broadcast %33 : vector<64x1xf32> to vector<64x128xf32>
    %41 = arith.subf %26, %40 : vector<64x128xf32>
    %cst_21 = arith.constant 9.99999974E-6 : f32
    %42 = vector.broadcast %cst_21 : f32 to vector<64x1xf32>
    %43 = arith.addf %39, %42 : vector<64x1xf32>
    %44 = math.rsqrt %43 : vector<64x1xf32>
    %45 = vector.broadcast %44 : vector<64x1xf32> to vector<64x128xf32>
    %46 = arith.mulf %41, %45 : vector<64x128xf32>
    %47 = vector.broadcast %20 : vector<1x128xf32> to vector<64x128xf32>
    %48 = arith.mulf %46, %47 : vector<64x128xf32>
    %49 = vector.broadcast %23 : vector<1x128xf32> to vector<64x128xf32>
    %50 = arith.addf %48, %49 : vector<64x128xf32>
    %cst_22 = arith.constant 0.000000e+00 : f32
    %51 = vector.broadcast %cst_22 : f32 to vector<64x128xf32>
    %52 = arith.maximumf %50, %51 : vector<64x128xf32>
    %53 = arith.index_cast %11 : i32 to index
    %c0_23 = arith.constant 0 : index
    %c0_24 = arith.constant 0 : index
    %54 = vector.load %arg4[%53, %c0_23, %c0_24] : memref<4x128x128xf32, #tpu.memory_space<vmem>>, vector<1x128x128xf32>
    %55 = vector.shape_cast %54 : vector<1x128x128xf32> to vector<128x128xf32>
    %56 = arith.index_cast %11 : i32 to index
    %c0_25 = arith.constant 0 : index
    %c0_26 = arith.constant 0 : index
    %57 = vector.load %arg5[%56, %c0_25, %c0_26] : memref<4x1x128xf32, #tpu.memory_space<vmem>>, vector<1x1x128xf32>
    %58 = vector.shape_cast %57 : vector<1x1x128xf32> to vector<1x128xf32>
    %59 = arith.index_cast %11 : i32 to index
    %c0_27 = arith.constant 0 : index
    %c0_28 = arith.constant 0 : index
    %60 = vector.load %arg6[%59, %c0_27, %c0_28] : memref<4x1x128xf32, #tpu.memory_space<vmem>>, vector<1x1x128xf32>
    %61 = vector.shape_cast %60 : vector<1x1x128xf32> to vector<1x128xf32>
    %62 = arith.index_cast %11 : i32 to index
    %c0_29 = arith.constant 0 : index
    %c0_30 = arith.constant 0 : index
    %63 = vector.load %arg7[%62, %c0_29, %c0_30] : memref<4x1x128xf32, #tpu.memory_space<vmem>>, vector<1x1x128xf32>
    %64 = vector.shape_cast %63 : vector<1x1x128xf32> to vector<1x128xf32>
    %cst_31 = arith.constant dense<0.000000e+00> : vector<64x128xf32>
    %65 = tpu.matmul %9, %55, %cst_31 {dimension_numbers = #tpu.dot_dimension_numbers<[1], [0], [0], [1], [0, 0, 1, 1], [], []>} : vector<64x128xf32>, vector<128x128xf32>, vector<64x128xf32> -> vector<64x128xf32>
    %66 = vector.broadcast %58 : vector<1x128xf32> to vector<64x128xf32>
    %67 = arith.addf %65, %66 : vector<64x128xf32>
    %cst_32 = arith.constant dense<0.000000e+00> : vector<64xf32>
    %68 = vector.multi_reduction <add>, %67, %cst_32 [1] : vector<64x128xf32> to vector<64xf32>
    %69 = vector.shape_cast %68 : vector<64xf32> to vector<64x1xf32>
    %70 = arith.mulf %67, %67 : vector<64x128xf32>
    %cst_33 = arith.constant dense<0.000000e+00> : vector<64xf32>
    %71 = vector.multi_reduction <add>, %70, %cst_33 [1] : vector<64x128xf32> to vector<64xf32>
    %72 = vector.shape_cast %71 : vector<64xf32> to vector<64x1xf32>
    %cst_34 = arith.constant 3.125000e-02 : f32
    %73 = vector.broadcast %cst_34 : f32 to vector<64x1xf32>
    %74 = arith.mulf %69, %73 : vector<64x1xf32>
    %cst_35 = arith.constant 3.125000e-02 : f32
    %75 = vector.broadcast %cst_35 : f32 to vector<64x1xf32>
    %76 = arith.mulf %72, %75 : vector<64x1xf32>
    %77 = arith.mulf %74, %74 : vector<64x1xf32>
    %78 = arith.subf %76, %77 : vector<64x1xf32>
    %cst_36 = arith.constant 0.000000e+00 : f32
    %79 = vector.broadcast %cst_36 : f32 to vector<64x1xf32>
    %80 = arith.maximumf %78, %79 : vector<64x1xf32>
    %81 = vector.broadcast %74 : vector<64x1xf32> to vector<64x128xf32>
    %82 = arith.subf %67, %81 : vector<64x128xf32>
    %cst_37 = arith.constant 9.99999974E-6 : f32
    %83 = vector.broadcast %cst_37 : f32 to vector<64x1xf32>
    %84 = arith.addf %80, %83 : vector<64x1xf32>
    %85 = math.rsqrt %84 : vector<64x1xf32>
    %86 = vector.broadcast %85 : vector<64x1xf32> to vector<64x128xf32>
    %87 = arith.mulf %82, %86 : vector<64x128xf32>
    %88 = vector.broadcast %61 : vector<1x128xf32> to vector<64x128xf32>
    %89 = arith.mulf %87, %88 : vector<64x128xf32>
    %90 = vector.broadcast %64 : vector<1x128xf32> to vector<64x128xf32>
    %91 = arith.addf %89, %90 : vector<64x128xf32>
    %cst_38 = arith.constant 0.000000e+00 : f32
    %92 = vector.broadcast %cst_38 : f32 to vector<64x128xf32>
    %93 = arith.maximumf %91, %92 : vector<64x128xf32>
    %c1_i32 = arith.constant 1 : i32
    %94 = arith.addi %10, %c1_i32 : i32
    %95 = arith.index_cast %94 : i32 to index
    %c0_39 = arith.constant 0 : index
    %c0_40 = arith.constant 0 : index
    %96 = vector.load %arg4[%95, %c0_39, %c0_40] : memref<4x128x128xf32, #tpu.memory_space<vmem>>, vector<1x128x128xf32>
    %97 = vector.shape_cast %96 : vector<1x128x128xf32> to vector<128x128xf32>
    %98 = arith.index_cast %94 : i32 to index
    %c0_41 = arith.constant 0 : index
    %c0_42 = arith.constant 0 : index
    %99 = vector.load %arg5[%98, %c0_41, %c0_42] : memref<4x1x128xf32, #tpu.memory_space<vmem>>, vector<1x1x128xf32>
    %100 = vector.shape_cast %99 : vector<1x1x128xf32> to vector<1x128xf32>
    %101 = arith.index_cast %94 : i32 to index
    %c0_43 = arith.constant 0 : index
    %c0_44 = arith.constant 0 : index
    %102 = vector.load %arg6[%101, %c0_43, %c0_44] : memref<4x1x128xf32, #tpu.memory_space<vmem>>, vector<1x1x128xf32>
    %103 = vector.shape_cast %102 : vector<1x1x128xf32> to vector<1x128xf32>
    %104 = arith.index_cast %94 : i32 to index
    %c0_45 = arith.constant 0 : index
    %c0_46 = arith.constant 0 : index
    %105 = vector.load %arg7[%104, %c0_45, %c0_46] : memref<4x1x128xf32, #tpu.memory_space<vmem>>, vector<1x1x128xf32>
    %106 = vector.shape_cast %105 : vector<1x1x128xf32> to vector<1x128xf32>
    %cst_47 = arith.constant dense<0.000000e+00> : vector<64x128xf32>
    %107 = tpu.matmul %52, %97, %cst_47 {dimension_numbers = #tpu.dot_dimension_numbers<[1], [0], [0], [1], [0, 0, 1, 1], [], []>} : vector<64x128xf32>, vector<128x128xf32>, vector<64x128xf32> -> vector<64x128xf32>
    %108 = vector.broadcast %100 : vector<1x128xf32> to vector<64x128xf32>
    %109 = arith.addf %107, %108 : vector<64x128xf32>
    %cst_48 = arith.constant dense<0.000000e+00> : vector<64xf32>
    %110 = vector.multi_reduction <add>, %109, %cst_48 [1] : vector<64x128xf32> to vector<64xf32>
    %111 = vector.shape_cast %110 : vector<64xf32> to vector<64x1xf32>
    %112 = arith.mulf %109, %109 : vector<64x128xf32>
    %cst_49 = arith.constant dense<0.000000e+00> : vector<64xf32>
    %113 = vector.multi_reduction <add>, %112, %cst_49 [1] : vector<64x128xf32> to vector<64xf32>
    %114 = vector.shape_cast %113 : vector<64xf32> to vector<64x1xf32>
    %cst_50 = arith.constant 3.125000e-02 : f32
    %115 = vector.broadcast %cst_50 : f32 to vector<64x1xf32>
    %116 = arith.mulf %111, %115 : vector<64x1xf32>
    %cst_51 = arith.constant 3.125000e-02 : f32
    %117 = vector.broadcast %cst_51 : f32 to vector<64x1xf32>
    %118 = arith.mulf %114, %117 : vector<64x1xf32>
    %119 = arith.mulf %116, %116 : vector<64x1xf32>
    %120 = arith.subf %118, %119 : vector<64x1xf32>
    %cst_52 = arith.constant 0.000000e+00 : f32
    %121 = vector.broadcast %cst_52 : f32 to vector<64x1xf32>
    %122 = arith.maximumf %120, %121 : vector<64x1xf32>
    %123 = vector.broadcast %116 : vector<64x1xf32> to vector<64x128xf32>
    %124 = arith.subf %109, %123 : vector<64x128xf32>
    %cst_53 = arith.constant 9.99999974E-6 : f32
    %125 = vector.broadcast %cst_53 : f32 to vector<64x1xf32>
    %126 = arith.addf %122, %125 : vector<64x1xf32>
    %127 = math.rsqrt %126 : vector<64x1xf32>
    %128 = vector.broadcast %127 : vector<64x1xf32> to vector<64x128xf32>
    %129 = arith.mulf %124, %128 : vector<64x128xf32>
    %130 = vector.broadcast %103 : vector<1x128xf32> to vector<64x128xf32>
    %131 = arith.mulf %129, %130 : vector<64x128xf32>
    %132 = vector.broadcast %106 : vector<1x128xf32> to vector<64x128xf32>
    %133 = arith.addf %131, %132 : vector<64x128xf32>
    %cst_54 = arith.constant 0.000000e+00 : f32
    %134 = vector.broadcast %cst_54 : f32 to vector<64x128xf32>
    %135 = arith.maximumf %133, %134 : vector<64x128xf32>
    %136 = arith.index_cast %94 : i32 to index
    %c0_55 = arith.constant 0 : index
    %c0_56 = arith.constant 0 : index
    %137 = vector.load %arg4[%136, %c0_55, %c0_56] : memref<4x128x128xf32, #tpu.memory_space<vmem>>, vector<1x128x128xf32>
    %138 = vector.shape_cast %137 : vector<1x128x128xf32> to vector<128x128xf32>
    %139 = arith.index_cast %94 : i32 to index
    %c0_57 = arith.constant 0 : index
    %c0_58 = arith.constant 0 : index
    %140 = vector.load %arg5[%139, %c0_57, %c0_58] : memref<4x1x128xf32, #tpu.memory_space<vmem>>, vector<1x1x128xf32>
    %141 = vector.shape_cast %140 : vector<1x1x128xf32> to vector<1x128xf32>
    %142 = arith.index_cast %94 : i32 to index
    %c0_59 = arith.constant 0 : index
    %c0_60 = arith.constant 0 : index
    %143 = vector.load %arg6[%142, %c0_59, %c0_60] : memref<4x1x128xf32, #tpu.memory_space<vmem>>, vector<1x1x128xf32>
    %144 = vector.shape_cast %143 : vector<1x1x128xf32> to vector<1x128xf32>
    %145 = arith.index_cast %94 : i32 to index
    %c0_61 = arith.constant 0 : index
    %c0_62 = arith.constant 0 : index
    %146 = vector.load %arg7[%145, %c0_61, %c0_62] : memref<4x1x128xf32, #tpu.memory_space<vmem>>, vector<1x1x128xf32>
    %147 = vector.shape_cast %146 : vector<1x1x128xf32> to vector<1x128xf32>
    %cst_63 = arith.constant dense<0.000000e+00> : vector<64x128xf32>
    %148 = tpu.matmul %93, %138, %cst_63 {dimension_numbers = #tpu.dot_dimension_numbers<[1], [0], [0], [1], [0, 0, 1, 1], [], []>} : vector<64x128xf32>, vector<128x128xf32>, vector<64x128xf32> -> vector<64x128xf32>
    %149 = vector.broadcast %141 : vector<1x128xf32> to vector<64x128xf32>
    %150 = arith.addf %148, %149 : vector<64x128xf32>
    %cst_64 = arith.constant dense<0.000000e+00> : vector<64xf32>
    %151 = vector.multi_reduction <add>, %150, %cst_64 [1] : vector<64x128xf32> to vector<64xf32>
    %152 = vector.shape_cast %151 : vector<64xf32> to vector<64x1xf32>
    %153 = arith.mulf %150, %150 : vector<64x128xf32>
    %cst_65 = arith.constant dense<0.000000e+00> : vector<64xf32>
    %154 = vector.multi_reduction <add>, %153, %cst_65 [1] : vector<64x128xf32> to vector<64xf32>
    %155 = vector.shape_cast %154 : vector<64xf32> to vector<64x1xf32>
    %cst_66 = arith.constant 3.125000e-02 : f32
    %156 = vector.broadcast %cst_66 : f32 to vector<64x1xf32>
    %157 = arith.mulf %152, %156 : vector<64x1xf32>
    %cst_67 = arith.constant 3.125000e-02 : f32
    %158 = vector.broadcast %cst_67 : f32 to vector<64x1xf32>
    %159 = arith.mulf %155, %158 : vector<64x1xf32>
    %160 = arith.mulf %157, %157 : vector<64x1xf32>
    %161 = arith.subf %159, %160 : vector<64x1xf32>
    %cst_68 = arith.constant 0.000000e+00 : f32
    %162 = vector.broadcast %cst_68 : f32 to vector<64x1xf32>
    %163 = arith.maximumf %161, %162 : vector<64x1xf32>
    %164 = vector.broadcast %157 : vector<64x1xf32> to vector<64x128xf32>
    %165 = arith.subf %150, %164 : vector<64x128xf32>
    %cst_69 = arith.constant 9.99999974E-6 : f32
    %166 = vector.broadcast %cst_69 : f32 to vector<64x1xf32>
    %167 = arith.addf %163, %166 : vector<64x1xf32>
    %168 = math.rsqrt %167 : vector<64x1xf32>
    %169 = vector.broadcast %168 : vector<64x1xf32> to vector<64x128xf32>
    %170 = arith.mulf %165, %169 : vector<64x128xf32>
    %171 = vector.broadcast %144 : vector<1x128xf32> to vector<64x128xf32>
    %172 = arith.mulf %170, %171 : vector<64x128xf32>
    %173 = vector.broadcast %147 : vector<1x128xf32> to vector<64x128xf32>
    %174 = arith.addf %172, %173 : vector<64x128xf32>
    %cst_70 = arith.constant 0.000000e+00 : f32
    %175 = vector.broadcast %cst_70 : f32 to vector<64x128xf32>
    %176 = arith.maximumf %174, %175 : vector<64x128xf32>
    %c2_i32_71 = arith.constant 2 : i32
    %177 = arith.addf %8, %135 : vector<64x128xf32>
    %178 = arith.addf %9, %176 : vector<64x128xf32>
    %c1_i32_72 = arith.constant 1 : i32
    %c2_i32_73 = arith.constant 2 : i32
    %179 = arith.muli %c1_i32_72, %c2_i32_73 : i32
    %c0_i32_74 = arith.constant 0 : i32
    %180 = arith.addi %179, %c0_i32_74 : i32
    %181 = arith.index_cast %180 : i32 to index
    %c0_75 = arith.constant 0 : index
    %c0_76 = arith.constant 0 : index
    %182 = vector.load %arg4[%181, %c0_75, %c0_76] : memref<4x128x128xf32, #tpu.memory_space<vmem>>, vector<1x128x128xf32>
    %183 = vector.shape_cast %182 : vector<1x128x128xf32> to vector<128x128xf32>
    %184 = arith.index_cast %180 : i32 to index
    %c0_77 = arith.constant 0 : index
    %c0_78 = arith.constant 0 : index
    %185 = vector.load %arg5[%184, %c0_77, %c0_78] : memref<4x1x128xf32, #tpu.memory_space<vmem>>, vector<1x1x128xf32>
    %186 = vector.shape_cast %185 : vector<1x1x128xf32> to vector<1x128xf32>
    %187 = arith.index_cast %180 : i32 to index
    %c0_79 = arith.constant 0 : index
    %c0_80 = arith.constant 0 : index
    %188 = vector.load %arg6[%187, %c0_79, %c0_80] : memref<4x1x128xf32, #tpu.memory_space<vmem>>, vector<1x1x128xf32>
    %189 = vector.shape_cast %188 : vector<1x1x128xf32> to vector<1x128xf32>
    %190 = arith.index_cast %180 : i32 to index
    %c0_81 = arith.constant 0 : index
    %c0_82 = arith.constant 0 : index
    %191 = vector.load %arg7[%190, %c0_81, %c0_82] : memref<4x1x128xf32, #tpu.memory_space<vmem>>, vector<1x1x128xf32>
    %192 = vector.shape_cast %191 : vector<1x1x128xf32> to vector<1x128xf32>
    %cst_83 = arith.constant dense<0.000000e+00> : vector<64x128xf32>
    %193 = tpu.matmul %177, %183, %cst_83 {dimension_numbers = #tpu.dot_dimension_numbers<[1], [0], [0], [1], [0, 0, 1, 1], [], []>} : vector<64x128xf32>, vector<128x128xf32>, vector<64x128xf32> -> vector<64x128xf32>
    %194 = vector.broadcast %186 : vector<1x128xf32> to vector<64x128xf32>
    %195 = arith.addf %193, %194 : vector<64x128xf32>
    %cst_84 = arith.constant dense<0.000000e+00> : vector<64xf32>
    %196 = vector.multi_reduction <add>, %195, %cst_84 [1] : vector<64x128xf32> to vector<64xf32>
    %197 = vector.shape_cast %196 : vector<64xf32> to vector<64x1xf32>
    %198 = arith.mulf %195, %195 : vector<64x128xf32>
    %cst_85 = arith.constant dense<0.000000e+00> : vector<64xf32>
    %199 = vector.multi_reduction <add>, %198, %cst_85 [1] : vector<64x128xf32> to vector<64xf32>
    %200 = vector.shape_cast %199 : vector<64xf32> to vector<64x1xf32>
    %cst_86 = arith.constant 3.125000e-02 : f32
    %201 = vector.broadcast %cst_86 : f32 to vector<64x1xf32>
    %202 = arith.mulf %197, %201 : vector<64x1xf32>
    %cst_87 = arith.constant 3.125000e-02 : f32
    %203 = vector.broadcast %cst_87 : f32 to vector<64x1xf32>
    %204 = arith.mulf %200, %203 : vector<64x1xf32>
    %205 = arith.mulf %202, %202 : vector<64x1xf32>
    %206 = arith.subf %204, %205 : vector<64x1xf32>
    %cst_88 = arith.constant 0.000000e+00 : f32
    %207 = vector.broadcast %cst_88 : f32 to vector<64x1xf32>
    %208 = arith.maximumf %206, %207 : vector<64x1xf32>
    %209 = vector.broadcast %202 : vector<64x1xf32> to vector<64x128xf32>
    %210 = arith.subf %195, %209 : vector<64x128xf32>
    %cst_89 = arith.constant 9.99999974E-6 : f32
    %211 = vector.broadcast %cst_89 : f32 to vector<64x1xf32>
    %212 = arith.addf %208, %211 : vector<64x1xf32>
    %213 = math.rsqrt %212 : vector<64x1xf32>
    %214 = vector.broadcast %213 : vector<64x1xf32> to vector<64x128xf32>
    %215 = arith.mulf %210, %214 : vector<64x128xf32>
    %216 = vector.broadcast %189 : vector<1x128xf32> to vector<64x128xf32>
    %217 = arith.mulf %215, %216 : vector<64x128xf32>
    %218 = vector.broadcast %192 : vector<1x128xf32> to vector<64x128xf32>
    %219 = arith.addf %217, %218 : vector<64x128xf32>
    %cst_90 = arith.constant 0.000000e+00 : f32
    %220 = vector.broadcast %cst_90 : f32 to vector<64x128xf32>
    %221 = arith.maximumf %219, %220 : vector<64x128xf32>
    %222 = arith.index_cast %180 : i32 to index
    %c0_91 = arith.constant 0 : index
    %c0_92 = arith.constant 0 : index
    %223 = vector.load %arg4[%222, %c0_91, %c0_92] : memref<4x128x128xf32, #tpu.memory_space<vmem>>, vector<1x128x128xf32>
    %224 = vector.shape_cast %223 : vector<1x128x128xf32> to vector<128x128xf32>
    %225 = arith.index_cast %180 : i32 to index
    %c0_93 = arith.constant 0 : index
    %c0_94 = arith.constant 0 : index
    %226 = vector.load %arg5[%225, %c0_93, %c0_94] : memref<4x1x128xf32, #tpu.memory_space<vmem>>, vector<1x1x128xf32>
    %227 = vector.shape_cast %226 : vector<1x1x128xf32> to vector<1x128xf32>
    %228 = arith.index_cast %180 : i32 to index
    %c0_95 = arith.constant 0 : index
    %c0_96 = arith.constant 0 : index
    %229 = vector.load %arg6[%228, %c0_95, %c0_96] : memref<4x1x128xf32, #tpu.memory_space<vmem>>, vector<1x1x128xf32>
    %230 = vector.shape_cast %229 : vector<1x1x128xf32> to vector<1x128xf32>
    %231 = arith.index_cast %180 : i32 to index
    %c0_97 = arith.constant 0 : index
    %c0_98 = arith.constant 0 : index
    %232 = vector.load %arg7[%231, %c0_97, %c0_98] : memref<4x1x128xf32, #tpu.memory_space<vmem>>, vector<1x1x128xf32>
    %233 = vector.shape_cast %232 : vector<1x1x128xf32> to vector<1x128xf32>
    %cst_99 = arith.constant dense<0.000000e+00> : vector<64x128xf32>
    %234 = tpu.matmul %178, %224, %cst_99 {dimension_numbers = #tpu.dot_dimension_numbers<[1], [0], [0], [1], [0, 0, 1, 1], [], []>} : vector<64x128xf32>, vector<128x128xf32>, vector<64x128xf32> -> vector<64x128xf32>
    %235 = vector.broadcast %227 : vector<1x128xf32> to vector<64x128xf32>
    %236 = arith.addf %234, %235 : vector<64x128xf32>
    %cst_100 = arith.constant dense<0.000000e+00> : vector<64xf32>
    %237 = vector.multi_reduction <add>, %236, %cst_100 [1] : vector<64x128xf32> to vector<64xf32>
    %238 = vector.shape_cast %237 : vector<64xf32> to vector<64x1xf32>
    %239 = arith.mulf %236, %236 : vector<64x128xf32>
    %cst_101 = arith.constant dense<0.000000e+00> : vector<64xf32>
    %240 = vector.multi_reduction <add>, %239, %cst_101 [1] : vector<64x128xf32> to vector<64xf32>
    %241 = vector.shape_cast %240 : vector<64xf32> to vector<64x1xf32>
    %cst_102 = arith.constant 3.125000e-02 : f32
    %242 = vector.broadcast %cst_102 : f32 to vector<64x1xf32>
    %243 = arith.mulf %238, %242 : vector<64x1xf32>
    %cst_103 = arith.constant 3.125000e-02 : f32
    %244 = vector.broadcast %cst_103 : f32 to vector<64x1xf32>
    %245 = arith.mulf %241, %244 : vector<64x1xf32>
    %246 = arith.mulf %243, %243 : vector<64x1xf32>
    %247 = arith.subf %245, %246 : vector<64x1xf32>
    %cst_104 = arith.constant 0.000000e+00 : f32
    %248 = vector.broadcast %cst_104 : f32 to vector<64x1xf32>
    %249 = arith.maximumf %247, %248 : vector<64x1xf32>
    %250 = vector.broadcast %243 : vector<64x1xf32> to vector<64x128xf32>
    %251 = arith.subf %236, %250 : vector<64x128xf32>
    %cst_105 = arith.constant 9.99999974E-6 : f32
    %252 = vector.broadcast %cst_105 : f32 to vector<64x1xf32>
    %253 = arith.addf %249, %252 : vector<64x1xf32>
    %254 = math.rsqrt %253 : vector<64x1xf32>
    %255 = vector.broadcast %254 : vector<64x1xf32> to vector<64x128xf32>
    %256 = arith.mulf %251, %255 : vector<64x128xf32>
    %257 = vector.broadcast %230 : vector<1x128xf32> to vector<64x128xf32>
    %258 = arith.mulf %256, %257 : vector<64x128xf32>
    %259 = vector.broadcast %233 : vector<1x128xf32> to vector<64x128xf32>
    %260 = arith.addf %258, %259 : vector<64x128xf32>
    %cst_106 = arith.constant 0.000000e+00 : f32
    %261 = vector.broadcast %cst_106 : f32 to vector<64x128xf32>
    %262 = arith.maximumf %260, %261 : vector<64x128xf32>
    %c1_i32_107 = arith.constant 1 : i32
    %263 = arith.addi %179, %c1_i32_107 : i32
    %264 = arith.index_cast %263 : i32 to index
    %c0_108 = arith.constant 0 : index
    %c0_109 = arith.constant 0 : index
    %265 = vector.load %arg4[%264, %c0_108, %c0_109] : memref<4x128x128xf32, #tpu.memory_space<vmem>>, vector<1x128x128xf32>
    %266 = vector.shape_cast %265 : vector<1x128x128xf32> to vector<128x128xf32>
    %267 = arith.index_cast %263 : i32 to index
    %c0_110 = arith.constant 0 : index
    %c0_111 = arith.constant 0 : index
    %268 = vector.load %arg5[%267, %c0_110, %c0_111] : memref<4x1x128xf32, #tpu.memory_space<vmem>>, vector<1x1x128xf32>
    %269 = vector.shape_cast %268 : vector<1x1x128xf32> to vector<1x128xf32>
    %270 = arith.index_cast %263 : i32 to index
    %c0_112 = arith.constant 0 : index
    %c0_113 = arith.constant 0 : index
    %271 = vector.load %arg6[%270, %c0_112, %c0_113] : memref<4x1x128xf32, #tpu.memory_space<vmem>>, vector<1x1x128xf32>
    %272 = vector.shape_cast %271 : vector<1x1x128xf32> to vector<1x128xf32>
    %273 = arith.index_cast %263 : i32 to index
    %c0_114 = arith.constant 0 : index
    %c0_115 = arith.constant 0 : index
    %274 = vector.load %arg7[%273, %c0_114, %c0_115] : memref<4x1x128xf32, #tpu.memory_space<vmem>>, vector<1x1x128xf32>
    %275 = vector.shape_cast %274 : vector<1x1x128xf32> to vector<1x128xf32>
    %cst_116 = arith.constant dense<0.000000e+00> : vector<64x128xf32>
    %276 = tpu.matmul %221, %266, %cst_116 {dimension_numbers = #tpu.dot_dimension_numbers<[1], [0], [0], [1], [0, 0, 1, 1], [], []>} : vector<64x128xf32>, vector<128x128xf32>, vector<64x128xf32> -> vector<64x128xf32>
    %277 = vector.broadcast %269 : vector<1x128xf32> to vector<64x128xf32>
    %278 = arith.addf %276, %277 : vector<64x128xf32>
    %cst_117 = arith.constant dense<0.000000e+00> : vector<64xf32>
    %279 = vector.multi_reduction <add>, %278, %cst_117 [1] : vector<64x128xf32> to vector<64xf32>
    %280 = vector.shape_cast %279 : vector<64xf32> to vector<64x1xf32>
    %281 = arith.mulf %278, %278 : vector<64x128xf32>
    %cst_118 = arith.constant dense<0.000000e+00> : vector<64xf32>
    %282 = vector.multi_reduction <add>, %281, %cst_118 [1] : vector<64x128xf32> to vector<64xf32>
    %283 = vector.shape_cast %282 : vector<64xf32> to vector<64x1xf32>
    %cst_119 = arith.constant 3.125000e-02 : f32
    %284 = vector.broadcast %cst_119 : f32 to vector<64x1xf32>
    %285 = arith.mulf %280, %284 : vector<64x1xf32>
    %cst_120 = arith.constant 3.125000e-02 : f32
    %286 = vector.broadcast %cst_120 : f32 to vector<64x1xf32>
    %287 = arith.mulf %283, %286 : vector<64x1xf32>
    %288 = arith.mulf %285, %285 : vector<64x1xf32>
    %289 = arith.subf %287, %288 : vector<64x1xf32>
    %cst_121 = arith.constant 0.000000e+00 : f32
    %290 = vector.broadcast %cst_121 : f32 to vector<64x1xf32>
    %291 = arith.maximumf %289, %290 : vector<64x1xf32>
    %292 = vector.broadcast %285 : vector<64x1xf32> to vector<64x128xf32>
    %293 = arith.subf %278, %292 : vector<64x128xf32>
    %cst_122 = arith.constant 9.99999974E-6 : f32
    %294 = vector.broadcast %cst_122 : f32 to vector<64x1xf32>
    %295 = arith.addf %291, %294 : vector<64x1xf32>
    %296 = math.rsqrt %295 : vector<64x1xf32>
    %297 = vector.broadcast %296 : vector<64x1xf32> to vector<64x128xf32>
    %298 = arith.mulf %293, %297 : vector<64x128xf32>
    %299 = vector.broadcast %272 : vector<1x128xf32> to vector<64x128xf32>
    %300 = arith.mulf %298, %299 : vector<64x128xf32>
    %301 = vector.broadcast %275 : vector<1x128xf32> to vector<64x128xf32>
    %302 = arith.addf %300, %301 : vector<64x128xf32>
    %cst_123 = arith.constant 0.000000e+00 : f32
    %303 = vector.broadcast %cst_123 : f32 to vector<64x128xf32>
    %304 = arith.maximumf %302, %303 : vector<64x128xf32>
    %305 = arith.index_cast %263 : i32 to index
    %c0_124 = arith.constant 0 : index
    %c0_125 = arith.constant 0 : index
    %306 = vector.load %arg4[%305, %c0_124, %c0_125] : memref<4x128x128xf32, #tpu.memory_space<vmem>>, vector<1x128x128xf32>
    %307 = vector.shape_cast %306 : vector<1x128x128xf32> to vector<128x128xf32>
    %308 = arith.index_cast %263 : i32 to index
    %c0_126 = arith.constant 0 : index
    %c0_127 = arith.constant 0 : index
    %309 = vector.load %arg5[%308, %c0_126, %c0_127] : memref<4x1x128xf32, #tpu.memory_space<vmem>>, vector<1x1x128xf32>
    %310 = vector.shape_cast %309 : vector<1x1x128xf32> to vector<1x128xf32>
    %311 = arith.index_cast %263 : i32 to index
    %c0_128 = arith.constant 0 : index
    %c0_129 = arith.constant 0 : index
    %312 = vector.load %arg6[%311, %c0_128, %c0_129] : memref<4x1x128xf32, #tpu.memory_space<vmem>>, vector<1x1x128xf32>
    %313 = vector.shape_cast %312 : vector<1x1x128xf32> to vector<1x128xf32>
    %314 = arith.index_cast %263 : i32 to index
    %c0_130 = arith.constant 0 : index
    %c0_131 = arith.constant 0 : index
    %315 = vector.load %arg7[%314, %c0_130, %c0_131] : memref<4x1x128xf32, #tpu.memory_space<vmem>>, vector<1x1x128xf32>
    %316 = vector.shape_cast %315 : vector<1x1x128xf32> to vector<1x128xf32>
    %cst_132 = arith.constant dense<0.000000e+00> : vector<64x128xf32>
    %317 = tpu.matmul %262, %307, %cst_132 {dimension_numbers = #tpu.dot_dimension_numbers<[1], [0], [0], [1], [0, 0, 1, 1], [], []>} : vector<64x128xf32>, vector<128x128xf32>, vector<64x128xf32> -> vector<64x128xf32>
    %318 = vector.broadcast %310 : vector<1x128xf32> to vector<64x128xf32>
    %319 = arith.addf %317, %318 : vector<64x128xf32>
    %cst_133 = arith.constant dense<0.000000e+00> : vector<64xf32>
    %320 = vector.multi_reduction <add>, %319, %cst_133 [1] : vector<64x128xf32> to vector<64xf32>
    %321 = vector.shape_cast %320 : vector<64xf32> to vector<64x1xf32>
    %322 = arith.mulf %319, %319 : vector<64x128xf32>
    %cst_134 = arith.constant dense<0.000000e+00> : vector<64xf32>
    %323 = vector.multi_reduction <add>, %322, %cst_134 [1] : vector<64x128xf32> to vector<64xf32>
    %324 = vector.shape_cast %323 : vector<64xf32> to vector<64x1xf32>
    %cst_135 = arith.constant 3.125000e-02 : f32
    %325 = vector.broadcast %cst_135 : f32 to vector<64x1xf32>
    %326 = arith.mulf %321, %325 : vector<64x1xf32>
    %cst_136 = arith.constant 3.125000e-02 : f32
    %327 = vector.broadcast %cst_136 : f32 to vector<64x1xf32>
    %328 = arith.mulf %324, %327 : vector<64x1xf32>
    %329 = arith.mulf %326, %326 : vector<64x1xf32>
    %330 = arith.subf %328, %329 : vector<64x1xf32>
    %cst_137 = arith.constant 0.000000e+00 : f32
    %331 = vector.broadcast %cst_137 : f32 to vector<64x1xf32>
    %332 = arith.maximumf %330, %331 : vector<64x1xf32>
    %333 = vector.broadcast %326 : vector<64x1xf32> to vector<64x128xf32>
    %334 = arith.subf %319, %333 : vector<64x128xf32>
    %cst_138 = arith.constant 9.99999974E-6 : f32
    %335 = vector.broadcast %cst_138 : f32 to vector<64x1xf32>
    %336 = arith.addf %332, %335 : vector<64x1xf32>
    %337 = math.rsqrt %336 : vector<64x1xf32>
    %338 = vector.broadcast %337 : vector<64x1xf32> to vector<64x128xf32>
    %339 = arith.mulf %334, %338 : vector<64x128xf32>
    %340 = vector.broadcast %313 : vector<1x128xf32> to vector<64x128xf32>
    %341 = arith.mulf %339, %340 : vector<64x128xf32>
    %342 = vector.broadcast %316 : vector<1x128xf32> to vector<64x128xf32>
    %343 = arith.addf %341, %342 : vector<64x128xf32>
    %cst_139 = arith.constant 0.000000e+00 : f32
    %344 = vector.broadcast %cst_139 : f32 to vector<64x128xf32>
    %345 = arith.maximumf %343, %344 : vector<64x128xf32>
    %c2_i32_140 = arith.constant 2 : i32
    %346 = arith.addf %177, %304 : vector<64x128xf32>
    %347 = arith.addf %178, %345 : vector<64x128xf32>
    %c2_i32_141 = arith.constant 2 : i32
    %c0_142 = arith.constant 0 : index
    %c0_143 = arith.constant 0 : index
    %348 = vector.load %arg8[%c0_142, %c0_143] : memref<128x128xf32, #tpu.memory_space<vmem>>, vector<128x128xf32>
    %cst_144 = arith.constant dense<0.000000e+00> : vector<64x128xf32>
    %349 = tpu.matmul %346, %348, %cst_144 {dimension_numbers = #tpu.dot_dimension_numbers<[1], [0], [0], [1], [0, 0, 1, 1], [], []>} : vector<64x128xf32>, vector<128x128xf32>, vector<64x128xf32> -> vector<64x128xf32>
    %c0_145 = arith.constant 0 : index
    %c0_146 = arith.constant 0 : index
    %350 = vector.load %arg9[%c0_145, %c0_146] : memref<1x128xf32, #tpu.memory_space<vmem>>, vector<1x128xf32>
    %351 = vector.broadcast %350 : vector<1x128xf32> to vector<64x128xf32>
    %352 = arith.addf %349, %351 : vector<64x128xf32>
    %c0_147 = arith.constant 0 : index
    %c0_148 = arith.constant 0 : index
    %353 = vector.load %arg10[%c0_147, %c0_148] : memref<128x128xf32, #tpu.memory_space<vmem>>, vector<64x128xf32>
    tpu.vector_store %arg10[%c0_147, %c0_148], %352 {strides = array<i32>} : memref<128x128xf32, #tpu.memory_space<vmem>>, vector<64x128xf32>,
    %c0_149 = arith.constant 0 : index
    %c0_150 = arith.constant 0 : index
    %354 = vector.load %arg8[%c0_149, %c0_150] : memref<128x128xf32, #tpu.memory_space<vmem>>, vector<128x128xf32>
    %cst_151 = arith.constant dense<0.000000e+00> : vector<64x128xf32>
    %355 = tpu.matmul %347, %354, %cst_151 {dimension_numbers = #tpu.dot_dimension_numbers<[1], [0], [0], [1], [0, 0, 1, 1], [], []>} : vector<64x128xf32>, vector<128x128xf32>, vector<64x128xf32> -> vector<64x128xf32>
    %c0_152 = arith.constant 0 : index
    %c0_153 = arith.constant 0 : index
    %356 = vector.load %arg9[%c0_152, %c0_153] : memref<1x128xf32, #tpu.memory_space<vmem>>, vector<1x128xf32>
    %357 = vector.broadcast %356 : vector<1x128xf32> to vector<64x128xf32>
    %358 = arith.addf %355, %357 : vector<64x128xf32>
    %c64 = arith.constant 64 : index
    %c0_154 = arith.constant 0 : index
    %359 = vector.load %arg10[%c64, %c0_154] : memref<128x128xf32, #tpu.memory_space<vmem>>, vector<64x128xf32>
    tpu.vector_store %arg10[%c64, %c0_154], %358 {strides = array<i32>} : memref<128x128xf32, #tpu.memory_space<vmem>>, vector<64x128xf32>,
    return
  }
  func.func @transform_0(%arg0: i32) -> (i32, i32) {
    %c0_i32 = arith.constant 0 : i32
    %c0_i32_0 = arith.constant 0 : i32
    return %arg0, %c0_i32 : i32, i32
  }
  func.func @transform_1(%arg0: i32) -> (i32, i32) {
    %c0_i32 = arith.constant 0 : i32
    %c0_i32_0 = arith.constant 0 : i32
    %c0_i32_1 = arith.constant 0 : i32
    return %c0_i32, %c0_i32_0 : i32, i32
  }
  func.func @transform_2(%arg0: i32) -> (i32, i32) {
    %c0_i32 = arith.constant 0 : i32
    %c0_i32_0 = arith.constant 0 : i32
    %c0_i32_1 = arith.constant 0 : i32
    return %c0_i32, %c0_i32_0 : i32, i32
  }
  func.func @transform_3(%arg0: i32) -> (i32, i32, i32) {
    %c0_i32 = arith.constant 0 : i32
    %c0_i32_0 = arith.constant 0 : i32
    %c0_i32_1 = arith.constant 0 : i32
    %c0_i32_2 = arith.constant 0 : i32
    return %c0_i32, %c0_i32_0, %c0_i32_1 : i32, i32, i32
  }
  func.func @transform_4(%arg0: i32) -> (i32, i32, i32) {
    %c0_i32 = arith.constant 0 : i32
    %c0_i32_0 = arith.constant 0 : i32
    %c0_i32_1 = arith.constant 0 : i32
    %c0_i32_2 = arith.constant 0 : i32
    return %c0_i32, %c0_i32_0, %c0_i32_1 : i32, i32, i32
  }
  func.func @transform_5(%arg0: i32) -> (i32, i32, i32) {
    %c0_i32 = arith.constant 0 : i32
    %c0_i32_0 = arith.constant 0 : i32
    %c0_i32_1 = arith.constant 0 : i32
    %c0_i32_2 = arith.constant 0 : i32
    return %c0_i32, %c0_i32_0, %c0_i32_1 : i32, i32, i32
  }
  func.func @transform_6(%arg0: i32) -> (i32, i32, i32) {
    %c0_i32 = arith.constant 0 : i32
    %c0_i32_0 = arith.constant 0 : i32
    %c0_i32_1 = arith.constant 0 : i32
    %c0_i32_2 = arith.constant 0 : i32
    return %c0_i32, %c0_i32_0, %c0_i32_1 : i32, i32, i32
  }
  func.func @transform_7(%arg0: i32) -> (i32, i32) {
    %c0_i32 = arith.constant 0 : i32
    %c0_i32_0 = arith.constant 0 : i32
    %c0_i32_1 = arith.constant 0 : i32
    return %c0_i32, %c0_i32_0 : i32, i32
  }
  func.func @transform_8(%arg0: i32) -> (i32, i32) {
    %c0_i32 = arith.constant 0 : i32
    %c0_i32_0 = arith.constant 0 : i32
    %c0_i32_1 = arith.constant 0 : i32
    return %c0_i32, %c0_i32_0 : i32, i32
  }
  func.func @transform_9(%arg0: i32) -> (i32, i32) {
    %c0_i32 = arith.constant 0 : i32
    %c0_i32_0 = arith.constant 0 : i32
    return %arg0, %c0_i32 : i32, i32
  }
}

</mosaic_0001>

<bundles_post_ra>
// kernel: tpu_custom_call.1
= control target key start
LH: loop header
LB: loop body
LE: loop exit
PB: predicated region body
PF: predicated region fallthrough
CT: control target
= control target key end

     0   :  { %6 = vsyncpa [#allocation3], 0  ;;  %s441_s0 = inlined_call_operand.hbm [shape: f32[8,128], index: 0, kind: input, shape index: {}]   ;;  %s442_s1 = inlined_call_operand.hbm [shape: f32[16,128], index: 1, kind: output, shape index: {}]  }
   0x1   :  { %7 = vsyncpa [#allocation4], 0 }
   0x2   :  { %9 = vsyncpa [#allocation4 + $0x1], 0  ;;  %s357_s6 = smov 0   ;;  %s359_s7 = smov 0  }
   0x3   :  { %s361_s8 = smov 0   ;;  %s363_s9 = smov 0  }
   0x4 LB: > { %s378_s10 = sadd.s32 4294967295, %s344_s9   ;;  %s188_s11 = sadd.s32 4294967294, %s344_s9   ;;  %s344_s9 = sphi %s363_s9, %s448_s9   ;;  %s340_s8 = sphi %s361_s8, %s447_s8   ;;  %s336_s7 = sphi %s359_s7, %s446_s7   ;;  %s332_s6 = sphi %s357_s6, %s445_s6  }
   0x5   : > { %s382_s12 = sadd.s32 1, %s344_s9   ;;  %s43_s13 = sadd.s32 1, %s340_s8 }
   0x6   : > { %s40_s14 = ssub.s32 %s344_s9, %s382_s12  ;;  %p53_p0 = scmp.ne.s32.totalorder %s340_s8, %s336_s7 }
   0x7   : > { %p41_p1 = scmp.eq.s32.totalorder %s40_s14, 0  ;;  %p54_p2 = scmp.eq.s32.totalorder %s378_s10, 1 }
   0x8   : > { %p59_p3 = scmp.ne.s32.totalorder %s336_s7, %s332_s6  ;;  %p60_p4 = scmp.eq.s32.totalorder %s188_s11, 1 }
   0x9   : > { %s393_s15 = scalar_select %p41_p1, %s340_s8, %s43_s13  }
   0xa   : > { %p395_p5 = por %p54_p2, %p53_p0  ;;  %p399_p6 = por %p60_p4, %p59_p3 }
   0xb   : > { %p189_p7 = scmp.ge.s32.totalorder %s344_s9, 1  ;;  %p67_p8 = scmp.lt.s32.totalorder %s344_s9, 3 }
   0xc   : > { %p212_p9 = scmp.eq.s32.totalorder %s378_s10, 0  ;;  %s79_s20 = sshll.u32 %s441_s0, 4  ;;  %s80_s20 = int_to_ptr.hbm [resolvable:$true] %s79_s20 }
   0xd   : > { %p68_p10 = pnand %p189_p7, %p67_p8  ;;  %s346_s21 = smov [#allocation2]  }
   0xe   : > { %s81_s22 = sshll.u32 %s346_s21, 4  ;;  %s82_s22 = int_to_ptr.vmem [resolvable:$true] %s81_s22 }
   0xf   : > { %p204_p11 = pneg %p68_p10  ;;  %94 = sbr.rel (%p68_p10) target bundleno = 37 (0x25), region = 24 }
  0x11   : > { %p205_p12 = pnand %p212_p9, %p204_p11 }
  0x13   : > { %207 = dma.hbm_to_vmem [thread:$0]  (!%p205_p12), %s80_s20, 128, %s82_s22, [#allocation3]  }
  0x14   : > { %323 = dma.done.wait (%p212_p9), [#allocation3], 128  }
  0x15   : > { %325 = vsyncadd (%p212_p9), [#allocation3], 4294967168  ;;  %s107_s23 = sand.u32 1, %s336_s7   ;;  %s195_s24 = sshll.u32 %s378_s10, 3  ;;  %v110_v0 = vld [vmem:[#allocation2] sm:$0xff] }
  0x16   : > { %s193_s25 = sshll.u32 %s107_s23, 3  ;;  %s124_s28 = scalar_lea.hbm %s442_s1, %s195_s24  ;;  %v111_v1 = vmul.f32 2.0, %v110_v0 }
  0x17   : > { %s109_s29 = scalar_lea.vmem [#allocation5], %s193_s25  ;;  %s128_s2 = sshll.u32 %s124_s28, 4  ;;  %s129_s2 = int_to_ptr.hbm [resolvable:$true] %s128_s2 }
  0x18   : > { %s126_s30 = sshll.u32 %s109_s29, 4  ;;  %112 = vst [vmem:[%s109_s29] sm:$0xff] %v111_v1  ;;  %s114_s3 = scalar_lea.sflag [#allocation4], %s107_s23  ;;  %s127_s30 = int_to_ptr.vmem [resolvable:$true] %s126_s30 }
  0x19   : > { %s292_s4 = sshra.s32 %s129_s2, 4  ;;  %s298_s13 = scalar_lea.hbm %s442_s1, 16  ;;  %s293_s4 = int_to_ptr.hbm [resolvable:$true] %s292_s4 }
  0x1a   : > { %s294_s5 = scalar_lea.hbm %s293_s4, 8  ;;  %p299_p2 = scmp.lt.s32.totalorder %s293_s4, %s442_s1 }
  0x1b   : > { %p295_p13 = scmp.ne.s32.totalorder %s293_s4, %s294_s5  ;;  %p300_p3 = scmp.lt.s32.totalorder %s298_s13, %s294_s5 }
  0x1d   : > { %p296_p0 = pnand %p295_p13, %p395_p5  ;;  %p301_p4 = por %p300_p3, %p299_p2 }
  0x1f   : > { %p297_p1 = pneg %p296_p0 }
  0x21   : > { %p302_p7 = pnand %p301_p4, %p297_p1 }
  0x23   : > { %305 = shalt.err (!%p302_p7)
}
  0x24   : > { %202 = dma.vmem_to_hbm [thread:$0]  (%p395_p5), %s127_s30, 128, %s129_s2, %s114_s3  }
  0x25 PF: > { %p214_p8 = scmp.ge.s32.totalorder %s344_s9, 2  ;;  %s140_s19 = sand.u32 1, %s332_s6  }
  0x26   : > { %s141_s20 = scalar_lea.sflag [#allocation4], %s140_s19 }
  0x27   : > { %p209_p9 = pnand %p214_p8, %p399_p6 }
  0x29   : > { %p210_p10 = pneg %p209_p9 }
  0x2b   : > { %327 = dma.done.wait (%p210_p10), %s141_s20, 128  }
  0x2c   : > { %329 = vsyncadd (%p210_p10), %s141_s20, 4294967168  ;;  %p12_p11 = scmp.ge.s32.totalorder %s382_s12, 4   ;;  %s445_s6 = smov %s336_s7 }
  0x2d   : > { %s446_s7 = smov %s340_s8  ;;  %s447_s8 = smov %s393_s15 }
  0x2e   : > { %s448_s9 = smov %s382_s12  ;;  %14 = sbr.rel (!%p12_p11) target bundleno = 4 (0x4), region = 61 }
  0x33   :  { %147 = vsyncpa [#allocation3], 1 }
  0x34   :  { %149 = vsyncpa [#allocation3 + $0x1], 1 }
  0x35   :  { %150 = vsyncpa [#allocation4], 1 }
  0x36   :  { %152 = vsyncpa [#allocation4 + $0x1], 1 }

// kernel: tpu_custom_call.1
= control target key start
LH: loop header
LB: loop body
LE: loop exit
PB: predicated region body
PF: predicated region fallthrough
CT: control target
= control target key end

     0   :  { %14 = vsyncpa [#allocation3], 0  ;;  %s5154_s0 = inlined_call_operand.vmem [shape: f32[256,16], index: 0, kind: input, shape index: {}]   ;;  %s5155_s1 = inlined_call_operand.vmem [shape: f32[16,128], index: 1, kind: input, shape index: {}]   ;;  %s5156_s2 = inlined_call_operand.vmem [shape: f32[1,128], index: 2, kind: input, shape index: {}]   ;;  %s5157_s3 = inlined_call_operand.hbm [shape: f32[4,128,128], index: 3, kind: input, shape index: {}]   ;;  %s5158_s4 = inlined_call_operand.vmem [shape: f32[4,1,128], index: 4, kind: input, shape index: {}]   ;;  %s5159_s5 = inlined_call_operand.vmem [shape: f32[4,1,128], index: 5, kind: input, shape index: {}]   ;;  %s5160_s6 = inlined_call_operand.vmem [shape: f32[4,1,128], index: 6, kind: input, shape index: {}]   ;;  %s5161_s7 = inlined_call_operand.vmem [shape: f32[128,128], index: 7, kind: input, shape index: {}]   ;;  %s5162_s8 = inlined_call_operand.vmem [shape: f32[1,128], index: 8, kind: input, shape index: {}]   ;;  %s5163_s9 = inlined_call_operand.hbm [shape: f32[256,128], index: 9, kind: output, shape index: {}]  }
   0x1   :  { %15 = vsyncpa [#allocation4], 0 }
   0x2   :  { %17 = vsyncpa [#allocation4 + $0x1], 0  ;;  %s3269_s30 = smov 0   ;;  %s3271_s10 = smov 0  }
   0x3   :  { %s3273_s11 = smov 0   ;;  %s3275_s12 = smov 0  }
   0x4 LB: > { %s3290_s13 = sadd.s32 4294967295, %s3212_s12   ;;  %s2879_s14 = sadd.s32 4294967294, %s3212_s12   ;;  %s3212_s12 = sphi %s3275_s12, %s5245_s12   ;;  %s3208_s11 = sphi %s3273_s11, %s5244_s11   ;;  %s3204_s10 = sphi %s3271_s10, %s5243_s10   ;;  %s3200_s30 = sphi %s3269_s30, %s5242_s30  }
   0x5   : > { %s3294_s15 = sadd.s32 1, %s3212_s12   ;;  %s224_s16 = sadd.s32 1, %s3208_s11 }
   0x6   : > { %s221_s17 = ssub.s32 %s3212_s12, %s3294_s15  ;;  %p234_p0 = scmp.ne.s32.totalorder %s3208_s11, %s3204_s10 }
   0x7   : > { %p222_p1 = scmp.eq.s32.totalorder %s221_s17, 0  ;;  %p235_p2 = scmp.eq.s32.totalorder %s3290_s13, 1 }
   0x8   : > { %p240_p3 = scmp.ne.s32.totalorder %s3204_s10, %s3200_s30  ;;  %p241_p4 = scmp.eq.s32.totalorder %s2879_s14, 1 }
   0x9   : > { %s3305_s18 = scalar_select %p222_p1, %s3208_s11, %s224_s16  }
   0xa   : > { %p3307_p5 = por %p235_p2, %p234_p0  ;;  %p3311_p6 = por %p241_p4, %p240_p3 }
   0xb   : > { %p2880_p7 = scmp.ge.s32.totalorder %s3212_s12, 1  ;;  %p248_p8 = scmp.lt.s32.totalorder %s3212_s12, 3 }
   0xc   : > { %p2933_p9 = scmp.eq.s32.totalorder %s3290_s13, 0  ;;  %s265_s23 = sshll.u32 %s5157_s3, 4  ;;  %s266_s23 = int_to_ptr.hbm [resolvable:$true] %s265_s23 }
   0xd   : > { %p249_p10 = pnand %p2880_p7, %p248_p8  ;;  %s3214_s24 = smov [#allocation2]  }
   0xe   : > { %s267_s25 = sshll.u32 %s3214_s24, 4  ;;  %s3215_s26 = smov 128   ;;  %s268_s25 = int_to_ptr.vmem [resolvable:$true] %s267_s25 }
   0xf   : > { %p2925_p11 = pneg %p249_p10  ;;  %s3216_s27 = smov 8  }
  0x10   : > { %307 = sbr.rel (%p249_p10) target bundleno = 1602 (0x642), region = 56 }
  0x11   : > { %p2926_p12 = pnand %p2933_p9, %p2925_p11 }
  0x13   : > { %2928 = dma.hbm_to_vmem [thread:$0]  (!%p2926_p12), %s266_s23, 8192, %s268_s25, [#allocation3], %s3215_s26, %s3215_s26, %s3216_s27  }
  0x15   : > { %3191 = dma.done.wait (%p2933_p9), [#allocation3], 8192  }
  0x16   : > { %3193 = vsyncadd (%p2933_p9), [#allocation3], 4294959104  ;;  %s2886_s28 = sshll.u32 %s3290_s13, 4  ;;  %v368_v0 = vld [vmem:[%s5155_s1 + $0x8] sm:$0xff]  ;;  %v367_v1 = vld [vmem:[%s5155_s1] sm:$0xff]  ;;  %vm373_vm0 = vcmask 130048  }
  0x17   : > { %p345_p13 = scmp.lt.s32.totalorder %s2886_s28, 31  ;;  %436 = vmatpush.msra.mxu0 %v368_v0  ;;  %v518_v11 = vld [vmem:[#allocation2 + $0x78] sm:$0xff]  ;;  %v517_v12 = vld [vmem:[#allocation2 + $0x70] sm:$0xff]  ;;  %v516_v13 = vld [vmem:[#allocation2 + $0x68] sm:$0xff]  ;;  %s341_s23 = sand.u32 1, %s3204_s10  }
  0x18   : > { %525 = vmatpush.msra.mxu1 %v518_v11  ;;  %780 = vmatpush.msra.mxu2 %v518_v11  ;;  %v515_v15 = vld [vmem:[#allocation2 + $0x60] sm:$0xff]  ;;  %v514_v16 = vld [vmem:[#allocation2 + $0x58] sm:$0xff]  ;;  %v513_v17 = vld [vmem:[#allocation2 + $0x50] sm:$0xff]  ;;  %s2885_s24 = sshll.u32 %s341_s23, 7  ;;  %s2918_s14 = sshll.u32 %s3290_s13, 7 }
  0x19   : > { %s5247_s28 = smov (!%p345_p13, %s2886_s28), 31  ;;  %437 = vmatpush.msra.mxu0 %v367_v1  ;;  %v512_v18 = vld [vmem:[#allocation2 + $0x48] sm:$0xff]  ;;  %v511_v20 = vld [vmem:[#allocation2 + $0x40] sm:$0xff]  ;;  %v510_v21 = vld [vmem:[#allocation2 + $0x38] sm:$0xff]  ;;  %s5044_s27 = scalar_lea.vmem [#allocation5], %s2885_s24 }
  0x1a   : > { %s2887_s29 = sshll.u32 %s5247_s28, 3  ;;  %526 = vmatpush.msra.mxu1 %v517_v12  ;;  %781 = vmatpush.msra.mxu2 %v517_v12  ;;  %v509_v22 = vld [vmem:[#allocation2 + $0x30] sm:$0xff]  ;;  %v508_v23 = vld [vmem:[#allocation2 + $0x28] sm:$0xff]  ;;  %v507_v25 = vld [vmem:[#allocation2 + $0x20] sm:$0xff]  ;;  %s2801_s21 = scalar_lea.hbm %s5163_s9, %s2918_s14 }
  0x1b   : > { %s3331_s17 = scalar_lea.vmem %s5154_s0, %s2887_s29  ;;  %v506_v26 = vld [vmem:[#allocation2 + $0x18] sm:$0xff]  ;;  %v505_v27 = vld [vmem:[#allocation2 + $0x10] sm:$0xff]  ;;  %v504_v29 = vld [vmem:[#allocation2 + $0x8] sm:$0xff]  ;;  %s2802_s22 = sshll.u32 %s5044_s27, 4  ;;  %s2803_s22 = int_to_ptr.vmem [resolvable:$true] %s2802_s22 }
  0x1c   : > { %v351_v2 = vld [vmem:[%s3331_s17] sm:$0xff]  ;;  %v352_v3 = vld [vmem:[%s3331_s17 + $0x8] sm:$0xff]  ;;  %v353_v4 = vld [vmem:[%s3331_s17 + $0x10] sm:$0xff]  ;;  %527 = vmatpush.msra.mxu1 %v516_v13  ;;  %782 = vmatpush.msra.mxu2 %v516_v13  ;;  %s2804_s24 = sshll.u32 %s2801_s21, 4  ;;  %s2790_s13 = scalar_lea.sflag [#allocation4], %s341_s23  ;;  %s2805_s24 = int_to_ptr.hbm [resolvable:$true] %s2804_s24 }
  0x1d   : > { %2888 = vmatmul.msk.f32.vlgmr.msra.gmra.mxu0 %vm373_vm0, %v351_v2  ;;  %v354_v5 = vld [vmem:[%s3331_s17 + $0x18] sm:$0xff]  ;;  %v355_v6 = vld [vmem:[%s3331_s17 + $0x20] sm:$0xff]  ;;  %v356_v7 = vld [vmem:[%s3331_s17 + $0x28] sm:$0xff]  ;;  %s3160_s25 = sshra.s32 %s2805_s24, 4  ;;  %s3166_s14 = scalar_lea.hbm %s5163_s9, 256  ;;  %s3161_s25 = int_to_ptr.hbm [resolvable:$true] %s3160_s25 }
  0x1e   : > { %v357_v8 = vld [vmem:[%s3331_s17 + $0x30] sm:$0xff]  ;;  %v358_v9 = vld [vmem:[%s3331_s17 + $0x38] sm:$0xff]  ;;  %v359_v10 = vld [vmem:[%s3331_s17 + $0x40] sm:$0xff]  ;;  %528 = vmatpush.msra.mxu1 %v515_v15  ;;  %783 = vmatpush.msra.mxu2 %v515_v15  ;;  %s3162_s26 = scalar_lea.hbm %s3161_s25, 128  ;;  %p3167_p3 = scmp.lt.s32.totalorder %s3161_s25, %s5163_s9 }
  0x1f   : > { %v360_v14 = vld [vmem:[%s3331_s17 + $0x48] sm:$0xff]  ;;  %v361_v19 = vld [vmem:[%s3331_s17 + $0x50] sm:$0xff]  ;;  %v362_v24 = vld [vmem:[%s3331_s17 + $0x58] sm:$0xff]  ;;  %p3163_p0 = scmp.ne.s32.totalorder %s3161_s25, %s3162_s26  ;;  %p3168_p4 = scmp.lt.s32.totalorder %s3166_s14, %s3162_s26 }
  0x20   : > { %529 = vmatpush.msra.mxu1 %v514_v16  ;;  %784 = vmatpush.msra.mxu2 %v514_v16  ;;  %v363_v28 = vld [vmem:[%s3331_s17 + $0x60] sm:$0xff]  ;;  %v364_v31 = vld [vmem:[%s3331_s17 + $0x68] sm:$0xff]  ;;  %v365_v32 = vld [vmem:[%s3331_s17 + $0x70] sm:$0xff] }
  0x21   : > { %v503_v30 = vld [vmem:[#allocation2] sm:$0xff]  ;;  %v366_v33 = vld [vmem:[%s3331_s17 + $0x78] sm:$0xff]  ;;  %p3164_p1 = pnand %p3163_p0, %p3307_p5  ;;  %p3169_p7 = por %p3168_p4, %p3167_p3 }
  0x22   : > { %530 = vmatpush.msra.mxu1 %v513_v17  ;;  %785 = vmatpush.msra.mxu2 %v513_v17  ;;  %v2973_v34 = vld [vmem:[%s5156_s2] ss:$0 sm:$0xff] }
  0x23   : > { %p3165_p2 = pneg %p3164_p1 }
  0x24   : > { %531 = vmatpush.msra.mxu1 %v512_v18  ;;  %786 = vmatpush.msra.mxu2 %v512_v18 }
  0x25   : > { %2889 = vmatmul.msk.f32.gmra.mxu0 %vm373_vm0, %v352_v3  ;;  %p3170_p8 = pnand %p3169_p7, %p3165_p2 }
  0x26   : > { %532 = vmatpush.msra.mxu1 %v511_v20  ;;  %787 = vmatpush.msra.mxu2 %v511_v20 }
  0x28   : > { %533 = vmatpush.msra.mxu1 %v510_v21  ;;  %788 = vmatpush.msra.mxu2 %v510_v21 }
  0x2a   : > { %534 = vmatpush.msra.mxu1 %v509_v22  ;;  %789 = vmatpush.msra.mxu2 %v509_v22 }
  0x2c   : > { %535 = vmatpush.msra.mxu1 %v508_v23  ;;  %790 = vmatpush.msra.mxu2 %v508_v23 }
  0x2d   : > { %2890 = vmatmul.msk.f32.gmra.mxu0 %vm373_vm0, %v353_v4 }
  0x2e   : > { %536 = vmatpush.msra.mxu1 %v507_v25  ;;  %791 = vmatpush.msra.mxu2 %v507_v25 }
  0x30   : > { %537 = vmatpush.msra.mxu1 %v506_v26  ;;  %792 = vmatpush.msra.mxu2 %v506_v26 }
  0x32   : > { %538 = vmatpush.msra.mxu1 %v505_v27  ;;  %793 = vmatpush.msra.mxu2 %v505_v27 }
  0x34   : > { %539 = vmatpush.msra.mxu1 %v504_v29  ;;  %794 = vmatpush.msra.mxu2 %v504_v29 }
  0x35   : > { %2891 = vmatmul.msk.f32.gmra.mxu0 %vm373_vm0, %v354_v5 }
  0x36   : > { %540 = vmatpush.msra.mxu1 %v503_v30  ;;  %795 = vmatpush.msra.mxu2 %v503_v30 }
  0x3d   : > { %2892 = vmatmul.msk.f32.gmra.mxu0 %vm373_vm0, %v355_v6 }
  0x45   : > { %2893 = vmatmul.msk.f32.gmra.mxu0 %vm373_vm0, %v356_v7 }
  0x4d   : > { %2894 = vmatmul.msk.f32.gmra.mxu0 %vm373_vm0, %v357_v8 }
  0x55   : > { %2895 = vmatmul.msk.f32.gmra.mxu0 %vm373_vm0, %v358_v9 }
  0x5d   : > { %2896 = vmatmul.msk.f32.gmra.mxu0 %vm373_vm0, %v359_v10 }
  0x65   : > { %2897 = vmatmul.msk.f32.gmra.mxu0 %vm373_vm0, %v360_v14 }
  0x6d   : > { %2898 = vmatmul.msk.f32.gmra.mxu0 %vm373_vm0, %v361_v19  ;;  %v3457_v19 = vld [vmem:[%s5158_s4] ss:$0 sm:$0xff] }
  0x75   : > { %2899 = vmatmul.msk.f32.gmra.mxu0 %vm373_vm0, %v362_v24 }
  0x7d   : > { %2900 = vmatmul.msk.f32.gmra.mxu0 %vm373_vm0, %v363_v28 }
  0x85   : > { %2901 = vmatmul.msk.f32.gmra.mxu0 %vm373_vm0, %v364_v31 }
  0x8d   : > { %2902 = vmatmul.msk.f32.gmra.mxu0 %vm373_vm0, %v365_v32 }
  0x95   : > { %2903 = vmatmul.msk.f32.gmra.mxu0 %vm373_vm0, %v366_v33 }
  0x9a   : > { %v439_v35 = vpop.f32.mrf.mxu0 }
  0x9b   : > { %v3374_v36 = vadd.f32 %v2973_v34, %v439_v35 }
  0x9d   : > { %v487_v37 = vmax.f32 %v3374_v36, 0.0 }
  0x9f   : > { %541 = vmatmul.f32.vlgmr.msra.gmra.mxu1 %v487_v37 }
  0xa2   : > { %v442_v38 = vpop.f32.mrf.mxu0 }
  0xa3   : > { %v3379_v39 = vadd.f32 %v2973_v34, %v442_v38 }
  0xa5   : > { %v5178_v40 = vmax.f32 %v3379_v39, 0.0 }
  0xa7   : > { %544 = vmatmul.f32.gmra.mxu1 %v5178_v40 }
  0xaa   : > { %v445_v41 = vpop.f32.mrf.mxu0 }
  0xab   : > { %v3384_v42 = vadd.f32 %v2973_v34, %v445_v41 }
  0xad   : > { %v5177_v43 = vmax.f32 %v3384_v42, 0.0 }
  0xaf   : > { %547 = vmatmul.f32.gmra.mxu1 %v5177_v43 }
  0xb2   : > { %v448_v44 = vpop.f32.mrf.mxu0 }
  0xb3   : > { %v3389_v45 = vadd.f32 %v2973_v34, %v448_v44 }
  0xb5   : > { %v5176_v46 = vmax.f32 %v3389_v45, 0.0 }
  0xb7   : > { %550 = vmatmul.f32.gmra.mxu1 %v5176_v46 }
  0xba   : > { %v451_v47 = vpop.f32.mrf.mxu0 }
  0xbb   : > { %v3394_v48 = vadd.f32 %v2973_v34, %v451_v47 }
  0xbd   : > { %v5173_v49 = vmax.f32 %v3394_v48, 0.0 }
  0xbf   : > { %553 = vmatmul.f32.gmra.mxu1 %v5173_v49 }
  0xc2   : > { %v454_v50 = vpop.f32.mrf.mxu0 }
  0xc3   : > { %v3399_v51 = vadd.f32 %v2973_v34, %v454_v50 }
  0xc5   : > { %v5171_v52 = vmax.f32 %v3399_v51, 0.0 }
  0xc7   : > { %556 = vmatmul.f32.gmra.mxu1 %v5171_v52 }
  0xca   : > { %v457_v53 = vpop.f32.mrf.mxu0 }
  0xcb   : > { %v3404_v54 = vadd.f32 %v2973_v34, %v457_v53 }
  0xcd   : > { %v5168_v55 = vmax.f32 %v3404_v54, 0.0 }
  0xcf   : > { %559 = vmatmul.f32.gmra.mxu1 %v5168_v55 }
  0xd2   : > { %v460_v56 = vpop.f32.mrf.mxu0 }
  0xd3   : > { %v3409_v57 = vadd.f32 %v2973_v34, %v460_v56 }
  0xd5   : > { %v5166_v58 = vmax.f32 %v3409_v57, 0.0 }
  0xd7   : > { %562 = vmatmul.f32.gmra.mxu1 %v5166_v58 }
  0xda   : > { %v463_v59 = vpop.f32.mrf.mxu0 }
  0xdb   : > { %v3414_v60 = vadd.f32 %v2973_v34, %v463_v59 }
  0xdd   : > { %v5175_v61 = vmax.f32 %v3414_v60, 0.0 }
  0xdf   : > { %796 = vmatmul.f32.vlgmr.msra.gmra.mxu2 %v5175_v61 }
  0xe2   : > { %v466_v62 = vpop.f32.mrf.mxu0 }
  0xe3   : > { %v3419_v63 = vadd.f32 %v2973_v34, %v466_v62 }
  0xe5   : > { %v5174_v0 = vmax.f32 %v3419_v63, 0.0 }
  0xe7   : > { %799 = vmatmul.f32.gmra.mxu2 %v5174_v0 }
  0xea   : > { %v469_v1 = vpop.f32.mrf.mxu0 }
  0xeb   : > { %v3424_v2 = vadd.f32 %v2973_v34, %v469_v1 }
  0xed   : > { %v5172_v3 = vmax.f32 %v3424_v2, 0.0 }
  0xef   : > { %802 = vmatmul.f32.gmra.mxu2 %v5172_v3 }
  0xf2   : > { %v472_v4 = vpop.f32.mrf.mxu0 }
  0xf3   : > { %v3429_v5 = vadd.f32 %v2973_v34, %v472_v4 }
  0xf5   : > { %v5170_v6 = vmax.f32 %v3429_v5, 0.0 }
  0xf7   : > { %805 = vmatmul.f32.gmra.mxu2 %v5170_v6 }
  0xfa   : > { %v475_v7 = vpop.f32.mrf.mxu0 }
  0xfb   : > { %v3434_v8 = vadd.f32 %v2973_v34, %v475_v7 }
  0xfd   : > { %v5169_v9 = vmax.f32 %v3434_v8, 0.0 }
  0xff   : > { %808 = vmatmul.f32.gmra.mxu2 %v5169_v9 }
 0x102   : > { %v478_v10 = vpop.f32.mrf.mxu0 }
 0x103   : > { %v3439_v11 = vadd.f32 %v2973_v34, %v478_v10 }
 0x105   : > { %v5167_v12 = vmax.f32 %v3439_v11, 0.0 }
 0x107   : > { %811 = vmatmul.f32.gmra.mxu2 %v5167_v12 }
 0x10a   : > { %v481_v13 = vpop.f32.mrf.mxu0 }
 0x10b   : > { %v3444_v14 = vadd.f32 %v2973_v34, %v481_v13  ;;  %v1045_v13 = vld [vmem:[#allocation2 + $0xf8] sm:$0xff] }
 0x10c   : > { %1055 = vmatpush.msra.mxu3 %v1045_v13  ;;  %1310 = vmatpush.msrb.mxu1 %v1045_v13 }
 0x10d   : > { %v5165_v15 = vmax.f32 %v3444_v14, 0.0 }
 0x10f   : > { %814 = vmatmul.f32.gmra.mxu2 %v5165_v15 }
 0x112   : > { %v484_v16 = vpop.f32.mrf.mxu0 }
 0x113   : > { %v3449_v17 = vadd.f32 %v2973_v34, %v484_v16  ;;  %v1044_v16 = vld [vmem:[#allocation2 + $0xf0] sm:$0xff] }
 0x114   : > { %1056 = vmatpush.msra.mxu3 %v1044_v16  ;;  %1311 = vmatpush.msrb.mxu1 %v1044_v16  ;;  %v1035_v16 = vld [vmem:[#allocation2 + $0xa8] sm:$0xff] }
 0x115   : > { %v5164_v18 = vmax.f32 %v3449_v17, 0.0 }
 0x117   : > { %817 = vmatmul.f32.gmra.mxu2 %v5164_v18 }
 0x11c   : > { %v542_v20 = vpop.f32.mrf.mxu1 }
 0x11d   : > { %v3460_v21 = vadd.f32 %v3457_v19, %v542_v20 }
 0x11f   : > { %566 = vadd.xlane.f32.xlu0 %v3460_v21  ;;  %v582_v24 = vmul.f32 %v3460_v21, %v3460_v21 }
 0x124   : > { %v545_v22 = vpop.f32.mrf.mxu1 }
 0x125   : > { %v3464_v23 = vadd.f32 %v3457_v19, %v545_v22  ;;  %v1043_v22 = vld [vmem:[#allocation2 + $0xe8] sm:$0xff] }
 0x126   : > { %1057 = vmatpush.msra.mxu3 %v1043_v22  ;;  %1312 = vmatpush.msrb.mxu1 %v1043_v22 }
 0x127   : > { %568 = vadd.xlane.f32.xlu1 %v3464_v23  ;;  %590 = vadd.xlane.f32.xlu0 %v582_v24  ;;  %v583_v25 = vmul.f32 %v3464_v23, %v3464_v23 }
 0x129   : > { %592 = vadd.xlane.f32.xlu2 %v583_v25 }
 0x12c   : > { %v548_v26 = vpop.f32.mrf.mxu1 }
 0x12d   : > { %v3472_v27 = vadd.f32 %v3457_v19, %v548_v26  ;;  %v1042_v26 = vld [vmem:[#allocation2 + $0xe0] sm:$0xff] }
 0x12e   : > { %1058 = vmatpush.msra.mxu3 %v1042_v26  ;;  %1313 = vmatpush.msrb.mxu1 %v1042_v26 }
 0x12f   : > { %570 = vadd.xlane.f32.xlu1 %v3472_v27  ;;  %v584_v28 = vmul.f32 %v3472_v27, %v3472_v27 }
 0x131   : > { %594 = vadd.xlane.f32.xlu0 %v584_v28 }
 0x134   : > { %v551_v29 = vpop.f32.mrf.mxu1 }
 0x135   : > { %v3478_v30 = vadd.f32 %v3457_v19, %v551_v29  ;;  %v1041_v29 = vld [vmem:[#allocation2 + $0xd8] sm:$0xff] }
 0x136   : > { %1059 = vmatpush.msra.mxu3 %v1041_v29  ;;  %1314 = vmatpush.msrb.mxu1 %v1041_v29 }
 0x137   : > { %572 = vadd.xlane.f32.xlu2 %v3478_v30  ;;  %v585_v44 = vmul.f32 %v3478_v30, %v3478_v30 }
 0x13c   : > { %v554_v31 = vpop.f32.mrf.mxu1 }
 0x13d   : > { %v3482_v32 = vadd.f32 %v3457_v19, %v554_v31 }
 0x13f   : > { %574 = vadd.xlane.f32.xlu0 %v3482_v32  ;;  %v586_v56 = vmul.f32 %v3482_v32, %v3482_v32 }
 0x144   : > { %v557_v62 = vpop.f32.mrf.mxu1 }
 0x145   : > { %v3508_v1 = vadd.f32 %v3457_v19, %v557_v62  ;;  %v1036_v62 = vld [vmem:[#allocation2 + $0xb0] sm:$0xff] }
 0x147   : > { %v587_v10 = vmul.f32 %v3508_v1, %v3508_v1 }
 0x14c   : > { %v560_v31 = vpop.f32.mrf.mxu1 }
 0x162   : > { %v797_v33 = vpop.f32.mrf.mxu2 }
 0x163   : > { %v3486_v34 = vadd.f32 %v3457_v19, %v797_v33  ;;  %v1040_v33 = vld [vmem:[#allocation2 + $0xd0] sm:$0xff] }
 0x164   : > { %1060 = vmatpush.msra.mxu3 %v1040_v33  ;;  %1315 = vmatpush.msrb.mxu1 %v1040_v33 }
 0x165   : > { %821 = vadd.xlane.f32.xlu1 %v3486_v34  ;;  %v837_v35 = vmul.f32 %v3486_v34, %v3486_v34 }
 0x167   : > { %845 = vadd.xlane.f32.xlu2 %v837_v35 }
 0x16a   : > { %v800_v38 = vpop.f32.mrf.mxu2 }
 0x16b   : > { %v3492_v41 = vadd.f32 %v3457_v19, %v800_v38  ;;  %v1039_v38 = vld [vmem:[#allocation2 + $0xc8] sm:$0xff] }
 0x16c   : > { %1061 = vmatpush.msra.mxu3 %v1039_v38  ;;  %1316 = vmatpush.msrb.mxu1 %v1039_v38 }
 0x16d   : > { %596 = vadd.xlane.f32.xlu1 %v585_v44  ;;  %823 = vadd.xlane.f32.xlu0 %v3492_v41  ;;  %v838_v47 = vmul.f32 %v3492_v41, %v3492_v41 }
 0x16f   : > { %847 = vadd.xlane.f32.xlu2 %v838_v47  ;;  %v1038_v47 = vld [vmem:[#allocation2 + $0xc0] sm:$0xff] }
 0x170   : > { %1062 = vmatpush.msra.mxu3 %v1038_v47  ;;  %1317 = vmatpush.msrb.mxu1 %v1038_v47  ;;  %v1031_v47 = vld [vmem:[#allocation2 + $0x88] sm:$0xff] }
 0x172   : > { %v803_v50 = vpop.f32.mrf.mxu2 }
 0x173   : > { %v3500_v53 = vadd.f32 %v3457_v19, %v803_v50  ;;  %v3529_v50 = vadd.f32 %v3457_v19, %v560_v31  ;;  %v1032_v31 = vld [vmem:[#allocation2 + $0x90] sm:$0xff] }
 0x175   : > { %825 = vadd.xlane.f32.xlu1 %v3500_v53  ;;  %v839_v59 = vmul.f32 %v3500_v53, %v3500_v53  ;;  %v588_v22 = vmul.f32 %v3529_v50, %v3529_v50 }
 0x177   : > { %598 = vadd.xlane.f32.xlu2 %v586_v56  ;;  %849 = vadd.xlane.f32.xlu0 %v839_v59  ;;  %v1037_v59 = vld [vmem:[#allocation2 + $0xb8] sm:$0xff] }
 0x178   : > { %1063 = vmatpush.msra.mxu3 %v1037_v59  ;;  %1318 = vmatpush.msrb.mxu1 %v1037_v59 }
 0x17a   : > { %v806_v4 = vpop.f32.mrf.mxu2  ;;  %1064 = vmatpush.msra.mxu3 %v1036_v62  ;;  %1319 = vmatpush.msrb.mxu1 %v1036_v62 }
 0x17b   : > { %v3511_v7 = vadd.f32 %v3457_v19, %v806_v4  ;;  %v563_v4 = vpop.f32.mrf.mxu1 }
 0x17c   : > { %1065 = vmatpush.msra.mxu3 %v1035_v16  ;;  %1320 = vmatpush.msrb.mxu1 %v1035_v16  ;;  %v3541_v26 = vadd.f32 %v3457_v19, %v563_v4 }
 0x17d   : > { %576 = vadd.xlane.f32.xlu1 %v3508_v1  ;;  %v840_v20 = vmul.f32 %v3511_v7, %v3511_v7 }
 0x17f   : > { %827 = vadd.xlane.f32.xlu2 %v3511_v7  ;;  %600 = vadd.xlane.f32.xlu0 %v587_v10 }
 0x182   : > { %v809_v24 = vpop.f32.mrf.mxu2 }
 0x183   : > { %v3520_v25 = vadd.f32 %v3457_v19, %v809_v24  ;;  %v1034_v24 = vld [vmem:[#allocation2 + $0xa0] sm:$0xff] }
 0x184   : > { %1066 = vmatpush.msra.mxu3 %v1034_v24  ;;  %1321 = vmatpush.msrb.mxu1 %v1034_v24 }
 0x185   : > { %851 = vadd.xlane.f32.xlu1 %v840_v20  ;;  %v841_v28 = vmul.f32 %v3520_v25, %v3520_v25 }
 0x187   : > { %853 = vadd.xlane.f32.xlu2 %v841_v28  ;;  %829 = vadd.xlane.f32.xlu0 %v3520_v25  ;;  %v1033_v28 = vld [vmem:[#allocation2 + $0x98] sm:$0xff] }
 0x188   : > { %1067 = vmatpush.msra.mxu3 %v1033_v28  ;;  %1322 = vmatpush.msrb.mxu1 %v1033_v28 }
 0x18a   : > { %v812_v35 = vpop.f32.mrf.mxu2  ;;  %1068 = vmatpush.msra.mxu3 %v1032_v31  ;;  %1323 = vmatpush.msrb.mxu1 %v1032_v31  ;;  %v589_v31 = vmul.f32 %v3541_v26, %v3541_v26 }
 0x18b   : > { %v3526_v44 = vadd.f32 %v3457_v19, %v812_v35 }
 0x18c   : > { %1069 = vmatpush.msra.mxu3 %v1031_v47  ;;  %1324 = vmatpush.msrb.mxu1 %v1031_v47 }
 0x18d   : > { %831 = vadd.xlane.f32.xlu1 %v3526_v44  ;;  %v842_v56 = vmul.f32 %v3526_v44, %v3526_v44 }
 0x18f   : > { %578 = vadd.xlane.f32.xlu2 %v3529_v50  ;;  %855 = vadd.xlane.f32.xlu0 %v842_v56 }
 0x192   : > { %v567_v10 = vpop.xlane.xlu0 %566  ;;  %v815_v13 = vpop.f32.mrf.mxu2 }
 0x193   : > { %v3536_v20 = vadd.f32 %v3457_v19, %v815_v13  ;;  %v3543_v29 = vmul.f32 0.03125, %v567_v10  ;;  %v1030_v10 = vld [vmem:[#allocation2 + $0x80] sm:$0xff] }
 0x194   : > { %1070 = vmatpush.msra.mxu3 %v1030_v10  ;;  %1325 = vmatpush.msrb.mxu1 %v1030_v10 }
 0x195   : > { %602 = vadd.xlane.f32.xlu1 %v588_v22  ;;  %v843_v33 = vmul.f32 %v3536_v20, %v3536_v20  ;;  %v622_v56 = vmul.f32 %v3543_v29, %v3543_v29 }
 0x197   : > { %833 = vadd.xlane.f32.xlu2 %v3536_v20  ;;  %580 = vadd.xlane.f32.xlu0 %v3541_v26 }
 0x19a   : > { %v569_v35 = vpop.xlane.xlu1 %568  ;;  %v591_v38 = vpop.xlane.xlu0 %590 }
 0x19b   : > { %v3551_v59 = vmul.f32 0.03125, %v569_v35  ;;  %v614_v62 = vmul.f32 0.03125, %v591_v38  ;;  %v818_v4 = vpop.f32.mrf.mxu2 }
 0x19c   : > { %v3554_v13 = vadd.f32 %v3457_v19, %v818_v4  ;;  %v593_v16 = vpop.xlane.xlu2 %592 }
 0x19d   : > { %v623_v22 = vmul.f32 %v3551_v59, %v3551_v59  ;;  %v630_v24 = vsub.f32 %v614_v62, %v622_v56  ;;  %v615_v28 = vmul.f32 0.03125, %v593_v16  ;;  %857 = vadd.xlane.f32.xlu1 %v843_v33 }
 0x19e   : > { %v844_v47 = vmul.f32 %v3554_v13, %v3554_v13 }
 0x19f   : > { %v638_v35 = vmax.f32 %v630_v24, 0.0  ;;  %v631_v38 = vsub.f32 %v615_v28, %v623_v22  ;;  %604 = vadd.xlane.f32.xlu2 %v589_v31  ;;  %835 = vadd.xlane.f32.xlu0 %v3554_v13 }
 0x1a1   : > { %v654_v19 = vadd.f32 1e-05, %v638_v35  ;;  %v639_v4 = vmax.f32 %v631_v38, 0.0 }
 0x1a2   : > { %v571_v18 = vpop.xlane.xlu1 %570 }
 0x1a3   : > { %2988 = vrsqrt.f32 %v654_v19  ;;  %v655_v56 = vadd.f32 1e-05, %v639_v4  ;;  %v608_v62 = vmul.f32 0.03125, %v571_v18  ;;  %vm668_vm2 = vweird.f32 %v654_v19 }
 0x1a4   : > { %v595_v33 = vpop.xlane.xlu0 %594 }
 0x1a5   : > { %2990 = vrsqrt.f32 %v655_v56  ;;  %v624_v16 = vmul.f32 %v608_v62, %v608_v62  ;;  %859 = vadd.xlane.f32.xlu1 %v844_v47  ;;  %v616_v15 = vmul.f32 0.03125, %v595_v33  ;;  %vm678_vm5 = vweird.f32 %v655_v56 }
 0x1a7   : > { %v632_v10 = vsub.f32 %v616_v15, %v624_v16  ;;  %v646_v15 = vsub.f32 %v3460_v21, %v3543_v29 }
 0x1a9   : > { %v2989_v24 = vpop.eup %2988  ;;  %v640_v28 = vmax.f32 %v632_v10, 0.0 }
 0x1aa   : > { %v663_v22 = vmul.f32 %v2989_v24, %v654_v19  ;;  %vm669_vm1 = vweird.f32 %v2989_v24 }
 0x1ab   : > { %v2991_v31 = vpop.eup %2990  ;;  %v656_v38 = vadd.f32 1e-05, %v640_v28  ;;  %vm670_vm4 = vmor %vm668_vm2, %vm669_vm1 }
 0x1ac   : > { %v664_v58 = vmul.f32 %v2989_v24, %v663_v22  ;;  %v673_v35 = vmul.f32 %v2991_v31, %v655_v56  ;;  %vm679_vm3 = vweird.f32 %v2991_v31 }
 0x1ad   : > { %2992 = vrsqrt.f32 %v656_v38  ;;  %vm680_vm6 = vmor %vm678_vm5, %vm679_vm3  ;;  %vm688_vm8 = vweird.f32 %v656_v38 }
 0x1ae   : > { %v665_v12 = vmul.f32 0.5, %v664_v58  ;;  %v674_v55 = vmul.f32 %v2991_v31, %v673_v35  ;;  %v3568_v58 = vld [vmem:[%s5159_s5] ss:$0 sm:$0xff] }
 0x1b0   : > { %v666_v9 = vsub.f32 1.5, %v665_v12  ;;  %v675_v4 = vmul.f32 0.5, %v674_v55  ;;  %v647_v55 = vsub.f32 %v3464_v23, %v3551_v59  ;;  %v648_v59 = vsub.f32 %v3472_v27, %v608_v62 }
 0x1b2   : > { %v676_v18 = vsub.f32 1.5, %v675_v4  ;;  %v667_v6 = vmul.f32 %v2989_v24, %v666_v9  ;;  %v3575_v9 = vld [vmem:[%s5160_s6] ss:$0 sm:$0xff] }
 0x1b3   : > { %v2993_v47 = vpop.eup %2992 }
 0x1b4   : > { %v671_v33 = vsel %vm670_vm4, %v2989_v24, %v667_v6  ;;  %v677_v16 = vmul.f32 %v2991_v31, %v676_v18  ;;  %v683_v12 = vmul.f32 %v2993_v47, %v656_v38  ;;  %vm689_vm7 = vweird.f32 %v2993_v47 }
 0x1b5   : > { %v742_v19 = vmul.f32 %v671_v33, %v646_v15  ;;  %vm690_vm9 = vmor %vm688_vm8, %vm689_vm7 }
 0x1b6   : > { %v681_v21 = vsel %vm680_vm6, %v2991_v31, %v677_v16  ;;  %v684_v29 = vmul.f32 %v2993_v47, %v683_v12 }
 0x1b7   : > { %v753_v6 = vmul.f32 %v3568_v58, %v742_v19  ;;  %v743_v56 = vmul.f32 %v681_v21, %v647_v55  ;;  %v573_v55 = vpop.xlane.xlu2 %572  ;;  %v575_v19 = vpop.xlane.xlu0 %574 }
 0x1b8   : > { %v685_v10 = vmul.f32 0.5, %v684_v29  ;;  %v3588_v29 = vmul.f32 0.03125, %v573_v55 }
 0x1b9   : > { %v764_v24 = vadd.f32 %v3575_v9, %v753_v6  ;;  %v754_v35 = vmul.f32 %v3568_v58, %v743_v56 }
 0x1ba   : > { %v686_v22 = vsub.f32 1.5, %v685_v10 }
 0x1bb   : > { %v772_v28 = vmax.f32 %v764_v24, 0.0  ;;  %v765_v31 = vadd.f32 %v3575_v9, %v754_v35 }
 0x1bc   : > { %v687_v23 = vmul.f32 %v2993_v47, %v686_v22  ;;  %v625_v22 = vmul.f32 %v3588_v29, %v3588_v29 }
 0x1bd   : > { %1071 = vmatmul.f32.vlgmr.msra.gmra.mxu3 %v772_v28  ;;  %v773_v15 = vmax.f32 %v765_v31, 0.0 }
 0x1be   : > { %v691_v4 = vsel %vm690_vm9, %v2993_v47, %v687_v23 }
 0x1bf   : > { %v744_v18 = vmul.f32 %v691_v4, %v648_v59 }
 0x1c1   : > { %v755_v33 = vmul.f32 %v3568_v58, %v744_v18 }
 0x1c3   : > { %v766_v16 = vadd.f32 %v3575_v9, %v755_v33 }
 0x1c5   : > { %1074 = vmatmul.f32.gmra.mxu3 %v773_v15  ;;  %v774_v12 = vmax.f32 %v766_v16, 0.0  ;;  %v3596_v16 = vmul.f32 0.03125, %v575_v19 }
 0x1cd   : > { %1077 = vmatmul.f32.gmra.mxu3 %v774_v12 }
 0x1d8   : > { %v822_v38 = vpop.xlane.xlu1 %821 }
 0x1d9   : > { %v3584_v21 = vmul.f32 0.03125, %v822_v38 }
 0x1da   : > { %v846_v27 = vpop.xlane.xlu2 %845 }
 0x1db   : > { %v877_v62 = vmul.f32 %v3584_v21, %v3584_v21  ;;  %v869_v47 = vmul.f32 0.03125, %v846_v27 }
 0x1dd   : > { %v885_v6 = vsub.f32 %v869_v47, %v877_v62 }
 0x1df   : > { %v893_v56 = vmax.f32 %v885_v6, 0.0 }
 0x1e0   : > { %v597_v10 = vpop.xlane.xlu1 %596  ;;  %v824_v24 = vpop.xlane.xlu0 %823 }
 0x1e1   : > { %v909_v28 = vadd.f32 1e-05, %v893_v56  ;;  %v617_v35 = vmul.f32 0.03125, %v597_v10  ;;  %v3592_v23 = vmul.f32 0.03125, %v824_v24  ;;  %v626_v24 = vmul.f32 %v3596_v16, %v3596_v16 }
 0x1e2   : > { %v848_v59 = vpop.xlane.xlu2 %847 }
 0x1e3   : > { %2994 = vrsqrt.f32 %v909_v28  ;;  %v633_v4 = vsub.f32 %v617_v35, %v625_v22  ;;  %v878_v31 = vmul.f32 %v3592_v23, %v3592_v23  ;;  %v870_v18 = vmul.f32 0.03125, %v848_v59 }
 0x1e4   : > { %vm923_vm11 = vweird.f32 %v909_v28 }
 0x1e5   : > { %v641_v15 = vmax.f32 %v633_v4, 0.0  ;;  %v886_v33 = vsub.f32 %v870_v18, %v878_v31 }
 0x1e7   : > { %v657_v12 = vadd.f32 1e-05, %v641_v15  ;;  %v894_v55 = vmax.f32 %v886_v33, 0.0 }
 0x1e8   : > { %v826_v38 = vpop.xlane.xlu1 %825 }
 0x1e9   : > { %v2995_v27 = vpop.eup %2994  ;;  %2996 = vrsqrt.f32 %v657_v12  ;;  %v3598_v62 = vmul.f32 0.03125, %v826_v38  ;;  %v3600_v6 = vadd.f32 1e-05, %v894_v55  ;;  %vm698_vm14 = vweird.f32 %v657_v12 }
 0x1ea   : > { %v918_v47 = vmul.f32 %v2995_v27, %v909_v28  ;;  %v599_v56 = vpop.xlane.xlu2 %598  ;;  %v850_v10 = vpop.xlane.xlu0 %849  ;;  %vm924_vm10 = vweird.f32 %v2995_v27 }
 0x1eb   : > { %v879_v22 = vmul.f32 %v3598_v62, %v3598_v62  ;;  %v618_v19 = vmul.f32 0.03125, %v599_v56  ;;  %v871_v35 = vmul.f32 0.03125, %v850_v10  ;;  %2998 = vrsqrt.f32 %v3600_v6  ;;  %vm925_vm12 = vmor %vm923_vm11, %vm924_vm10 }
 0x1ec   : > { %v919_v59 = vmul.f32 %v2995_v27, %v918_v47  ;;  %vm933_vm1 = vweird.f32 %v3600_v6 }
 0x1ed   : > { %v634_v4 = vsub.f32 %v618_v19, %v626_v24  ;;  %v887_v31 = vsub.f32 %v871_v35, %v879_v22 }
 0x1ee   : > { %v920_v18 = vmul.f32 0.5, %v919_v59 }
 0x1ef   : > { %v3607_v15 = vpop.eup %2996  ;;  %v642_v33 = vmax.f32 %v634_v4, 0.0  ;;  %v895_v55 = vmax.f32 %v887_v31, 0.0 }
 0x1f0   : > { %v921_v38 = vsub.f32 1.5, %v920_v18  ;;  %v693_v52 = vmul.f32 %v3607_v15, %v657_v12  ;;  %v577_v3 = vpop.xlane.xlu1 %576  ;;  %v901_v18 = vsub.f32 %v3486_v34, %v3584_v21  ;;  %vm699_vm13 = vweird.f32 %v3607_v15 }
 0x1f1   : > { %v3610_v49 = vadd.f32 1e-05, %v642_v33  ;;  %v3612_v0 = vadd.f32 1e-05, %v895_v55  ;;  %v3614_v56 = vmul.f32 0.03125, %v577_v3  ;;  %v3616_v47 = vpop.eup %2998  ;;  %v649_v34 = vsub.f32 %v3478_v30, %v3588_v29  ;;  %vm3640_vm15 = vmor %vm698_vm14, %vm699_vm13 }
 0x1f2   : > { %v922_v10 = vmul.f32 %v2995_v27, %v921_v38  ;;  %v694_v24 = vmul.f32 %v3607_v15, %v693_v52  ;;  %v828_v22 = vpop.xlane.xlu2 %827  ;;  %v601_v19 = vpop.xlane.xlu0 %600  ;;  %v928_v35 = vmul.f32 %v3616_v47, %v3600_v6  ;;  %vm934_vm0 = vweird.f32 %v3616_v47 }
 0x1f3   : > { %3000 = vrsqrt.f32 %v3610_v49  ;;  %v627_v3 = vmul.f32 %v3614_v56, %v3614_v56  ;;  %v3626_v31 = vmul.f32 0.03125, %v828_v22  ;;  %v619_v52 = vmul.f32 0.03125, %v601_v19  ;;  %vm3670_vm3 = vmor %vm933_vm1, %vm934_vm0 }
 0x1f4   : > { %v695_v59 = vmul.f32 0.5, %v694_v24  ;;  %3002 = vrsqrt.f32 %v3612_v0  ;;  %v929_v4 = vmul.f32 %v3616_v47, %v928_v35  ;;  %v926_v55 = vsel %vm925_vm12, %v2995_v27, %v922_v10 }
 0x1f5   : > { %v880_v38 = vmul.f32 %v3626_v31, %v3626_v31  ;;  %v635_v24 = vsub.f32 %v619_v52, %v627_v3  ;;  %v997_v46 = vmul.f32 %v926_v55, %v901_v18  ;;  %vm708_vm2 = vweird.f32 %v3610_v49 }
 0x1f6   : > { %v696_v33 = vsub.f32 1.5, %v695_v59  ;;  %v930_v28 = vmul.f32 0.5, %v929_v4  ;;  %vm943_vm5 = vweird.f32 %v3612_v0 }
 0x1f7   : > { %v643_v22 = vmax.f32 %v635_v24, 0.0  ;;  %v1005_v4 = vmul.f32 %v3568_v58, %v997_v46  ;;  %v902_v46 = vsub.f32 %v3492_v41, %v3592_v23 }
 0x1f8   : > { %v852_v61 = vpop.xlane.xlu1 %851  ;;  %v697_v43 = vmul.f32 %v3607_v15, %v696_v33  ;;  %v931_v27 = vsub.f32 1.5, %v930_v28 }
 0x1f9   : > { %v3634_v35 = vpop.eup %3000  ;;  %v872_v19 = vmul.f32 0.03125, %v852_v61  ;;  %v3649_v12 = vadd.f32 1e-05, %v643_v22  ;;  %v1013_v55 = vadd.f32 %v3575_v9, %v1005_v4 }
 0x1fa   : > { %v3636_v40 = vpop.eup %3002  ;;  %v703_v10 = vmul.f32 %v3634_v35, %v3610_v49  ;;  %v854_v59 = vpop.xlane.xlu2 %853  ;;  %v701_v30 = vsel %vm3640_vm15, %v3607_v15, %v697_v43  ;;  %vm709_vm4 = vweird.f32 %v3634_v35 }
 0x1fb   : > { %v830_v3 = vpop.xlane.xlu0 %829  ;;  %v938_v61 = vmul.f32 %v3636_v40, %v3612_v0  ;;  %v888_v52 = vsub.f32 %v872_v19, %v880_v38  ;;  %v873_v18 = vmul.f32 0.03125, %v854_v59  ;;  %3004 = vrsqrt.f32 %v3649_v12  ;;  %vm3702_vm7 = vmor %vm708_vm2, %vm709_vm4 }
 0x1fc   : > { %v704_v29 = vmul.f32 %v3634_v35, %v703_v10  ;;  %v3655_v33 = vmul.f32 0.03125, %v830_v3  ;;  %v1021_v15 = vmax.f32 %v1013_v55, 0.0  ;;  %v745_v21 = vmul.f32 %v701_v30, %v649_v34 }
 0x1fd   : > { %v939_v28 = vmul.f32 %v3636_v40, %v938_v61  ;;  %v896_v24 = vmax.f32 %v888_v52, 0.0  ;;  %v932_v10 = vmul.f32 %v3616_v47, %v931_v27  ;;  %vm944_vm6 = vweird.f32 %v3636_v40 }
 0x1fe   : > { %v705_v38 = vmul.f32 0.5, %v704_v29  ;;  %v881_v43 = vmul.f32 %v3655_v33, %v3655_v33  ;;  %1326 = vmatmul.f32.vlgmr.msrb.gmra.mxu1 %v1021_v15  ;;  %v756_v61 = vmul.f32 %v3568_v58, %v745_v21  ;;  %vm3712_vm8 = vmor %vm943_vm5, %vm944_vm6  ;;  %vm718_vm9 = vweird.f32 %v3649_v12 }
 0x1ff   : > { %v940_v22 = vmul.f32 0.5, %v939_v28  ;;  %v3665_v19 = vadd.f32 1e-05, %v896_v24  ;;  %v936_v52 = vsel %vm3670_vm3, %v3616_v47, %v932_v10  ;;  %v650_v47 = vsub.f32 %v3482_v32, %v3596_v16 }
 0x200   : > { %v706_v41 = vsub.f32 1.5, %v705_v38  ;;  %v889_v23 = vsub.f32 %v873_v18, %v881_v43  ;;  %v832_v59 = vpop.xlane.xlu1 %831  ;;  %v767_v15 = vadd.f32 %v3575_v9, %v756_v61  ;;  %v998_v10 = vmul.f32 %v936_v52, %v902_v46 }
 0x201   : > { %3006 = vrsqrt.f32 %v3665_v19  ;;  %v3677_v34 = vmul.f32 0.03125, %v832_v59  ;;  %v3684_v30 = vpop.eup %3004  ;;  %v941_v29 = vsub.f32 1.5, %v940_v22  ;;  %vm953_vm11 = vweird.f32 %v3665_v19 }
 0x202   : > { %v897_v6 = vmax.f32 %v889_v23, 0.0  ;;  %v579_v27 = vpop.xlane.xlu2 %578  ;;  %v707_v28 = vmul.f32 %v3634_v35, %v706_v41  ;;  %v713_v24 = vmul.f32 %v3684_v30, %v3649_v12  ;;  %v903_v41 = vsub.f32 %v3500_v53, %v3598_v62 }
 0x203   : > { %v856_v4 = vpop.xlane.xlu0 %855  ;;  %v882_v18 = vmul.f32 %v3677_v34, %v3677_v34  ;;  %v3693_v43 = vmul.f32 0.03125, %v579_v27  ;;  %v775_v49 = vmax.f32 %v767_v15, 0.0  ;;  %v1006_v46 = vmul.f32 %v3568_v58, %v998_v10 }
 0x204   : > { %v874_v55 = vmul.f32 0.03125, %v856_v4  ;;  %v3691_v38 = vadd.f32 1e-05, %v897_v6  ;;  %v714_v32 = vmul.f32 %v3684_v30, %v713_v24  ;;  %v711_v53 = vsel %vm3702_vm7, %v3634_v35, %v707_v28 }
 0x205   : > { %v942_v0 = vmul.f32 %v3636_v40, %v941_v29  ;;  %v628_v6 = vmul.f32 %v3693_v43, %v3693_v43  ;;  %1080 = vmatmul.f32.gmra.mxu3 %v775_v49  ;;  %v746_v4 = vmul.f32 %v711_v53, %v650_v47  ;;  %v1014_v52 = vadd.f32 %v3575_v9, %v1006_v46 }
 0x206   : > { %v890_v21 = vsub.f32 %v874_v55, %v882_v18  ;;  %3008 = vrsqrt.f32 %v3691_v38  ;;  %v715_v62 = vmul.f32 0.5, %v714_v32  ;;  %vm719_vm10 = vweird.f32 %v3684_v30 }
 0x207   : > { %v3718_v16 = vpop.eup %3006  ;;  %v946_v35 = vsel %vm3712_vm8, %v3636_v40, %v942_v0  ;;  %v757_v24 = vmul.f32 %v3568_v58, %v746_v4  ;;  %v1022_v47 = vmax.f32 %v1014_v52, 0.0  ;;  %vm3761_vm13 = vmor %vm718_vm9, %vm719_vm10  ;;  %vm963_vm14 = vweird.f32 %v3691_v38 }
 0x208   : > { %v898_v59 = vmax.f32 %v890_v21, 0.0  ;;  %v948_v3 = vmul.f32 %v3718_v16, %v3665_v19  ;;  %v603_v27 = vpop.xlane.xlu1 %602  ;;  %v999_v15 = vmul.f32 %v946_v35, %v903_v41  ;;  %v716_v10 = vsub.f32 1.5, %v715_v62 }
 0x209   : > { %v620_v18 = vmul.f32 0.03125, %v603_v27  ;;  %v768_v40 = vadd.f32 %v3575_v9, %v757_v24  ;;  %1329 = vmatmul.f32.gmra.mxu1 %v1022_v47  ;;  %vm954_vm12 = vweird.f32 %v3718_v16 }
 0x20a   : > { %v3729_v61 = vadd.f32 1e-05, %v898_v59  ;;  %v949_v29 = vmul.f32 %v3718_v16, %v948_v3  ;;  %v834_v55 = vpop.xlane.xlu2 %833  ;;  %v1007_v59 = vmul.f32 %v3568_v58, %v999_v15  ;;  %v717_v52 = vmul.f32 %v3684_v30, %v716_v10  ;;  %vm3771_vm15 = vmor %vm953_vm11, %vm954_vm12 }
 0x20b   : > { %v581_v28 = vpop.xlane.xlu0 %580  ;;  %v636_v22 = vsub.f32 %v620_v18, %v628_v6  ;;  %v3745_v41 = vmul.f32 0.03125, %v834_v55  ;;  %v776_v6 = vmax.f32 %v768_v40, 0.0 }
 0x20c   : > { %3010 = vrsqrt.f32 %v3729_v61  ;;  %v3739_v21 = vpop.eup %3008  ;;  %v950_v23 = vmul.f32 0.5, %v949_v29  ;;  %v3750_v53 = vmul.f32 0.03125, %v581_v28  ;;  %v1015_v19 = vadd.f32 %v3575_v9, %v1007_v59 }
 0x20d   : > { %v958_v32 = vmul.f32 %v3739_v21, %v3691_v38  ;;  %v644_v49 = vmax.f32 %v636_v22, 0.0  ;;  %v883_v3 = vmul.f32 %v3745_v41, %v3745_v41  ;;  %vm964_vm0 = vweird.f32 %v3739_v21  ;;  %1083 = vmatmul.f32.gmra.mxu3 %v776_v6 }
 0x20e   : > { %v951_v46 = vsub.f32 1.5, %v950_v23  ;;  %v651_v28 = vsub.f32 %v3508_v1, %v3614_v56  ;;  %v1023_v15 = vmax.f32 %v1015_v19, 0.0  ;;  %v721_v22 = vsel %vm3761_vm13, %v3684_v30, %v717_v52  ;;  %vm3792_vm1 = vmor %vm963_vm14, %vm964_vm0 }
 0x20f   : > { %v959_v0 = vmul.f32 %v3739_v21, %v958_v32  ;;  %v3753_v62 = vadd.f32 1e-05, %v644_v49  ;;  %v629_v23 = vmul.f32 %v3750_v53, %v3750_v53  ;;  %v904_v59 = vsub.f32 %v3511_v7, %v3626_v31 }
 0x210   : > { %v858_v4 = vpop.xlane.xlu1 %857  ;;  %v952_v18 = vmul.f32 %v3718_v16, %v951_v46  ;;  %v747_v30 = vmul.f32 %v721_v22, %v651_v28  ;;  %vm973_vm2 = vweird.f32 %v3729_v61 }
 0x211   : > { %v960_v12 = vmul.f32 0.5, %v959_v0  ;;  %3012 = vrsqrt.f32 %v3753_v62  ;;  %v875_v55 = vmul.f32 0.03125, %v858_v4  ;;  %v905_v0 = vsub.f32 %v3520_v25, %v3655_v33  ;;  %1332 = vmatmul.f32.gmra.mxu1 %v1023_v15 }
 0x212   : > { %v3769_v35 = vpop.eup %3010  ;;  %v605_v47 = vpop.xlane.xlu2 %604  ;;  %v956_v46 = vsel %vm3771_vm15, %v3718_v16, %v952_v18  ;;  %v758_v27 = vmul.f32 %v3568_v58, %v747_v30  ;;  %vm728_vm6 = vweird.f32 %v3753_v62 }
 0x213   : > { %v968_v24 = vmul.f32 %v3769_v35, %v3729_v61  ;;  %v961_v10 = vsub.f32 1.5, %v960_v12  ;;  %v891_v40 = vsub.f32 %v875_v55, %v883_v3  ;;  %v621_v32 = vmul.f32 0.03125, %v605_v47  ;;  %v836_v49 = vpop.xlane.xlu0 %835 }
 0x214   : > { %v3803_v6 = vmul.f32 0.03125, %v836_v49  ;;  %v1000_v19 = vmul.f32 %v956_v46, %v904_v59  ;;  %vm974_vm3 = vweird.f32 %v3769_v35 }
 0x215   : > { %v969_v56 = vmul.f32 %v3769_v35, %v968_v24  ;;  %v962_v7 = vmul.f32 %v3739_v21, %v961_v10  ;;  %v899_v31 = vmax.f32 %v891_v40, 0.0  ;;  %v637_v3 = vsub.f32 %v621_v32, %v629_v23  ;;  %vm3819_vm4 = vmor %vm973_vm2, %vm974_vm3 }
 0x216   : > { %v884_v29 = vmul.f32 %v3803_v6, %v3803_v6  ;;  %v769_v24 = vadd.f32 %v3575_v9, %v758_v27  ;;  %v1008_v47 = vmul.f32 %v3568_v58, %v1000_v19  ;;  %v652_v27 = vsub.f32 %v3529_v50, %v3693_v43 }
 0x217   : > { %v970_v38 = vmul.f32 0.5, %v969_v56  ;;  %v3013_v4 = vpop.eup %3012  ;;  %v966_v52 = vsel %vm3792_vm1, %v3739_v21, %v962_v7  ;;  %v915_v16 = vadd.f32 1e-05, %v899_v31  ;;  %v645_v25 = vmax.f32 %v637_v3, 0.0 }
 0x218   : > { %v723_v18 = vmul.f32 %v3013_v4, %v3753_v62  ;;  %v860_v12 = vpop.xlane.xlu1 %859  ;;  %v1001_v55 = vmul.f32 %v966_v52, %v905_v0  ;;  %v777_v22 = vmax.f32 %v769_v24, 0.0  ;;  %v1016_v49 = vadd.f32 %v3575_v9, %v1008_v47 }
 0x219   : > { %v971_v33 = vsub.f32 1.5, %v970_v38  ;;  %3014 = vrsqrt.f32 %v915_v16  ;;  %v661_v28 = vadd.f32 1e-05, %v645_v25  ;;  %v876_v21 = vmul.f32 0.03125, %v860_v12 }
 0x21a   : > { %v724_v15 = vmul.f32 %v3013_v4, %v723_v18  ;;  %1086 = vmatmul.f32.gmra.mxu3 %v777_v22  ;;  %v1009_v59 = vmul.f32 %v3568_v58, %v1001_v55  ;;  %v1024_v30 = vmax.f32 %v1016_v49, 0.0  ;;  %vm729_vm5 = vweird.f32 %v3013_v4 }
 0x21b   : > { %3016 = vrsqrt.f32 %v661_v28  ;;  %v972_v10 = vmul.f32 %v3769_v35, %v971_v33  ;;  %v892_v32 = vsub.f32 %v876_v21, %v884_v29  ;;  %v906_v0 = vsub.f32 %v3526_v44, %v3677_v34  ;;  %vm730_vm7 = vmor %vm728_vm6, %vm729_vm5 }
 0x21c   : > { %v725_v40 = vmul.f32 0.5, %v724_v15  ;;  %1335 = vmatmul.f32.gmra.mxu1 %v1024_v30  ;;  %v1017_v19 = vadd.f32 %v3575_v9, %v1009_v59  ;;  %vm983_vm8 = vweird.f32 %v915_v16  ;;  %v907_v21 = vsub.f32 %v3536_v20, %v3745_v41 }
 0x21d   : > { %v900_v56 = vmax.f32 %v892_v32, 0.0  ;;  %v976_v61 = vsel %vm3819_vm4, %v3769_v35, %v972_v10  ;;  %vm738_vm12 = vweird.f32 %v661_v28  ;;  %v653_v32 = vsub.f32 %v3541_v26, %v3750_v53 }
 0x21e   : > { %v726_v1 = vsub.f32 1.5, %v725_v40  ;;  %v1002_v35 = vmul.f32 %v976_v61, %v906_v0  ;;  %v1025_v29 = vmax.f32 %v1017_v19, 0.0  ;;  %v908_v0 = vsub.f32 %v3554_v13, %v3803_v6 }
 0x21f   : > { %v3015_v46 = vpop.eup %3014  ;;  %v916_v31 = vadd.f32 1e-05, %v900_v56 }
 0x220   : > { %v978_v7 = vmul.f32 %v3015_v46, %v915_v16  ;;  %v727_v3 = vmul.f32 %v3013_v4, %v726_v1  ;;  %vm984_vm9 = vweird.f32 %v3015_v46  ;;  %v1010_v43 = vmul.f32 %v3568_v58, %v1002_v35 }
 0x221   : > { %v3017_v38 = vpop.eup %3016  ;;  %3018 = vrsqrt.f32 %v916_v31  ;;  %vm3836_vm10 = vmor %vm983_vm8, %vm984_vm9  ;;  %vm993_vm14 = vweird.f32 %v916_v31 }
 0x222   : > { %v979_v52 = vmul.f32 %v3015_v46, %v978_v7  ;;  %v733_v25 = vmul.f32 %v3017_v38, %v661_v28  ;;  %v731_v33 = vsel %vm730_vm7, %v3013_v4, %v727_v3  ;;  %vm739_vm11 = vweird.f32 %v3017_v38 }
 0x223   : > { %v748_v18 = vmul.f32 %v731_v33, %v652_v27  ;;  %v1018_v10 = vadd.f32 %v3575_v9, %v1010_v43  ;;  %vm740_vm13 = vmor %vm738_vm12, %vm739_vm11 }
 0x224   : > { %v980_v44 = vmul.f32 0.5, %v979_v52  ;;  %v734_v34 = vmul.f32 %v3017_v38, %v733_v25  ;;  %1338 = vmatmul.f32.gmra.mxu1 %v1025_v29  ;;  %v3859_v25 = vld [vmem:[%s5158_s4 + $0x1] ss:$0 sm:$0xff] }
 0x225   : > { %v759_v50 = vmul.f32 %v3568_v58, %v748_v18  ;;  %v1026_v28 = vmax.f32 %v1018_v10, 0.0 }
 0x226   : > { %v981_v12 = vsub.f32 1.5, %v980_v44  ;;  %v735_v55 = vmul.f32 0.5, %v734_v34 }
 0x227   : > { %v3019_v24 = vpop.eup %3018  ;;  %v770_v4 = vadd.f32 %v3575_v9, %v759_v50 }
 0x228   : > { %v736_v15 = vsub.f32 1.5, %v735_v55  ;;  %v982_v16 = vmul.f32 %v3015_v46, %v981_v12  ;;  %v988_v47 = vmul.f32 %v3019_v24, %v916_v31  ;;  %vm994_vm15 = vweird.f32 %v3019_v24 }
 0x229   : > { %v778_v22 = vmax.f32 %v770_v4, 0.0  ;;  %vm995_vm0 = vmor %vm993_vm14, %vm994_vm15 }
 0x22a   : > { %v986_v23 = vsel %vm3836_vm10, %v3015_v46, %v982_v16  ;;  %v737_v40 = vmul.f32 %v3017_v38, %v736_v15  ;;  %v989_v49 = vmul.f32 %v3019_v24, %v988_v47 }
 0x22b   : > { %v1003_v59 = vmul.f32 %v986_v23, %v907_v21  ;;  %1089 = vmatmul.f32.gmra.mxu3 %v778_v22 }
 0x22c   : > { %v741_v1 = vsel %vm740_vm13, %v3017_v38, %v737_v40  ;;  %v990_v56 = vmul.f32 0.5, %v989_v49  ;;  %1341 = vmatmul.f32.gmra.mxu1 %v1026_v28  ;;  %v1588_v28 = vld [vmem:[#allocation2 + $0x160] sm:$0xff] }
 0x22d   : > { %v1011_v20 = vmul.f32 %v3568_v58, %v1003_v59  ;;  %v749_v41 = vmul.f32 %v741_v1, %v653_v32  ;;  %v1591_v1 = vld [vmem:[#allocation2 + $0x178] sm:$0xff] }
 0x22e   : > { %v991_v30 = vsub.f32 1.5, %v990_v56  ;;  %1601 = vmatpush.msrb.mxu2 %v1591_v1  ;;  %1856 = vmatpush.msrb.mxu3 %v1591_v1 }
 0x22f   : > { %v760_v61 = vmul.f32 %v3568_v58, %v749_v41  ;;  %v1019_v46 = vadd.f32 %v3575_v9, %v1011_v20  ;;  %v1590_v20 = vld [vmem:[#allocation2 + $0x170] sm:$0xff]  ;;  %v1589_v41 = vld [vmem:[#allocation2 + $0x168] sm:$0xff] }
 0x230   : > { %v992_v53 = vmul.f32 %v3019_v24, %v991_v30  ;;  %1602 = vmatpush.msrb.mxu2 %v1590_v20  ;;  %1857 = vmatpush.msrb.mxu3 %v1590_v20  ;;  %v1577_v20 = vld [vmem:[#allocation2 + $0x108] sm:$0xff] }
 0x231   : > { %v771_v26 = vadd.f32 %v3575_v9, %v760_v61  ;;  %v1027_v3 = vmax.f32 %v1019_v46, 0.0  ;;  %v1587_v46 = vld [vmem:[#allocation2 + $0x158] sm:$0xff] }
 0x232   : > { %v996_v31 = vsel %vm995_vm0, %v3019_v24, %v992_v53  ;;  %1603 = vmatpush.msrb.mxu2 %v1589_v41  ;;  %1858 = vmatpush.msrb.mxu3 %v1589_v41  ;;  %v1576_v41 = vld [vmem:[#allocation2 + $0x100] sm:$0xff] }
 0x233   : > { %v779_v7 = vmax.f32 %v771_v26, 0.0  ;;  %v1004_v38 = vmul.f32 %v996_v31, %v908_v0  ;;  %v1586_v0 = vld [vmem:[#allocation2 + $0x150] sm:$0xff] }
 0x234   : > { %1344 = vmatmul.f32.gmra.mxu1 %v1027_v3  ;;  %1604 = vmatpush.msrb.mxu2 %v1588_v28  ;;  %v1584_v3 = vld [vmem:[#allocation2 + $0x140] sm:$0xff] }
 0x235   : > { %1092 = vmatmul.f32.gmra.mxu3 %v779_v7  ;;  %v1012_v27 = vmul.f32 %v3568_v58, %v1004_v38  ;;  %v1585_v7 = vld [vmem:[#allocation2 + $0x148] sm:$0xff] }
 0x236   : > { %1859 = vmatpush.msrb.mxu3 %v1588_v28  ;;  %1605 = vmatpush.msrb.mxu2 %v1587_v46 }
 0x237   : > { %v1020_v19 = vadd.f32 %v3575_v9, %v1012_v27  ;;  %v1583_v27 = vld [vmem:[#allocation2 + $0x138] sm:$0xff] }
 0x238   : > { %1860 = vmatpush.msrb.mxu3 %v1587_v46  ;;  %1606 = vmatpush.msrb.mxu2 %v1586_v0 }
 0x239   : > { %v1028_v52 = vmax.f32 %v1020_v19, 0.0 }
 0x23a   : > { %1861 = vmatpush.msrb.mxu3 %v1586_v0  ;;  %1607 = vmatpush.msrb.mxu2 %v1585_v7 }
 0x23c   : > { %1347 = vmatmul.f32.gmra.mxu1 %v1028_v52  ;;  %1862 = vmatpush.msrb.mxu3 %v1585_v7 }
 0x23d   : > { %1608 = vmatpush.msrb.mxu2 %v1584_v3 }
 0x23e   : > { %1863 = vmatpush.msrb.mxu3 %v1584_v3 }
 0x23f   : > { %1609 = vmatpush.msrb.mxu2 %v1583_v27 }
 0x240   : > { %v1072_v35 = vpop.f32.mrf.mxu3  ;;  %1864 = vmatpush.msrb.mxu3 %v1583_v27 }
 0x241   : > { %v3862_v13 = vadd.f32 %v3859_v25, %v1072_v35 }
 0x243   : > { %1096 = vadd.xlane.f32.xlu2 %v3862_v13  ;;  %v1112_v6 = vmul.f32 %v3862_v13, %v3862_v13 }
 0x245   : > { %1120 = vadd.xlane.f32.xlu1 %v1112_v6  ;;  %v1582_v6 = vld [vmem:[#allocation2 + $0x130] sm:$0xff] }
 0x246   : > { %1610 = vmatpush.msrb.mxu2 %v1582_v6  ;;  %1865 = vmatpush.msrb.mxu3 %v1582_v6 }
 0x248   : > { %v1075_v58 = vpop.f32.mrf.mxu3 }
 0x249   : > { %v3868_v9 = vadd.f32 %v3859_v25, %v1075_v58 }
 0x24b   : > { %1098 = vadd.xlane.f32.xlu0 %v3868_v9  ;;  %v1113_v33 = vmul.f32 %v3868_v9, %v3868_v9 }
 0x24d   : > { %1122 = vadd.xlane.f32.xlu2 %v1113_v33 }
 0x250   : > { %v1078_v44 = vpop.f32.mrf.mxu3 }
 0x251   : > { %v3874_v34 = vadd.f32 %v3859_v25, %v1078_v44 }
 0x253   : > { %1100 = vadd.xlane.f32.xlu1 %v3874_v34  ;;  %v1114_v18 = vmul.f32 %v3874_v34, %v3874_v34 }
 0x255   : > { %1124 = vadd.xlane.f32.xlu0 %v1114_v18  ;;  %v1581_v18 = vld [vmem:[#allocation2 + $0x128] sm:$0xff] }
 0x256   : > { %1611 = vmatpush.msrb.mxu2 %v1581_v18  ;;  %1866 = vmatpush.msrb.mxu3 %v1581_v18 }
 0x27b   : > { %v1327_v29 = vpop.f32.mrf.mxu1 }
 0x27c   : > { %v3880_v12 = vadd.f32 %v3859_v25, %v1327_v29 }
 0x27e   : > { %1351 = vadd.xlane.f32.xlu0 %v3880_v12  ;;  %v1367_v15 = vmul.f32 %v3880_v12, %v3880_v12 }
 0x286   : > { %v1330_v55 = vpop.f32.mrf.mxu1 }
 0x287   : > { %v3895_v21 = vadd.f32 %v3859_v25, %v1330_v55 }
 0x288   : > { %v1081_v50 = vpop.f32.mrf.mxu3 }
 0x289   : > { %v3884_v43 = vadd.f32 %v3859_v25, %v1081_v50  ;;  %v1368_v10 = vmul.f32 %v3895_v21, %v3895_v21 }
 0x28b   : > { %1102 = vadd.xlane.f32.xlu2 %v3884_v43  ;;  %v1115_v62 = vmul.f32 %v3884_v43, %v3884_v43 }
 0x28d   : > { %1126 = vadd.xlane.f32.xlu1 %v1115_v62  ;;  %v1580_v62 = vld [vmem:[#allocation2 + $0x120] sm:$0xff] }
 0x28e   : > { %v1333_v4 = vpop.f32.mrf.mxu1  ;;  %1612 = vmatpush.msrb.mxu2 %v1580_v62  ;;  %1867 = vmatpush.msrb.mxu3 %v1580_v62 }
 0x28f   : > { %v3900_v47 = vadd.f32 %v3859_v25, %v1333_v4  ;;  %v1579_v4 = vld [vmem:[#allocation2 + $0x118] sm:$0xff] }
 0x290   : > { %v1084_v24 = vpop.f32.mrf.mxu3  ;;  %1613 = vmatpush.msrb.mxu2 %v1579_v4  ;;  %1868 = vmatpush.msrb.mxu3 %v1579_v4 }
 0x291   : > { %v3892_v16 = vadd.f32 %v3859_v25, %v1084_v24  ;;  %v1369_v23 = vmul.f32 %v3900_v47, %v3900_v47 }
 0x293   : > { %1375 = vadd.xlane.f32.xlu2 %v1367_v15  ;;  %1104 = vadd.xlane.f32.xlu0 %v3892_v16  ;;  %v1116_v32 = vmul.f32 %v3892_v16, %v3892_v16 }
 0x295   : > { %1353 = vadd.xlane.f32.xlu1 %v3895_v21 }
 0x299   : > { %v1336_v22 = vpop.f32.mrf.mxu1 }
 0x29a   : > { %v3910_v49 = vadd.f32 %v3859_v25, %v1336_v22 }
 0x29b   : > { %1355 = vadd.xlane.f32.xlu2 %v3900_v47  ;;  %1377 = vadd.xlane.f32.xlu0 %v1368_v10 }
 0x29c   : > { %v1370_v30 = vmul.f32 %v3910_v49, %v3910_v49 }
 0x29d   : > { %1379 = vadd.xlane.f32.xlu1 %v1369_v23  ;;  %v1087_v40 = vpop.f32.mrf.mxu3 }
 0x29e   : > { %v3913_v56 = vadd.f32 %v3859_v25, %v1087_v40  ;;  %v1578_v40 = vld [vmem:[#allocation2 + $0x110] sm:$0xff] }
 0x29f   : > { %1614 = vmatpush.msrb.mxu2 %v1578_v40  ;;  %1869 = vmatpush.msrb.mxu3 %v1578_v40 }
 0x2a0   : > { %v1117_v61 = vmul.f32 %v3913_v56, %v3913_v56 }
 0x2a1   : > { %v1339_v59 = vpop.f32.mrf.mxu1  ;;  %1615 = vmatpush.msrb.mxu2 %v1577_v20  ;;  %1870 = vmatpush.msrb.mxu3 %v1577_v20 }
 0x2a2   : > { %v3922_v26 = vadd.f32 %v3859_v25, %v1339_v59 }
 0x2a3   : > { %1128 = vadd.xlane.f32.xlu2 %v1116_v32  ;;  %1357 = vadd.xlane.f32.xlu0 %v3910_v49 }
 0x2a4   : > { %v1371_v38 = vmul.f32 %v3922_v26, %v3922_v26  ;;  %1616 = vmatpush.msrb.mxu2 %v1576_v41  ;;  %1871 = vmatpush.msrb.mxu3 %v1576_v41  ;;  %v3970_v41 = vld [vmem:[%s5159_s5 + $0x1] ss:$0 sm:$0xff] }
 0x2a5   : > { %1106 = vadd.xlane.f32.xlu1 %v3913_v56 }
 0x2a9   : > { %v1342_v53 = vpop.f32.mrf.mxu1 }
 0x2aa   : > { %v3926_v31 = vadd.f32 %v3859_v25, %v1342_v53 }
 0x2ab   : > { %1381 = vadd.xlane.f32.xlu2 %v1370_v30  ;;  %1130 = vadd.xlane.f32.xlu0 %v1117_v61 }
 0x2ac   : > { %v1372_v19 = vmul.f32 %v3926_v31, %v3926_v31 }
 0x2ad   : > { %1359 = vadd.xlane.f32.xlu1 %v3922_v26 }
 0x2ae   : > { %v1090_v52 = vpop.f32.mrf.mxu3 }
 0x2af   : > { %v3936_v29 = vadd.f32 %v3859_v25, %v1090_v52 }
 0x2b1   : > { %v1345_v33 = vpop.f32.mrf.mxu1  ;;  %v1118_v10 = vmul.f32 %v3936_v29, %v3936_v29 }
 0x2b2   : > { %v3941_v15 = vadd.f32 %v3859_v25, %v1345_v33 }
 0x2b3   : > { %1361 = vadd.xlane.f32.xlu2 %v3926_v31  ;;  %1383 = vadd.xlane.f32.xlu0 %v1371_v38 }
 0x2b4   : > { %v1373_v53 = vmul.f32 %v3941_v15, %v3941_v15 }
 0x2b5   : > { %1385 = vadd.xlane.f32.xlu1 %v1372_v19 }
 0x2b6   : > { %v1097_v35 = vpop.xlane.xlu2 %1096 }
 0x2b7   : > { %v3933_v58 = vmul.f32 0.03125, %v1097_v35 }
 0x2b8   : > { %v1121_v44 = vpop.xlane.xlu1 %1120  ;;  %v1093_v28 = vpop.f32.mrf.mxu3 }
 0x2b9   : > { %v1152_v55 = vmul.f32 %v3933_v58, %v3933_v58  ;;  %v1144_v50 = vmul.f32 0.03125, %v1121_v44  ;;  %v1348_v61 = vpop.f32.mrf.mxu1  ;;  %v3954_v0 = vadd.f32 %v3859_v25, %v1093_v28 }
 0x2ba   : > { %v3957_v3 = vadd.f32 %v3859_v25, %v1348_v61 }
 0x2bb   : > { %v1160_v24 = vsub.f32 %v1144_v50, %v1152_v55  ;;  %1108 = vadd.xlane.f32.xlu2 %v3936_v29  ;;  %1363 = vadd.xlane.f32.xlu0 %v3941_v15  ;;  %v1119_v25 = vmul.f32 %v3954_v0, %v3954_v0 }
 0x2bd   : > { %v1168_v22 = vmax.f32 %v1160_v24, 0.0  ;;  %1132 = vadd.xlane.f32.xlu1 %v1118_v10  ;;  %v1374_v24 = vmul.f32 %v3957_v3, %v3957_v3 }
 0x2be   : > { %v1099_v23 = vpop.xlane.xlu0 %1098 }
 0x2bf   : > { %v1184_v32 = vadd.f32 1e-05, %v1168_v22  ;;  %v3947_v59 = vmul.f32 0.03125, %v1099_v23 }
 0x2c0   : > { %v1123_v1 = vpop.xlane.xlu2 %1122 }
 0x2c1   : > { %3020 = vrsqrt.f32 %v1184_v32  ;;  %v1153_v30 = vmul.f32 %v3947_v59, %v3947_v59  ;;  %v1145_v46 = vmul.f32 0.03125, %v1123_v1  ;;  %vm1198_vm2 = vweird.f32 %v1184_v32 }
 0x2c2   : > { %v1176_v1 = vsub.f32 %v3862_v13, %v3933_v58 }
 0x2c3   : > { %v1161_v7 = vsub.f32 %v1145_v46, %v1153_v30  ;;  %1387 = vadd.xlane.f32.xlu2 %v1373_v53  ;;  %1110 = vadd.xlane.f32.xlu0 %v3954_v0  ;;  %v3975_v46 = vld [vmem:[%s5160_s6 + $0x1] ss:$0 sm:$0xff] }
 0x2c5   : > { %v1169_v38 = vmax.f32 %v1161_v7, 0.0  ;;  %1365 = vadd.xlane.f32.xlu1 %v3957_v3 }
 0x2c6   : > { %v1101_v27 = vpop.xlane.xlu1 %1100 }
 0x2c7   : > { %v3021_v19 = vpop.eup %3020  ;;  %v1138_v52 = vmul.f32 0.03125, %v1101_v27  ;;  %v1185_v6 = vadd.f32 1e-05, %v1169_v38 }
 0x2c8   : > { %v1193_v35 = vmul.f32 %v3021_v19, %v1184_v32  ;;  %v1125_v33 = vpop.xlane.xlu0 %1124  ;;  %vm1199_vm1 = vweird.f32 %v3021_v19 }
 0x2c9   : > { %v1154_v44 = vmul.f32 %v1138_v52, %v1138_v52  ;;  %v1146_v18 = vmul.f32 0.03125, %v1125_v33  ;;  %3022 = vrsqrt.f32 %v1185_v6  ;;  %vm1200_vm3 = vmor %vm1198_vm2, %vm1199_vm1  ;;  %vm1208_vm5 = vweird.f32 %v1185_v6 }
 0x2ca   : > { %v1194_v55 = vmul.f32 %v3021_v19, %v1193_v35 }
 0x2cb   : > { %v1162_v50 = vsub.f32 %v1146_v18, %v1154_v44  ;;  %1134 = vadd.xlane.f32.xlu2 %v1119_v25  ;;  %1389 = vadd.xlane.f32.xlu0 %v1374_v24 }
 0x2cc   : > { %v1195_v62 = vmul.f32 0.5, %v1194_v55 }
 0x2cd   : > { %v1170_v4 = vmax.f32 %v1162_v50, 0.0 }
 0x2ce   : > { %v1196_v22 = vsub.f32 1.5, %v1195_v62 }
 0x2cf   : > { %v1186_v10 = vadd.f32 1e-05, %v1170_v4  ;;  %v3023_v23 = vpop.eup %3022  ;;  %v5199_v4 = vmax.f32 %v3379_v39, 0.0 }
 0x2d0   : > { %v1197_v40 = vmul.f32 %v3021_v19, %v1196_v22  ;;  %v1203_v20 = vmul.f32 %v3023_v23, %v1185_v6  ;;  %vm1209_vm4 = vweird.f32 %v3023_v23 }
 0x2d1   : > { %3024 = vrsqrt.f32 %v1186_v10  ;;  %vm1210_vm6 = vmor %vm1208_vm5, %vm1209_vm4  ;;  %vm1218_vm8 = vweird.f32 %v1186_v10 }
 0x2d2   : > { %v1201_v28 = vsel %vm1200_vm3, %v3021_v19, %v1197_v40  ;;  %v1204_v30 = vmul.f32 %v3023_v23, %v1203_v20  ;;  %v1177_v19 = vsub.f32 %v3868_v9, %v3947_v59  ;;  %v1178_v9 = vsub.f32 %v3874_v34, %v1138_v52 }
 0x2d3   : > { %v1272_v61 = vmul.f32 %v1201_v28, %v1176_v1 }
 0x2d4   : > { %v1205_v32 = vmul.f32 0.5, %v1204_v30 }
 0x2d5   : > { %v1283_v53 = vmul.f32 %v3970_v41, %v1272_v61 }
 0x2d6   : > { %v1206_v58 = vsub.f32 1.5, %v1205_v32 }
 0x2d7   : > { %v3025_v13 = vpop.eup %3024  ;;  %v1294_v7 = vadd.f32 %v3975_v46, %v1283_v53 }
 0x2d8   : > { %v1213_v38 = vmul.f32 %v3025_v13, %v1186_v10  ;;  %v1207_v27 = vmul.f32 %v3023_v23, %v1206_v58  ;;  %vm1219_vm7 = vweird.f32 %v3025_v13  ;;  %v5200_v10 = vmax.f32 %v3384_v42, 0.0 }
 0x2d9   : > { %v1302_v35 = vmax.f32 %v1294_v7, 0.0  ;;  %vm1220_vm9 = vmor %vm1218_vm8, %vm1219_vm7 }
 0x2da   : > { %v1214_v33 = vmul.f32 %v3025_v13, %v1213_v38  ;;  %v1211_v18 = vsel %vm1210_vm6, %v3023_v23, %v1207_v27 }
 0x2db   : > { %v3983_v44 = vadd.f32 %v1302_v35, %v487_v37  ;;  %v1273_v50 = vmul.f32 %v1211_v18, %v1177_v19 }
 0x2dc   : > { %v1215_v55 = vmul.f32 0.5, %v1214_v33 }
 0x2dd   : > { %1617 = vmatmul.f32.vlgmr.msrb.gmra.mxu2 %v3983_v44  ;;  %v1284_v62 = vmul.f32 %v3970_v41, %v1273_v50 }
 0x2de   : > { %v1216_v25 = vsub.f32 1.5, %v1215_v55 }
 0x2df   : > { %v1295_v24 = vadd.f32 %v3975_v46, %v1284_v62 }
 0x2e0   : > { %v1217_v6 = vmul.f32 %v3025_v13, %v1216_v25 }
 0x2e1   : > { %v1303_v59 = vmax.f32 %v1295_v24, 0.0 }
 0x2e2   : > { %v1221_v36 = vsel %vm1220_vm9, %v3025_v13, %v1217_v6 }
 0x2e3   : > { %v1274_v37 = vmul.f32 %v1221_v36, %v1178_v9  ;;  %v3991_v22 = vadd.f32 %v1303_v59, %v5199_v4 }
 0x2e5   : > { %v1285_v23 = vmul.f32 %v3970_v41, %v1274_v37  ;;  %1620 = vmatmul.f32.gmra.mxu2 %v3991_v22 }
 0x2e7   : > { %v1296_v40 = vadd.f32 %v3975_v46, %v1285_v23 }
 0x2e9   : > { %v1304_v1 = vmax.f32 %v1296_v40, 0.0 }
 0x2eb   : > { %v3998_v20 = vadd.f32 %v1304_v1, %v5200_v10 }
 0x2ed   : > { %1623 = vmatmul.f32.gmra.mxu2 %v3998_v20 }
 0x2f1   : > { %v1352_v52 = vpop.xlane.xlu0 %1351 }
 0x2f2   : > { %v4001_v32 = vmul.f32 0.03125, %v1352_v52 }
 0x2f4   : > { %v1407_v7 = vmul.f32 %v4001_v32, %v4001_v32 }
 0x2fe   : > { %v1103_v34 = vpop.xlane.xlu2 %1102 }
 0x2ff   : > { %v1139_v28 = vmul.f32 0.03125, %v1103_v34 }
 0x300   : > { %v1127_v30 = vpop.xlane.xlu1 %1126 }
 0x301   : > { %v1155_v39 = vmul.f32 %v1139_v28, %v1139_v28  ;;  %v1147_v61 = vmul.f32 0.03125, %v1127_v30 }
 0x303   : > { %v1163_v53 = vsub.f32 %v1147_v61, %v1155_v39 }
 0x305   : > { %v1171_v13 = vmax.f32 %v1163_v53, 0.0 }
 0x306   : > { %v1376_v58 = vpop.xlane.xlu2 %1375  ;;  %v1105_v27 = vpop.xlane.xlu0 %1104 }
 0x307   : > { %v1187_v38 = vadd.f32 1e-05, %v1171_v13  ;;  %v1399_v42 = vmul.f32 0.03125, %v1376_v58  ;;  %v4013_v1 = vmul.f32 0.03125, %v1105_v27 }
 0x308   : > { %v1354_v35 = vpop.xlane.xlu1 %1353 }
 0x309   : > { %3026 = vrsqrt.f32 %v1187_v38  ;;  %v1415_v19 = vsub.f32 %v1399_v42, %v1407_v7  ;;  %v4005_v18 = vmul.f32 0.03125, %v1354_v35  ;;  %v1156_v7 = vmul.f32 %v4013_v1, %v4013_v1 }
 0x30a   : > { %vm1228_vm11 = vweird.f32 %v1187_v38 }
 0x30b   : > { %v1423_v33 = vmax.f32 %v1415_v19, 0.0  ;;  %v1408_v9 = vmul.f32 %v4005_v18, %v4005_v18 }
 0x30d   : > { %v1439_v55 = vadd.f32 1e-05, %v1423_v33 }
 0x30e   : > { %v1356_v50 = vpop.xlane.xlu2 %1355  ;;  %v1378_v6 = vpop.xlane.xlu0 %1377 }
 0x30f   : > { %v3027_v25 = vpop.eup %3026  ;;  %3028 = vrsqrt.f32 %v1439_v55  ;;  %v4007_v62 = vmul.f32 0.03125, %v1356_v50  ;;  %v1400_v36 = vmul.f32 0.03125, %v1378_v6  ;;  %v1179_v6 = vsub.f32 %v3884_v43, %v1139_v28 }
 0x310   : > { %v1223_v24 = vmul.f32 %v3027_v25, %v1187_v38  ;;  %v1380_v59 = vpop.xlane.xlu1 %1379  ;;  %vm1229_vm10 = vweird.f32 %v3027_v25  ;;  %vm1453_vm14 = vweird.f32 %v1439_v55 }
 0x311   : > { %v1409_v37 = vmul.f32 %v4007_v62, %v4007_v62  ;;  %v1401_v4 = vmul.f32 0.03125, %v1380_v59  ;;  %v1416_v40 = vsub.f32 %v1400_v36, %v1408_v9  ;;  %vm1230_vm12 = vmor %vm1228_vm11, %vm1229_vm10 }
 0x312   : > { %v1224_v23 = vmul.f32 %v3027_v25, %v1223_v24 }
 0x313   : > { %v1417_v10 = vsub.f32 %v1401_v4, %v1409_v37  ;;  %v1424_v52 = vmax.f32 %v1416_v40, 0.0 }
 0x314   : > { %v1225_v34 = vmul.f32 0.5, %v1224_v23 }
 0x315   : > { %v3029_v30 = vpop.eup %3028  ;;  %v1425_v39 = vmax.f32 %v1417_v10, 0.0  ;;  %v4015_v13 = vadd.f32 1e-05, %v1424_v52 }
 0x316   : > { %v1226_v61 = vsub.f32 1.5, %v1225_v34  ;;  %v1448_v53 = vmul.f32 %v3029_v30, %v1439_v55  ;;  %v1129_v58 = vpop.xlane.xlu2 %1128  ;;  %v1358_v19 = vpop.xlane.xlu0 %1357  ;;  %vm1454_vm13 = vweird.f32 %v3029_v30 }
 0x317   : > { %v4019_v42 = vadd.f32 1e-05, %v1425_v39  ;;  %v1148_v35 = vmul.f32 0.03125, %v1129_v58  ;;  %3030 = vrsqrt.f32 %v4015_v13  ;;  %v4024_v23 = vmul.f32 0.03125, %v1358_v19  ;;  %vm1455_vm15 = vmor %vm1453_vm14, %vm1454_vm13 }
 0x318   : > { %v1227_v27 = vmul.f32 %v3027_v25, %v1226_v61  ;;  %v1449_v33 = vmul.f32 %v3029_v30, %v1448_v53  ;;  %v1107_v50 = vpop.xlane.xlu1 %1106  ;;  %vm1463_vm2 = vweird.f32 %v4015_v13 }
 0x319   : > { %3032 = vrsqrt.f32 %v4019_v42  ;;  %v1164_v24 = vsub.f32 %v1148_v35, %v1156_v7  ;;  %v4028_v38 = vmul.f32 0.03125, %v1107_v50  ;;  %v1410_v55 = vmul.f32 %v4024_v23, %v4024_v23 }
 0x31a   : > { %v1450_v9 = vmul.f32 0.5, %v1449_v33  ;;  %v1231_v59 = vsel %vm1230_vm12, %v3027_v25, %v1227_v27  ;;  %v1431_v25 = vsub.f32 %v3880_v12, %v4001_v32  ;;  %vm1473_vm4 = vweird.f32 %v4019_v42 }
 0x31b   : > { %v1172_v36 = vmax.f32 %v1164_v24, 0.0  ;;  %v1275_v37 = vmul.f32 %v1231_v59, %v1179_v6  ;;  %v1157_v12 = vmul.f32 %v4028_v38, %v4028_v38 }
 0x31c   : > { %v1451_v4 = vsub.f32 1.5, %v1450_v9 }
 0x31d   : > { %v4026_v40 = vadd.f32 1e-05, %v1172_v36  ;;  %v1286_v10 = vmul.f32 %v3970_v41, %v1275_v37  ;;  %v4031_v34 = vpop.eup %3030 }
 0x31e   : > { %v1452_v43 = vmul.f32 %v3029_v30, %v1451_v4  ;;  %v1382_v28 = vpop.xlane.xlu2 %1381  ;;  %v1458_v39 = vmul.f32 %v4031_v34, %v4015_v13  ;;  %v1131_v61 = vpop.xlane.xlu0 %1130  ;;  %vm1464_vm0 = vweird.f32 %v4031_v34 }
 0x31f   : > { %v4033_v52 = vpop.eup %3032  ;;  %3034 = vrsqrt.f32 %v4026_v40  ;;  %v1402_v7 = vmul.f32 0.03125, %v1382_v28  ;;  %v1149_v32 = vmul.f32 0.03125, %v1131_v61  ;;  %v1297_v27 = vadd.f32 %v3975_v46, %v1286_v10  ;;  %vm1465_vm3 = vmor %vm1463_vm2, %vm1464_vm0 }
 0x320   : > { %v1456_v53 = vsel %vm1455_vm15, %v3029_v30, %v1452_v43  ;;  %v1468_v58 = vmul.f32 %v4033_v52, %v4019_v42  ;;  %v1360_v35 = vpop.xlane.xlu1 %1359  ;;  %v1459_v19 = vmul.f32 %v4031_v34, %v1458_v39  ;;  %vm1474_vm1 = vweird.f32 %v4033_v52 }
 0x321   : > { %v1418_v50 = vsub.f32 %v1402_v7, %v1410_v55  ;;  %v1527_v30 = vmul.f32 %v1456_v53, %v1431_v25  ;;  %v1165_v24 = vsub.f32 %v1149_v32, %v1157_v12  ;;  %v1305_v36 = vmax.f32 %v1297_v27, 0.0  ;;  %vm4090_vm5 = vmor %vm1473_vm4, %vm1474_vm1 }
 0x322   : > { %v1469_v33 = vmul.f32 %v4033_v52, %v1468_v58  ;;  %v1460_v6 = vmul.f32 0.5, %v1459_v19  ;;  %v4052_v43 = vmul.f32 0.03125, %v1360_v35  ;;  %v5201_v7 = vmax.f32 %v3389_v45, 0.0 }
 0x323   : > { %v1426_v59 = vmax.f32 %v1418_v50, 0.0  ;;  %v1173_v28 = vmax.f32 %v1165_v24, 0.0  ;;  %v1535_v53 = vmul.f32 %v3970_v41, %v1527_v30  ;;  %v5204_v42 = vmax.f32 %v3414_v60, 0.0 }
 0x324   : > { %v1470_v9 = vmul.f32 0.5, %v1469_v33  ;;  %v1461_v4 = vsub.f32 1.5, %v1460_v6  ;;  %v4064_v19 = vadd.f32 %v1305_v36, %v5201_v7  ;;  %v1411_v50 = vmul.f32 %v4052_v43, %v4052_v43 }
 0x325   : > { %v4049_v37 = vpop.eup %3034  ;;  %v4056_v61 = vadd.f32 1e-05, %v1426_v59  ;;  %v4060_v55 = vadd.f32 1e-05, %v1173_v28  ;;  %v1543_v24 = vadd.f32 %v3975_v46, %v1535_v53  ;;  %vm1238_vm7 = vweird.f32 %v4026_v40 }
 0x326   : > { %v1471_v39 = vsub.f32 1.5, %v1470_v9  ;;  %v1233_v10 = vmul.f32 %v4049_v37, %v4026_v40  ;;  %v1362_v25 = vpop.xlane.xlu2 %1361  ;;  %v1462_v58 = vmul.f32 %v4031_v34, %v1461_v4  ;;  %v1384_v12 = vpop.xlane.xlu0 %1383  ;;  %1626 = vmatmul.f32.gmra.mxu2 %v4064_v19  ;;  %v1432_v9 = vsub.f32 %v3895_v21, %v4005_v18 }
 0x327   : > { %v4066_v35 = vmul.f32 0.03125, %v1362_v25  ;;  %3036 = vrsqrt.f32 %v4056_v61  ;;  %v1403_v6 = vmul.f32 0.03125, %v1384_v12  ;;  %vm1239_vm6 = vweird.f32 %v4049_v37 }
 0x328   : > { %v1234_v32 = vmul.f32 %v4049_v37, %v1233_v10  ;;  %v1386_v27 = vpop.xlane.xlu1 %1385  ;;  %v1472_v33 = vmul.f32 %v4033_v52, %v1471_v39  ;;  %3038 = vrsqrt.f32 %v4060_v55  ;;  %v1466_v59 = vsel %vm1465_vm3, %v4031_v34, %v1462_v58  ;;  %vm4129_vm8 = vmor %vm1238_vm7, %vm1239_vm6 }
 0x329   : > { %v1412_v45 = vmul.f32 %v4066_v35, %v4066_v35  ;;  %v1404_v30 = vmul.f32 0.03125, %v1386_v27  ;;  %v1419_v28 = vsub.f32 %v1403_v6, %v1411_v50  ;;  %v1551_v39 = vmax.f32 %v1543_v24, 0.0 }
 0x32a   : > { %v1235_v13 = vmul.f32 0.5, %v1234_v32  ;;  %v1433_v10 = vsub.f32 %v3900_v47, %v4007_v62  ;;  %v1528_v53 = vmul.f32 %v1466_v59, %v1432_v9  ;;  %v1476_v47 = vsel %vm4090_vm5, %v4033_v52, %v1472_v33 }
 0x32b   : > { %v1420_v4 = vsub.f32 %v1404_v30, %v1412_v45  ;;  %v1427_v18 = vmax.f32 %v1419_v28, 0.0  ;;  %v4098_v34 = vadd.f32 %v1551_v39, %v5204_v42  ;;  %v1180_v59 = vsub.f32 %v3892_v16, %v4013_v1 }
 0x32c   : > { %v1236_v36 = vsub.f32 1.5, %v1235_v13  ;;  %v1536_v33 = vmul.f32 %v3970_v41, %v1528_v53  ;;  %v1529_v9 = vmul.f32 %v1476_v47, %v1433_v10  ;;  %v1181_v28 = vsub.f32 %v3913_v56, %v4028_v38 }
 0x32d   : > { %v4094_v7 = vpop.eup %3036  ;;  %v1428_v21 = vmax.f32 %v1420_v4, 0.0  ;;  %v4115_v13 = vadd.f32 1e-05, %v1427_v18  ;;  %1872 = vmatmul.f32.vlgmr.msrb.gmra.mxu3 %v4098_v34  ;;  %v1434_v53 = vsub.f32 %v3910_v49, %v4024_v23  ;;  %vm1483_vm9 = vweird.f32 %v4056_v61 }
 0x32e   : > { %v1109_v58 = vpop.xlane.xlu2 %1108  ;;  %v4103_v62 = vpop.eup %3038  ;;  %v1237_v12 = vmul.f32 %v4049_v37, %v1236_v36  ;;  %v1478_v32 = vmul.f32 %v4094_v7, %v4056_v61  ;;  %v1544_v40 = vadd.f32 %v3975_v46, %v1536_v33  ;;  %v1537_v38 = vmul.f32 %v3970_v41, %v1529_v9 }
 0x32f   : > { %v4109_v27 = vmul.f32 0.03125, %v1109_v58  ;;  %v1364_v50 = vpop.xlane.xlu0 %1363  ;;  %v1243_v60 = vmul.f32 %v4103_v62, %v4060_v55  ;;  %v4113_v45 = vadd.f32 1e-05, %v1428_v21  ;;  %v1435_v21 = vsub.f32 %v3922_v26, %v4052_v43 }
 0x330   : > { %v1133_v52 = vpop.xlane.xlu1 %1132  ;;  %v1479_v30 = vmul.f32 %v4094_v7, %v1478_v32  ;;  %v4136_v1 = vmul.f32 0.03125, %v1364_v50  ;;  %v1241_v25 = vsel %vm4129_vm8, %v4049_v37, %v1237_v12  ;;  %v1552_v42 = vmax.f32 %v1544_v40, 0.0 }
 0x331   : > { %v1158_v6 = vmul.f32 %v4109_v27, %v4109_v27  ;;  %v1150_v24 = vmul.f32 0.03125, %v1133_v52  ;;  %v1244_v36 = vmul.f32 %v4103_v62, %v1243_v60  ;;  %3040 = vrsqrt.f32 %v4113_v45 }
 0x332   : > { %v1480_v39 = vmul.f32 0.5, %v1479_v30  ;;  %3042 = vrsqrt.f32 %v4115_v13  ;;  %v1276_v47 = vmul.f32 %v1241_v25, %v1180_v59  ;;  %vm1248_vm10 = vweird.f32 %v4060_v55 }
 0x333   : > { %v1166_v10 = vsub.f32 %v1150_v24, %v1158_v6  ;;  %v1245_v16 = vmul.f32 0.5, %v1244_v36  ;;  %vm1249_vm11 = vweird.f32 %v4103_v62  ;;  %v1413_v52 = vmul.f32 %v4136_v1, %v4136_v1 }
 0x334   : > { %v1481_v32 = vsub.f32 1.5, %v1480_v39  ;;  %v5207_v33 = vmax.f32 %v3419_v63, 0.0  ;;  %v1287_v6 = vmul.f32 %v3970_v41, %v1276_v47  ;;  %v1545_v4 = vadd.f32 %v3975_v46, %v1537_v38  ;;  %vm1250_vm13 = vmor %vm1248_vm10, %vm1249_vm11 }
 0x335   : > { %v1174_v56 = vmax.f32 %v1166_v10, 0.0  ;;  %v1246_v18 = vsub.f32 1.5, %v1245_v16  ;;  %v1436_v39 = vsub.f32 %v3926_v31, %v4066_v35  ;;  %vm1484_vm12 = vweird.f32 %v4094_v7 }
 0x336   : > { %v1388_v58 = vpop.xlane.xlu2 %1387  ;;  %v4158_v30 = vadd.f32 %v1552_v42, %v5207_v33  ;;  %v1482_v40 = vmul.f32 %v4094_v7, %v1481_v32  ;;  %v1553_v32 = vmax.f32 %v1545_v4, 0.0  ;;  %vm4190_vm15 = vmor %vm1483_vm9, %vm1484_vm12  ;;  %v5210_v4 = vmax.f32 %v3394_v48, 0.0 }
 0x337   : > { %v4149_v50 = vadd.f32 1e-05, %v1174_v56  ;;  %v1405_v37 = vmul.f32 0.03125, %v1388_v58  ;;  %v1111_v12 = vpop.xlane.xlu0 %1110  ;;  %v4151_v60 = vpop.eup %3040  ;;  %v1247_v9 = vmul.f32 %v4103_v62, %v1246_v18  ;;  %v1298_v56 = vadd.f32 %v3975_v46, %v1287_v6 }
 0x338   : > { %v4161_v24 = vpop.eup %3042  ;;  %v1498_v59 = vmul.f32 %v4151_v60, %v4113_v45  ;;  %v1366_v36 = vpop.xlane.xlu1 %1365  ;;  %1875 = vmatmul.f32.gmra.mxu3 %v4158_v30  ;;  %v4173_v16 = vmul.f32 0.03125, %v1111_v12  ;;  %vm1493_vm0 = vweird.f32 %v4115_v13  ;;  %vm1504_vm1 = vweird.f32 %v4151_v60 }
 0x339   : > { %3044 = vrsqrt.f32 %v4149_v50  ;;  %v1488_v63 = vmul.f32 %v4161_v24, %v4115_v13  ;;  %v1421_v10 = vsub.f32 %v1405_v37, %v1413_v52  ;;  %vm1494_vm14 = vweird.f32 %v4161_v24 }
 0x33a   : > { %v1499_v25 = vmul.f32 %v4151_v60, %v1498_v59  ;;  %v4185_v42 = vmul.f32 0.03125, %v1366_v36  ;;  %v1306_v47 = vmax.f32 %v1298_v56, 0.0  ;;  %v1251_v37 = vsel %vm1250_vm13, %v4103_v62, %v1247_v9  ;;  %vm1495_vm2 = vmor %vm1493_vm0, %vm1494_vm14 }
 0x33b   : > { %v1489_v38 = vmul.f32 %v4161_v24, %v1488_v63  ;;  %v1429_v18 = vmax.f32 %v1421_v10, 0.0  ;;  %v1159_v33 = vmul.f32 %v4173_v16, %v4173_v16  ;;  %v1277_v59 = vmul.f32 %v1251_v37, %v1181_v28 }
 0x33c   : > { %v1500_v58 = vmul.f32 0.5, %v1499_v25  ;;  %v4200_v10 = vadd.f32 %v1306_v47, %v5210_v4  ;;  %v1486_v9 = vsel %vm4190_vm15, %v4094_v7, %v1482_v40  ;;  %v1414_v48 = vmul.f32 %v4185_v42, %v4185_v42 }
 0x33d   : > { %v1490_v55 = vmul.f32 0.5, %v1489_v38  ;;  %v4194_v52 = vadd.f32 1e-05, %v1429_v18  ;;  %v5211_v38 = vmax.f32 %v3424_v2, 0.0  ;;  %v1288_v47 = vmul.f32 %v3970_v41, %v1277_v59 }
 0x33e   : > { %v1135_v6 = vpop.xlane.xlu2 %1134  ;;  %v1501_v63 = vsub.f32 1.5, %v1500_v58  ;;  %1629 = vmatmul.f32.gmra.mxu2 %v4200_v10  ;;  %v1530_v2 = vmul.f32 %v1486_v9, %v1434_v53  ;;  %vm1503_vm3 = vweird.f32 %v4113_v45  ;;  %vm1258_vm6 = vweird.f32 %v4149_v50 }
 0x33f   : > { %v3045_v36 = vpop.eup %3044  ;;  %v1151_v62 = vmul.f32 0.03125, %v1135_v6  ;;  %v1390_v61 = vpop.xlane.xlu0 %1389  ;;  %v1491_v25 = vsub.f32 1.5, %v1490_v55  ;;  %3046 = vrsqrt.f32 %v4194_v52  ;;  %v4209_v28 = vadd.f32 %v1553_v32, %v5211_v38  ;;  %vm4234_vm4 = vmor %vm1503_vm3, %vm1504_vm1 }
 0x340   : > { %v1253_v56 = vmul.f32 %v3045_v36, %v4149_v50  ;;  %v1406_v58 = vmul.f32 0.03125, %v1390_v61  ;;  %v1502_v13 = vmul.f32 %v4151_v60, %v1501_v63  ;;  %v1299_v55 = vadd.f32 %v3975_v46, %v1288_v47 }
 0x341   : > { %v1167_v18 = vsub.f32 %v1151_v62, %v1159_v33  ;;  %v1492_v7 = vmul.f32 %v4161_v24, %v1491_v25  ;;  %1878 = vmatmul.f32.gmra.mxu3 %v4209_v28  ;;  %v1538_v33 = vmul.f32 %v3970_v41, %v1530_v2  ;;  %vm1259_vm5 = vweird.f32 %v3045_v36 }
 0x342   : > { %v1254_v40 = vmul.f32 %v3045_v36, %v1253_v56  ;;  %v1422_v37 = vsub.f32 %v1406_v58, %v1414_v48  ;;  %v1307_v62 = vmax.f32 %v1299_v55, 0.0  ;;  %v1506_v26 = vsel %vm4234_vm4, %v4151_v60, %v1502_v13  ;;  %vm1260_vm7 = vmor %vm1258_vm6, %vm1259_vm5 }
 0x343   : > { %v1175_v32 = vmax.f32 %v1167_v18, 0.0  ;;  %v1496_v6 = vsel %vm1495_vm2, %v4161_v24, %v1492_v7  ;;  %v1546_v61 = vadd.f32 %v3975_v46, %v1538_v33  ;;  %v5214_v24 = vmax.f32 %v3399_v51, 0.0 }
 0x344   : > { %v1255_v12 = vmul.f32 0.5, %v1254_v40  ;;  %v1430_v23 = vmax.f32 %v1422_v37, 0.0  ;;  %v1531_v53 = vmul.f32 %v1496_v6, %v1435_v21  ;;  %v1182_v56 = vsub.f32 %v3936_v29, %v4109_v27 }
 0x345   : > { %v4229_v49 = vadd.f32 1e-05, %v1175_v32  ;;  %v3047_v59 = vpop.eup %3046  ;;  %v4247_v9 = vadd.f32 %v1307_v62, %v5214_v24  ;;  %v1554_v25 = vmax.f32 %v1546_v61, 0.0  ;;  %v5215_v48 = vmax.f32 %v3429_v5, 0.0 }
 0x346   : > { %v1256_v4 = vsub.f32 1.5, %v1255_v12  ;;  %v1508_v45 = vmul.f32 %v3047_v59, %v4194_v52  ;;  %v1446_v21 = vadd.f32 1e-05, %v1430_v23  ;;  %v1539_v38 = vmul.f32 %v3970_v41, %v1531_v53 }
 0x347   : > { %3048 = vrsqrt.f32 %v4229_v49  ;;  %1632 = vmatmul.f32.gmra.mxu2 %v4247_v9  ;;  %v4255_v60 = vadd.f32 %v1554_v25, %v5215_v48  ;;  %v1532_v51 = vmul.f32 %v1506_v26, %v1436_v39  ;;  %vm1514_vm8 = vweird.f32 %v3047_v59 }
 0x348   : > { %v1257_v43 = vmul.f32 %v3045_v36, %v1256_v4  ;;  %v1509_v50 = vmul.f32 %v3047_v59, %v1508_v45  ;;  %3050 = vrsqrt.f32 %v1446_v21  ;;  %v1547_v7 = vadd.f32 %v3975_v46, %v1539_v38 }
 0x349   : > { %1881 = vmatmul.f32.gmra.mxu3 %v4255_v60  ;;  %vm1513_vm9 = vweird.f32 %v4194_v52  ;;  %v1437_v39 = vsub.f32 %v3941_v15, %v4136_v1  ;;  %v5216_v37 = vmax.f32 %v3434_v8, 0.0  ;;  %v5217_v4 = vmax.f32 %v3404_v54, 0.0 }
 0x34a   : > { %v1261_v18 = vsel %vm1260_vm7, %v3045_v36, %v1257_v43  ;;  %v1510_v58 = vmul.f32 0.5, %v1509_v50  ;;  %v1555_v47 = vmax.f32 %v1547_v7, 0.0  ;;  %v1540_v36 = vmul.f32 %v3970_v41, %v1532_v51  ;;  %vm1515_vm10 = vmor %vm1513_vm9, %vm1514_vm8 }
 0x34b   : > { %v1278_v29 = vmul.f32 %v1261_v18, %v1182_v56  ;;  %vm1268_vm12 = vweird.f32 %v4229_v49  ;;  %v1183_v45 = vsub.f32 %v3954_v0, %v4173_v16  ;;  %vm1523_vm15 = vweird.f32 %v1446_v21  ;;  %v4294_v0 = vld [vmem:[%s5158_s4 + $0x2] ss:$0 sm:$0xff] }
 0x34c   : > { %v1511_v40 = vsub.f32 1.5, %v1510_v58  ;;  %v4271_v12 = vadd.f32 %v1555_v47, %v5216_v37  ;;  %v1548_v53 = vadd.f32 %v3975_v46, %v1540_v36  ;;  %v1438_v25 = vsub.f32 %v3957_v3, %v4185_v42 }
 0x34d   : > { %v3049_v27 = vpop.eup %3048  ;;  %v1289_v2 = vmul.f32 %v3970_v41, %v1278_v29  ;;  %v5218_v56 = vmax.f32 %v3439_v11, 0.0  ;;  %v5219_v7 = vmax.f32 %v3409_v57, 0.0  ;;  %v5221_v57 = vmax.f32 %v3449_v17, 0.0 }
 0x34e   : > { %v1263_v5 = vmul.f32 %v3049_v27, %v4229_v49  ;;  %v1512_v13 = vmul.f32 %v3047_v59, %v1511_v40  ;;  %v3051_v35 = vpop.eup %3050  ;;  %vm1269_vm11 = vweird.f32 %v3049_v27  ;;  %v1556_v1 = vmax.f32 %v1548_v53, 0.0  ;;  %v2118_v53 = vld [vmem:[#allocation2 + $0x1e0] sm:$0xff] }
 0x34f   : > { %v1300_v31 = vadd.f32 %v3975_v46, %v1289_v2  ;;  %v1518_v55 = vmul.f32 %v3051_v35, %v1446_v21  ;;  %vm1270_vm13 = vmor %vm1268_vm12, %vm1269_vm11  ;;  %vm1524_vm14 = vweird.f32 %v3051_v35  ;;  %v5220_v40 = vmax.f32 %v3444_v14, 0.0 }
 0x350   : > { %v1264_v32 = vmul.f32 %v3049_v27, %v1263_v5  ;;  %v1516_v6 = vsel %vm1515_vm10, %v3047_v59, %v1512_v13  ;;  %vm1525_vm0 = vmor %vm1523_vm15, %vm1524_vm14  ;;  %v4288_v49 = vadd.f32 %v1556_v1, %v5218_v56  ;;  %v2116_v56 = vld [vmem:[#allocation2 + $0x1d0] sm:$0xff] }
 0x351   : > { %v1308_v33 = vmax.f32 %v1300_v31, 0.0  ;;  %v1533_v63 = vmul.f32 %v1516_v6, %v1437_v39  ;;  %v1519_v52 = vmul.f32 %v3051_v35, %v1518_v55  ;;  %1884 = vmatmul.f32.gmra.mxu3 %v4271_v12  ;;  %v2121_v31 = vld [vmem:[#allocation2 + $0x1f8] sm:$0xff]  ;;  %v2119_v55 = vld [vmem:[#allocation2 + $0x1e8] sm:$0xff] }
 0x352   : > { %v1265_v23 = vmul.f32 0.5, %v1264_v32  ;;  %2131 = vmatpush.msrb.mxu0 %v2121_v31  ;;  %2386 = vmatpush.msra.mxu1 %v2121_v31  ;;  %v2110_v31 = vld [vmem:[#allocation2 + $0x1a0] sm:$0xff] }
 0x353   : > { %v4276_v62 = vadd.f32 %v1308_v33, %v5217_v4  ;;  %v1520_v15 = vmul.f32 0.5, %v1519_v52  ;;  %v1541_v59 = vmul.f32 %v3970_v41, %v1533_v63 }
 0x354   : > { %v1266_v61 = vsub.f32 1.5, %v1265_v23 }
 0x355   : > { %1635 = vmatmul.f32.gmra.mxu2 %v4276_v62  ;;  %v1521_v54 = vsub.f32 1.5, %v1520_v15  ;;  %v1549_v50 = vadd.f32 %v3975_v46, %v1541_v59 }
 0x356   : > { %v1267_v8 = vmul.f32 %v3049_v27, %v1266_v61 }
 0x357   : > { %v1522_v43 = vmul.f32 %v3051_v35, %v1521_v54  ;;  %v1557_v42 = vmax.f32 %v1549_v50, 0.0 }
 0x358   : > { %v1271_v26 = vsel %vm1270_vm13, %v3049_v27, %v1267_v8 }
 0x359   : > { %v1279_v24 = vmul.f32 %v1271_v26, %v1183_v45  ;;  %v1526_v38 = vsel %vm1525_vm0, %v3051_v35, %v1522_v43  ;;  %1887 = vmatmul.f32.gmra.mxu3 %v4288_v49  ;;  %v4313_v47 = vadd.f32 %v1557_v42, %v5220_v40  ;;  %v2120_v35 = vld [vmem:[#allocation2 + $0x1f0] sm:$0xff]  ;;  %v2117_v26 = vld [vmem:[#allocation2 + $0x1d8] sm:$0xff] }
 0x35a   : > { %v1534_v21 = vmul.f32 %v1526_v38, %v1438_v25  ;;  %2132 = vmatpush.msrb.mxu0 %v2120_v35  ;;  %2387 = vmatpush.msra.mxu1 %v2120_v35  ;;  %v2115_v38 = vld [vmem:[#allocation2 + $0x1c8] sm:$0xff] }
 0x35b   : > { %v1290_v16 = vmul.f32 %v3970_v41, %v1279_v24 }
 0x35c   : > { %v1542_v11 = vmul.f32 %v3970_v41, %v1534_v21  ;;  %2133 = vmatpush.msrb.mxu0 %v2119_v55  ;;  %2388 = vmatpush.msra.mxu1 %v2119_v55 }
 0x35d   : > { %v1301_v3 = vadd.f32 %v3975_v46, %v1290_v16 }
 0x35e   : > { %v1550_v58 = vadd.f32 %v3975_v46, %v1542_v11  ;;  %2134 = vmatpush.msrb.mxu0 %v2118_v53  ;;  %2389 = vmatpush.msra.mxu1 %v2118_v53  ;;  %v2108_v53 = vld [vmem:[#allocation2 + $0x190] sm:$0xff] }
 0x35f   : > { %v1309_v51 = vmax.f32 %v1301_v3, 0.0 }
 0x360   : > { %v1618_v48 = vpop.f32.mrf.mxu2  ;;  %v1558_v41 = vmax.f32 %v1550_v58, 0.0  ;;  %2135 = vmatpush.msrb.mxu0 %v2117_v26  ;;  %2390 = vmatpush.msra.mxu1 %v2117_v26 }
 0x361   : > { %v4301_v18 = vadd.f32 %v4294_v0, %v1618_v48  ;;  %v4306_v29 = vadd.f32 %v1309_v51, %v5219_v7  ;;  %1890 = vmatmul.f32.gmra.mxu3 %v4313_v47  ;;  %v2114_v51 = vld [vmem:[#allocation2 + $0x1c0] sm:$0xff] }
 0x362   : > { %v4319_v2 = vadd.f32 %v1558_v41, %v5221_v57  ;;  %2136 = vmatpush.msrb.mxu0 %v2116_v56  ;;  %2391 = vmatpush.msra.mxu1 %v2116_v56  ;;  %v2112_v41 = vld [vmem:[#allocation2 + $0x1b0] sm:$0xff] }
 0x363   : > { %1642 = vadd.xlane.f32.xlu1 %v4301_v18  ;;  %v1658_v27 = vmul.f32 %v4301_v18, %v4301_v18  ;;  %1638 = vmatmul.f32.gmra.mxu2 %v4306_v29 }
 0x364   : > { %2137 = vmatpush.msrb.mxu0 %v2115_v38  ;;  %2392 = vmatpush.msra.mxu1 %v2115_v38 }
 0x365   : > { %1666 = vadd.xlane.f32.xlu0 %v1658_v27  ;;  %v2113_v27 = vld [vmem:[#allocation2 + $0x1b8] sm:$0xff] }
 0x366   : > { %2138 = vmatpush.msrb.mxu0 %v2114_v51  ;;  %2393 = vmatpush.msra.mxu1 %v2114_v51 }
 0x368   : > { %v1621_v46 = vpop.f32.mrf.mxu2  ;;  %2139 = vmatpush.msrb.mxu0 %v2113_v27  ;;  %2394 = vmatpush.msra.mxu1 %v2113_v27 }
 0x369   : > { %v4322_v5 = vadd.f32 %v4294_v0, %v1621_v46  ;;  %1893 = vmatmul.f32.gmra.mxu3 %v4319_v2 }
 0x36a   : > { %2140 = vmatpush.msrb.mxu0 %v2112_v41  ;;  %2395 = vmatpush.msra.mxu1 %v2112_v41 }
 0x36b   : > { %1644 = vadd.xlane.f32.xlu2 %v4322_v5  ;;  %v1659_v14 = vmul.f32 %v4322_v5, %v4322_v5 }
 0x36d   : > { %1668 = vadd.xlane.f32.xlu1 %v1659_v14 }
 0x370   : > { %v1624_v36 = vpop.f32.mrf.mxu2 }
 0x371   : > { %v4329_v13 = vadd.f32 %v4294_v0, %v1624_v36  ;;  %v2111_v36 = vld [vmem:[#allocation2 + $0x1a8] sm:$0xff] }
 0x372   : > { %2141 = vmatpush.msrb.mxu0 %v2111_v36  ;;  %2396 = vmatpush.msra.mxu1 %v2111_v36 }
 0x373   : > { %1646 = vadd.xlane.f32.xlu0 %v4329_v13  ;;  %v1660_v17 = vmul.f32 %v4329_v13, %v4329_v13 }
 0x374   : > { %2142 = vmatpush.msrb.mxu0 %v2110_v31  ;;  %2397 = vmatpush.msra.mxu1 %v2110_v31 }
 0x375   : > { %1670 = vadd.xlane.f32.xlu2 %v1660_v17 }
 0x3a9   : > { %v1627_v39 = vpop.f32.mrf.mxu2 }
 0x3aa   : > { %v4335_v32 = vadd.f32 %v4294_v0, %v1627_v39 }
 0x3ac   : > { %1648 = vadd.xlane.f32.xlu1 %v4335_v32  ;;  %v1661_v37 = vmul.f32 %v4335_v32, %v4335_v32 }
 0x3ae   : > { %1672 = vadd.xlane.f32.xlu0 %v1661_v37  ;;  %v2109_v37 = vld [vmem:[#allocation2 + $0x198] sm:$0xff] }
 0x3af   : > { %2143 = vmatpush.msrb.mxu0 %v2109_v37  ;;  %2398 = vmatpush.msra.mxu1 %v2109_v37 }
 0x3b0   : > { %v1873_v33 = vpop.f32.mrf.mxu3 }
 0x3b1   : > { %v4341_v6 = vadd.f32 %v4294_v0, %v1873_v33  ;;  %2144 = vmatpush.msrb.mxu0 %v2108_v53  ;;  %2399 = vmatpush.msra.mxu1 %v2108_v53 }
 0x3b3   : > { %1897 = vadd.xlane.f32.xlu2 %v4341_v6  ;;  %v1913_v23 = vmul.f32 %v4341_v6, %v4341_v6 }
 0x3b5   : > { %1921 = vadd.xlane.f32.xlu1 %v1913_v23 }
 0x3bb   : > { %v1876_v63 = vpop.f32.mrf.mxu3 }
 0x3bc   : > { %v4347_v52 = vadd.f32 %v4294_v0, %v1876_v63 }
 0x3be   : > { %1899 = vadd.xlane.f32.xlu0 %v4347_v52  ;;  %v1914_v45 = vmul.f32 %v4347_v52, %v4347_v52 }
 0x3c1   : > { %v1630_v4 = vpop.f32.mrf.mxu2 }
 0x3c2   : > { %v4351_v61 = vadd.f32 %v4294_v0, %v1630_v4 }
 0x3c4   : > { %v1879_v15 = vpop.f32.mrf.mxu3  ;;  %1650 = vadd.xlane.f32.xlu2 %v4351_v61  ;;  %v1662_v54 = vmul.f32 %v4351_v61, %v4351_v61 }
 0x3c5   : > { %v4354_v8 = vadd.f32 %v4294_v0, %v1879_v15 }
 0x3c7   : > { %1901 = vadd.xlane.f32.xlu1 %v4354_v8  ;;  %v1915_v1 = vmul.f32 %v4354_v8, %v4354_v8 }
 0x3c9   : > { %1925 = vadd.xlane.f32.xlu0 %v1915_v1  ;;  %v2107_v1 = vld [vmem:[#allocation2 + $0x188] sm:$0xff] }
 0x3ca   : > { %v1633_v59 = vpop.f32.mrf.mxu2  ;;  %2145 = vmatpush.msrb.mxu0 %v2107_v1  ;;  %2400 = vmatpush.msra.mxu1 %v2107_v1 }
 0x3cb   : > { %v4365_v24 = vadd.f32 %v4294_v0, %v1633_v59 }
 0x3cc   : > { %v1882_v43 = vpop.f32.mrf.mxu3  ;;  %1923 = vadd.xlane.f32.xlu2 %v1914_v45 }
 0x3cd   : > { %v4368_v25 = vadd.f32 %v4294_v0, %v1882_v43  ;;  %v1663_v46 = vmul.f32 %v4365_v24, %v4365_v24  ;;  %v2106_v43 = vld [vmem:[#allocation2 + $0x180] sm:$0xff] }
 0x3ce   : > { %2146 = vmatpush.msrb.mxu0 %v2106_v43  ;;  %2401 = vmatpush.msra.mxu1 %v2106_v43 }
 0x3cf   : > { %1674 = vadd.xlane.f32.xlu1 %v1662_v54  ;;  %v1916_v21 = vmul.f32 %v4368_v25, %v4368_v25 }
 0x3d1   : > { %1652 = vadd.xlane.f32.xlu0 %v4365_v24 }
 0x3d4   : > { %v1885_v42 = vpop.f32.mrf.mxu3  ;;  %1903 = vadd.xlane.f32.xlu2 %v4368_v25 }
 0x3d5   : > { %v4379_v58 = vadd.f32 %v4294_v0, %v1885_v42 }
 0x3d6   : > { %v1643_v50 = vpop.xlane.xlu1 %1642 }
 0x3d7   : > { %v4371_v16 = vmul.f32 0.03125, %v1643_v50  ;;  %1927 = vadd.xlane.f32.xlu1 %v1916_v21  ;;  %v1917_v54 = vmul.f32 %v4379_v58, %v4379_v58 }
 0x3d8   : > { %v1667_v3 = vpop.xlane.xlu0 %1666  ;;  %v1636_v15 = vpop.f32.mrf.mxu2 }
 0x3d9   : > { %v1698_v48 = vmul.f32 %v4371_v16, %v4371_v16  ;;  %v1690_v11 = vmul.f32 0.03125, %v1667_v3  ;;  %1905 = vadd.xlane.f32.xlu0 %v4379_v58  ;;  %v4397_v56 = vadd.f32 %v4294_v0, %v1636_v15 }
 0x3db   : > { %v1706_v7 = vsub.f32 %v1690_v11, %v1698_v48  ;;  %v1664_v27 = vmul.f32 %v4397_v56, %v4397_v56 }
 0x3dc   : > { %v1888_v35 = vpop.f32.mrf.mxu3  ;;  %1676 = vadd.xlane.f32.xlu2 %v1663_v46 }
 0x3dd   : > { %v1714_v40 = vmax.f32 %v1706_v7, 0.0  ;;  %v4387_v55 = vadd.f32 %v4294_v0, %v1888_v35  ;;  %v1722_v35 = vsub.f32 %v4301_v18, %v4371_v16  ;;  %v4422_v18 = vld [vmem:[%s5160_s6 + $0x2] ss:$0 sm:$0xff] }
 0x3de   : > { %v1645_v14 = vpop.xlane.xlu2 %1644 }
 0x3df   : > { %v1730_v57 = vadd.f32 1e-05, %v1714_v40  ;;  %v4384_v17 = vmul.f32 0.03125, %v1645_v14  ;;  %1907 = vadd.xlane.f32.xlu1 %v4387_v55  ;;  %v1918_v63 = vmul.f32 %v4387_v55, %v4387_v55 }
 0x3e0   : > { %v1669_v39 = vpop.xlane.xlu1 %1668 }
 0x3e1   : > { %3052 = vrsqrt.f32 %v1730_v57  ;;  %v1699_v33 = vmul.f32 %v4384_v17, %v4384_v17  ;;  %v1691_v23 = vmul.f32 0.03125, %v1669_v39  ;;  %1931 = vadd.xlane.f32.xlu0 %v1918_v63  ;;  %vm1744_vm2 = vweird.f32 %v1730_v57 }
 0x3e3   : > { %v1707_v4 = vsub.f32 %v1691_v23, %v1699_v33  ;;  %v4415_v23 = vld [vmem:[%s5159_s5 + $0x2] ss:$0 sm:$0xff] }
 0x3e4   : > { %v1891_v3 = vpop.f32.mrf.mxu3  ;;  %1929 = vadd.xlane.f32.xlu2 %v1917_v54 }
 0x3e5   : > { %v1715_v59 = vmax.f32 %v1707_v4, 0.0  ;;  %v4407_v46 = vadd.f32 %v4294_v0, %v1891_v3 }
 0x3e6   : > { %v1647_v26 = vpop.xlane.xlu0 %1646 }
 0x3e7   : > { %v3053_v45 = vpop.eup %3052  ;;  %v1731_v38 = vadd.f32 1e-05, %v1715_v59  ;;  %v4399_v21 = vmul.f32 0.03125, %v1647_v26  ;;  %1654 = vadd.xlane.f32.xlu1 %v4397_v56  ;;  %v1919_v53 = vmul.f32 %v4407_v46, %v4407_v46 }
 0x3e8   : > { %v1739_v50 = vmul.f32 %v3053_v45, %v1730_v57  ;;  %v1671_v42 = vpop.xlane.xlu2 %1670  ;;  %vm1745_vm1 = vweird.f32 %v3053_v45  ;;  %v1639_v57 = vpop.f32.mrf.mxu2 }
 0x3e9   : > { %3054 = vrsqrt.f32 %v1731_v38  ;;  %v1700_v11 = vmul.f32 %v4399_v21, %v4399_v21  ;;  %v1692_v51 = vmul.f32 0.03125, %v1671_v42  ;;  %1678 = vadd.xlane.f32.xlu0 %v1664_v27  ;;  %vm1746_vm3 = vmor %vm1744_vm2, %vm1745_vm1  ;;  %v4429_v54 = vadd.f32 %v4294_v0, %v1639_v57 }
 0x3ea   : > { %v1740_v48 = vmul.f32 %v3053_v45, %v1739_v50  ;;  %vm1754_vm5 = vweird.f32 %v1731_v38  ;;  %v1723_v42 = vsub.f32 %v4322_v5, %v4384_v17 }
 0x3eb   : > { %v1708_v40 = vsub.f32 %v1692_v51, %v1700_v11 }
 0x3ec   : > { %v1741_v7 = vmul.f32 0.5, %v1740_v48  ;;  %v1894_v37 = vpop.f32.mrf.mxu3  ;;  %1909 = vadd.xlane.f32.xlu2 %v4407_v46 }
 0x3ed   : > { %v1716_v14 = vmax.f32 %v1708_v40, 0.0  ;;  %v4425_v16 = vadd.f32 %v4294_v0, %v1894_v37  ;;  %v1665_v0 = vmul.f32 %v4429_v54, %v4429_v54 }
 0x3ee   : > { %v1742_v41 = vsub.f32 1.5, %v1741_v7 }
 0x3ef   : > { %v3055_v36 = vpop.eup %3054  ;;  %v1732_v33 = vadd.f32 1e-05, %v1716_v14  ;;  %1933 = vadd.xlane.f32.xlu1 %v1919_v53  ;;  %v1920_v40 = vmul.f32 %v4425_v16, %v4425_v16 }
 0x3f0   : > { %v1743_v31 = vmul.f32 %v3053_v45, %v1742_v41  ;;  %v1749_v39 = vmul.f32 %v3055_v36, %v1731_v38  ;;  %vm1755_vm4 = vweird.f32 %v3055_v36 }
 0x3f1   : > { %3056 = vrsqrt.f32 %v1732_v33  ;;  %1911 = vadd.xlane.f32.xlu0 %v4425_v16  ;;  %vm1756_vm6 = vmor %vm1754_vm5, %vm1755_vm4  ;;  %vm1764_vm8 = vweird.f32 %v1732_v33 }
 0x3f2   : > { %v1747_v63 = vsel %vm1746_vm3, %v3053_v45, %v1743_v31  ;;  %v1750_v4 = vmul.f32 %v3055_v36, %v1749_v39 }
 0x3f3   : > { %v1818_v15 = vmul.f32 %v1747_v63, %v1722_v35 }
 0x3f4   : > { %v1751_v1 = vmul.f32 0.5, %v1750_v4  ;;  %1656 = vadd.xlane.f32.xlu2 %v4429_v54 }
 0x3f5   : > { %v1829_v59 = vmul.f32 %v4415_v23, %v1818_v15 }
 0x3f6   : > { %v1752_v45 = vsub.f32 1.5, %v1751_v1 }
 0x3f7   : > { %v1840_v26 = vadd.f32 %v4422_v18, %v1829_v59  ;;  %v3057_v43 = vpop.eup %3056  ;;  %1680 = vadd.xlane.f32.xlu1 %v1665_v0 }
 0x3f8   : > { %v1753_v3 = vmul.f32 %v3055_v36, %v1752_v45  ;;  %v1759_v48 = vmul.f32 %v3057_v43, %v1732_v33  ;;  %vm1765_vm7 = vweird.f32 %v3057_v43 }
 0x3f9   : > { %v1848_v50 = vmax.f32 %v1840_v26, 0.0  ;;  %vm1766_vm9 = vmor %vm1764_vm8, %vm1765_vm7 }
 0x3fa   : > { %v1757_v11 = vsel %vm1756_vm6, %v3055_v36, %v1753_v3  ;;  %v1760_v51 = vmul.f32 %v3057_v43, %v1759_v48  ;;  %v1724_v36 = vsub.f32 %v4329_v13, %v4399_v21 }
 0x3fb   : > { %2147 = vmatmul.f32.vlgmr.msrb.gmra.mxu0 %v1848_v50  ;;  %v1819_v7 = vmul.f32 %v1757_v11, %v1723_v42 }
 0x3fc   : > { %v1761_v27 = vmul.f32 0.5, %v1760_v51  ;;  %1935 = vadd.xlane.f32.xlu2 %v1920_v40 }
 0x3fd   : > { %v1830_v38 = vmul.f32 %v4415_v23, %v1819_v7 }
 0x3fe   : > { %v1762_v41 = vsub.f32 1.5, %v1761_v27 }
 0x3ff   : > { %v1841_v5 = vadd.f32 %v4422_v18, %v1830_v38 }
 0x400   : > { %v1763_v14 = vmul.f32 %v3057_v43, %v1762_v41 }
 0x401   : > { %v1849_v17 = vmax.f32 %v1841_v5, 0.0 }
 0x402   : > { %v1767_v31 = vsel %vm1766_vm9, %v3057_v43, %v1763_v14 }
 0x403   : > { %2150 = vmatmul.f32.gmra.mxu0 %v1849_v17  ;;  %v1820_v35 = vmul.f32 %v1767_v31, %v1724_v36 }
 0x405   : > { %v1831_v39 = vmul.f32 %v4415_v23, %v1820_v35 }
 0x407   : > { %v1842_v37 = vadd.f32 %v4422_v18, %v1831_v39 }
 0x409   : > { %v1850_v53 = vmax.f32 %v1842_v37, 0.0 }
 0x40b   : > { %2153 = vmatmul.f32.gmra.mxu0 %v1850_v53 }
 0x41f   : > { %v1649_v63 = vpop.xlane.xlu1 %1648 }
 0x420   : > { %v1685_v4 = vmul.f32 0.03125, %v1649_v63 }
 0x421   : > { %v1673_v57 = vpop.xlane.xlu0 %1672 }
 0x422   : > { %v1701_v15 = vmul.f32 %v1685_v4, %v1685_v4  ;;  %v1693_v33 = vmul.f32 0.03125, %v1673_v57  ;;  %v1725_v31 = vsub.f32 %v4335_v32, %v1685_v4 }
 0x424   : > { %v1709_v1 = vsub.f32 %v1693_v33, %v1701_v15 }
 0x426   : > { %v1717_v59 = vmax.f32 %v1709_v1, 0.0  ;;  %v1898_v45 = vpop.xlane.xlu2 %1897 }
 0x427   : > { %v1937_v26 = vmul.f32 0.03125, %v1898_v45 }
 0x428   : > { %v1733_v13 = vadd.f32 1e-05, %v1717_v59  ;;  %v1922_v21 = vpop.xlane.xlu1 %1921 }
 0x429   : > { %v1953_v50 = vmul.f32 %v1937_v26, %v1937_v26  ;;  %v1945_v43 = vmul.f32 0.03125, %v1922_v21 }
 0x42a   : > { %3058 = vrsqrt.f32 %v1733_v13  ;;  %vm1774_vm11 = vweird.f32 %v1733_v13 }
 0x42b   : > { %v1961_v3 = vsub.f32 %v1945_v43, %v1953_v50 }
 0x42d   : > { %v1969_v42 = vmax.f32 %v1961_v3, 0.0 }
 0x42f   : > { %v1985_v48 = vadd.f32 1e-05, %v1969_v42 }
 0x430   : > { %v3059_v0 = vpop.eup %3058 }
 0x431   : > { %v1769_v11 = vmul.f32 %v3059_v0, %v1733_v13  ;;  %3060 = vrsqrt.f32 %v1985_v48  ;;  %v1900_v51 = vpop.xlane.xlu0 %1899  ;;  %vm1775_vm10 = vweird.f32 %v3059_v0  ;;  %vm1999_vm14 = vweird.f32 %v1985_v48 }
 0x432   : > { %vm1776_vm12 = vmor %vm1774_vm11, %vm1775_vm10  ;;  %v4451_v15 = vmul.f32 0.03125, %v1900_v51 }
 0x433   : > { %v1770_v7 = vmul.f32 %v3059_v0, %v1769_v11 }
 0x434   : > { %v1954_v50 = vmul.f32 %v4451_v15, %v4451_v15 }
 0x435   : > { %v1771_v27 = vmul.f32 0.5, %v1770_v7  ;;  %v1977_v7 = vsub.f32 %v4341_v6, %v1937_v26 }
 0x437   : > { %v3061_v38 = vpop.eup %3060  ;;  %v1772_v40 = vsub.f32 1.5, %v1771_v27  ;;  %v1651_v41 = vpop.xlane.xlu2 %1650 }
 0x438   : > { %v1994_v5 = vmul.f32 %v3061_v38, %v1985_v48  ;;  %v4453_v1 = vmul.f32 0.03125, %v1651_v41  ;;  %vm2000_vm13 = vweird.f32 %v3061_v38 }
 0x439   : > { %v1773_v36 = vmul.f32 %v3059_v0, %v1772_v40  ;;  %vm2001_vm15 = vmor %vm1999_vm14, %vm2000_vm13 }
 0x43a   : > { %v1902_v17 = vpop.xlane.xlu1 %1901  ;;  %v1995_v35 = vmul.f32 %v3061_v38, %v1994_v5 }
 0x43b   : > { %v4446_v14 = vmul.f32 0.03125, %v1902_v17  ;;  %v1777_v63 = vsel %vm1776_vm12, %v3059_v0, %v1773_v36  ;;  %v1702_v0 = vmul.f32 %v4453_v1, %v4453_v1 }
 0x43c   : > { %v1926_v39 = vpop.xlane.xlu0 %1925  ;;  %v1996_v57 = vmul.f32 0.5, %v1995_v35  ;;  %v1821_v33 = vmul.f32 %v1777_v63, %v1725_v31 }
 0x43d   : > { %v1955_v37 = vmul.f32 %v4446_v14, %v4446_v14  ;;  %v1947_v53 = vmul.f32 0.03125, %v1926_v39 }
 0x43e   : > { %v1997_v45 = vsub.f32 1.5, %v1996_v57  ;;  %v1832_v13 = vmul.f32 %v4415_v23, %v1821_v33 }
 0x43f   : > { %v1963_v59 = vsub.f32 %v1947_v53, %v1955_v37  ;;  %v1924_v4 = vpop.xlane.xlu2 %1923 }
 0x440   : > { %v1998_v21 = vmul.f32 %v3061_v38, %v1997_v45  ;;  %v1946_v43 = vmul.f32 0.03125, %v1924_v4  ;;  %v1843_v42 = vadd.f32 %v4422_v18, %v1832_v13 }
 0x441   : > { %v1971_v32 = vmax.f32 %v1963_v59, 0.0 }
 0x442   : > { %v1675_v3 = vpop.xlane.xlu1 %1674  ;;  %v2002_v48 = vsel %vm2001_vm15, %v3061_v38, %v1998_v21  ;;  %v1962_v27 = vsub.f32 %v1946_v43, %v1954_v50  ;;  %v1851_v41 = vmax.f32 %v1843_v42, 0.0 }
 0x443   : > { %v4461_v11 = vadd.f32 1e-05, %v1971_v32  ;;  %v1694_v51 = vmul.f32 0.03125, %v1675_v3  ;;  %v2073_v36 = vmul.f32 %v2002_v48, %v1977_v7 }
 0x444   : > { %v1653_v40 = vpop.xlane.xlu0 %1652  ;;  %v1970_v17 = vmax.f32 %v1962_v27, 0.0  ;;  %2156 = vmatmul.f32.gmra.mxu0 %v1851_v41 }
 0x445   : > { %3062 = vrsqrt.f32 %v4461_v11  ;;  %v1710_v5 = vsub.f32 %v1694_v51, %v1702_v0  ;;  %v2081_v39 = vmul.f32 %v4415_v23, %v2073_v36  ;;  %v4476_v21 = vmul.f32 0.03125, %v1653_v40 }
 0x446   : > { %v1986_v35 = vadd.f32 1e-05, %v1970_v17  ;;  %vm2019_vm2 = vweird.f32 %v4461_v11 }
 0x447   : > { %v1718_v31 = vmax.f32 %v1710_v5, 0.0  ;;  %v1904_v53 = vpop.xlane.xlu2 %1903  ;;  %v2089_v26 = vadd.f32 %v4422_v18, %v2081_v39  ;;  %v1703_v5 = vmul.f32 %v4476_v21, %v4476_v21 }
 0x448   : > { %3064 = vrsqrt.f32 %v1986_v35  ;;  %v4466_v63 = vmul.f32 0.03125, %v1904_v53  ;;  %vm2009_vm5 = vweird.f32 %v1986_v35 }
 0x449   : > { %v1734_v37 = vadd.f32 1e-05, %v1718_v31  ;;  %v2097_v13 = vmax.f32 %v2089_v26, 0.0  ;;  %v1978_v31 = vsub.f32 %v4347_v52, %v4451_v15 }
 0x44a   : > { %v1928_v6 = vpop.xlane.xlu1 %1927  ;;  %v1956_v59 = vmul.f32 %v4466_v63, %v4466_v63 }
 0x44b   : > { %v4469_v38 = vpop.eup %3062  ;;  %3066 = vrsqrt.f32 %v1734_v37  ;;  %v1948_v57 = vmul.f32 0.03125, %v1928_v6  ;;  %2402 = vmatmul.f32.vlgmr.msra.gmra.mxu1 %v2097_v13  ;;  %vm1784_vm6 = vweird.f32 %v1734_v37 }
 0x44c   : > { %v2014_v33 = vmul.f32 %v4469_v38, %v4461_v11  ;;  %v1906_v45 = vpop.xlane.xlu0 %1905  ;;  %vm2020_vm0 = vweird.f32 %v4469_v38 }
 0x44d   : > { %v1964_v4 = vsub.f32 %v1948_v57, %v1956_v59  ;;  %v4488_v57 = vmul.f32 0.03125, %v1906_v45  ;;  %vm4494_vm4 = vmor %vm2019_vm2, %vm2020_vm0 }
 0x44e   : > { %v2015_v32 = vmul.f32 %v4469_v38, %v2014_v33  ;;  %v3065_v50 = vpop.eup %3064 }
 0x44f   : > { %v1972_v3 = vmax.f32 %v1964_v4, 0.0  ;;  %v2004_v0 = vmul.f32 %v3065_v50, %v1986_v35  ;;  %v1677_v51 = vpop.xlane.xlu2 %1676  ;;  %vm2010_vm1 = vweird.f32 %v3065_v50  ;;  %v1957_v11 = vmul.f32 %v4488_v57, %v4488_v57 }
 0x450   : > { %v2016_v43 = vmul.f32 0.5, %v2015_v32  ;;  %v1695_v17 = vmul.f32 0.03125, %v1677_v51  ;;  %vm4503_vm7 = vmor %vm2009_vm5, %vm2010_vm1  ;;  %v1726_v35 = vsub.f32 %v4351_v61, %v4453_v1 }
 0x451   : > { %v3067_v42 = vpop.eup %3066  ;;  %v4478_v48 = vadd.f32 1e-05, %v1972_v3  ;;  %v2005_v41 = vmul.f32 %v3065_v50, %v2004_v0 }
 0x452   : > { %v1779_v7 = vmul.f32 %v3067_v42, %v1734_v37  ;;  %v2017_v27 = vsub.f32 1.5, %v2016_v43  ;;  %v1908_v40 = vpop.xlane.xlu1 %1907  ;;  %v1711_v53 = vsub.f32 %v1695_v17, %v1703_v5  ;;  %vm1785_vm3 = vweird.f32 %v3067_v42 }
 0x453   : > { %3068 = vrsqrt.f32 %v4478_v48  ;;  %v2006_v39 = vmul.f32 0.5, %v2005_v41  ;;  %v4485_v6 = vmul.f32 0.03125, %v1908_v40  ;;  %vm1786_vm8 = vmor %vm1784_vm6, %vm1785_vm3  ;;  %vm2029_vm10 = vweird.f32 %v4478_v48 }
 0x454   : > { %v1780_v36 = vmul.f32 %v3067_v42, %v1779_v7  ;;  %v1932_v33 = vpop.xlane.xlu0 %1931  ;;  %v1719_v13 = vmax.f32 %v1711_v53, 0.0  ;;  %v2018_v4 = vmul.f32 %v4469_v38, %v2017_v27 }
 0x455   : > { %v2007_v59 = vsub.f32 1.5, %v2006_v39  ;;  %v1958_v32 = vmul.f32 %v4485_v6, %v4485_v6  ;;  %v1950_v15 = vmul.f32 0.03125, %v1932_v33 }
 0x456   : > { %v1781_v26 = vmul.f32 0.5, %v1780_v36  ;;  %v4498_v45 = vadd.f32 1e-05, %v1719_v13  ;;  %v2022_v17 = vsel %vm4494_vm4, %v4469_v38, %v2018_v4  ;;  %v1979_v13 = vsub.f32 %v4354_v8, %v4446_v14 }
 0x457   : > { %v1930_v3 = vpop.xlane.xlu2 %1929  ;;  %v2008_v0 = vmul.f32 %v3065_v50, %v2007_v59  ;;  %v1966_v27 = vsub.f32 %v1950_v15, %v1958_v32 }
 0x458   : > { %v1782_v52 = vsub.f32 1.5, %v1781_v26  ;;  %v1949_v41 = vmul.f32 0.03125, %v1930_v3  ;;  %3070 = vrsqrt.f32 %v4498_v45  ;;  %vm1794_vm13 = vweird.f32 %v4498_v45 }
 0x459   : > { %v4500_v51 = vpop.eup %3068  ;;  %v1974_v36 = vmax.f32 %v1966_v27, 0.0  ;;  %v2012_v53 = vsel %vm4503_vm7, %v3065_v50, %v2008_v0 }
 0x45a   : > { %v1783_v5 = vmul.f32 %v3067_v42, %v1782_v52  ;;  %v2024_v37 = vmul.f32 %v4500_v51, %v4478_v48  ;;  %v1965_v40 = vsub.f32 %v1949_v41, %v1957_v11  ;;  %v1655_v39 = vpop.xlane.xlu1 %1654  ;;  %v2074_v33 = vmul.f32 %v2012_v53, %v1978_v31 }
 0x45b   : > { %v4521_v1 = vmul.f32 0.03125, %v1655_v39  ;;  %v4525_v32 = vadd.f32 1e-05, %v1974_v36  ;;  %v2075_v31 = vmul.f32 %v2022_v17, %v1979_v13  ;;  %vm2030_vm9 = vweird.f32 %v4500_v51 }
 0x45c   : > { %v1787_v26 = vsel %vm1786_vm8, %v3067_v42, %v1783_v5  ;;  %v2025_v61 = vmul.f32 %v4500_v51, %v2024_v37  ;;  %v1973_v52 = vmax.f32 %v1965_v40, 0.0  ;;  %v1679_v38 = vpop.xlane.xlu0 %1678  ;;  %v2082_v42 = vmul.f32 %v4415_v23, %v2074_v33  ;;  %vm4548_vm11 = vmor %vm2029_vm10, %vm2030_vm9 }
 0x45d   : > { %v1822_v59 = vmul.f32 %v1787_v26, %v1726_v35  ;;  %v1704_v15 = vmul.f32 %v4521_v1, %v4521_v1  ;;  %v1696_v43 = vmul.f32 0.03125, %v1679_v38  ;;  %3072 = vrsqrt.f32 %v4525_v32 }
 0x45e   : > { %v2026_v4 = vmul.f32 0.5, %v2025_v61  ;;  %v4530_v50 = vadd.f32 1e-05, %v1973_v52  ;;  %v4533_v3 = vpop.eup %3070  ;;  %v2090_v5 = vadd.f32 %v4422_v18, %v2082_v42  ;;  %v2083_v36 = vmul.f32 %v4415_v23, %v2075_v31 }
 0x45f   : > { %v1712_v8 = vsub.f32 %v1696_v43, %v1704_v15  ;;  %v1910_v14 = vpop.xlane.xlu2 %1909  ;;  %v1833_v7 = vmul.f32 %v4415_v23, %v1822_v59  ;;  %v1789_v11 = vmul.f32 %v4533_v3, %v4498_v45  ;;  %v1980_v38 = vsub.f32 %v4368_v25, %v4466_v63 }
 0x460   : > { %v2027_v0 = vsub.f32 1.5, %v2026_v4  ;;  %3074 = vrsqrt.f32 %v4530_v50  ;;  %v4540_v41 = vmul.f32 0.03125, %v1910_v14  ;;  %v2098_v59 = vmax.f32 %v2090_v5, 0.0 }
 0x461   : > { %v1720_v27 = vmax.f32 %v1712_v8, 0.0  ;;  %v1844_v35 = vadd.f32 %v4422_v18, %v1833_v7  ;;  %v1790_v37 = vmul.f32 %v4533_v3, %v1789_v11  ;;  %v2091_v31 = vadd.f32 %v4422_v18, %v2083_v36 }
 0x462   : > { %v1934_v17 = vpop.xlane.xlu1 %1933  ;;  %v2028_v40 = vmul.f32 %v4500_v51, %v2027_v0  ;;  %v1959_v26 = vmul.f32 %v4540_v41, %v4540_v41  ;;  %2405 = vmatmul.f32.gmra.mxu1 %v2098_v59  ;;  %vm1795_vm12 = vweird.f32 %v4533_v3  ;;  %vm2039_vm0 = vweird.f32 %v4530_v50 }
 0x463   : > { %v4552_v53 = vadd.f32 1e-05, %v1720_v27  ;;  %v1951_v61 = vmul.f32 0.03125, %v1934_v17  ;;  %v4556_v33 = vpop.eup %3072  ;;  %v1791_v48 = vmul.f32 0.5, %v1790_v37  ;;  %v1852_v13 = vmax.f32 %v1844_v35, 0.0  ;;  %vm4576_vm14 = vmor %vm1794_vm13, %vm1795_vm12 }
 0x464   : > { %v2032_v52 = vsel %vm4548_vm11, %v4500_v51, %v2028_v40  ;;  %v2044_v4 = vmul.f32 %v4556_v33, %v4525_v32  ;;  %v1912_v27 = vpop.xlane.xlu0 %1911  ;;  %v1727_v35 = vsub.f32 %v4365_v24, %v4476_v21  ;;  %v2099_v39 = vmax.f32 %v2091_v31, 0.0 }
 0x465   : > { %3076 = vrsqrt.f32 %v4552_v53  ;;  %v1792_v43 = vsub.f32 1.5, %v1791_v48  ;;  %v1967_v42 = vsub.f32 %v1951_v61, %v1959_v26  ;;  %2159 = vmatmul.f32.gmra.mxu0 %v1852_v13  ;;  %v2076_v25 = vmul.f32 %v2032_v52, %v1980_v38 }
 0x466   : > { %v3075_v15 = vpop.eup %3074  ;;  %v2045_v0 = vmul.f32 %v4556_v33, %v2044_v4  ;;  %v4593_v59 = vmul.f32 0.03125, %v1912_v27  ;;  %vm2050_vm1 = vweird.f32 %v4556_v33  ;;  %vm2049_vm3 = vweird.f32 %v4525_v32 }
 0x467   : > { %v2034_v51 = vmul.f32 %v3075_v15, %v4530_v50  ;;  %v1657_v8 = vpop.xlane.xlu2 %1656  ;;  %v1975_v63 = vmax.f32 %v1967_v42, 0.0  ;;  %v1793_v5 = vmul.f32 %v4533_v3, %v1792_v43  ;;  %v2084_v24 = vmul.f32 %v4415_v23, %v2076_v25  ;;  %vm4622_vm5 = vmor %vm2049_vm3, %vm2050_vm1 }
 0x468   : > { %v4570_v14 = vmul.f32 0.03125, %v1657_v8  ;;  %v2046_v7 = vmul.f32 0.5, %v2045_v0  ;;  %vm2040_vm15 = vweird.f32 %v3075_v15  ;;  %v1981_v43 = vsub.f32 %v4379_v58, %v4488_v57  ;;  %v4610_v57 = vld [vmem:[%s5158_s4 + $0x3] ss:$0 sm:$0xff] }
 0x469   : > { %v2035_v11 = vmul.f32 %v3075_v15, %v2034_v51  ;;  %v4580_v17 = vadd.f32 1e-05, %v1975_v63  ;;  %v1797_v48 = vsel %vm4576_vm14, %v4533_v3, %v1793_v5  ;;  %v1982_v3 = vsub.f32 %v4387_v55, %v4485_v6  ;;  %vm2041_vm2 = vmor %vm2039_vm0, %vm2040_vm15 }
 0x46a   : > { %v1705_v36 = vmul.f32 %v4570_v14, %v4570_v14  ;;  %v1681_v40 = vpop.xlane.xlu1 %1680  ;;  %v2047_v13 = vsub.f32 1.5, %v2046_v7  ;;  %v1823_v4 = vmul.f32 %v1797_v48, %v1727_v35  ;;  %2408 = vmatmul.f32.gmra.mxu1 %v2099_v39  ;;  %v2092_v8 = vadd.f32 %v4422_v18, %v2084_v24 }
 0x46b   : > { %v4584_v45 = vpop.eup %3076  ;;  %v2036_v26 = vmul.f32 0.5, %v2035_v11  ;;  %v1697_v61 = vmul.f32 0.03125, %v1681_v40  ;;  %3078 = vrsqrt.f32 %v4580_v17  ;;  %v1960_v55 = vmul.f32 %v4593_v59, %v4593_v59 }
 0x46c   : > { %v1799_v21 = vmul.f32 %v4584_v45, %v4552_v53  ;;  %v1834_v51 = vmul.f32 %v4415_v23, %v1823_v4  ;;  %v2048_v11 = vmul.f32 %v4556_v33, %v2047_v13  ;;  %vm1805_vm4 = vweird.f32 %v4584_v45 }
 0x46d   : > { %v2037_v52 = vsub.f32 1.5, %v2036_v26  ;;  %v1713_v38 = vsub.f32 %v1697_v61, %v1705_v36  ;;  %v2100_v40 = vmax.f32 %v2092_v8, 0.0  ;;  %vm1804_vm6 = vweird.f32 %v4552_v53 }
 0x46e   : > { %v1800_v42 = vmul.f32 %v4584_v45, %v1799_v21  ;;  %v1845_v63 = vadd.f32 %v4422_v18, %v1834_v51  ;;  %v2052_v13 = vsel %vm4622_vm5, %v4556_v33, %v2048_v11  ;;  %vm1806_vm7 = vmor %vm1804_vm6, %vm1805_vm4  ;;  %vm2059_vm9 = vweird.f32 %v4580_v17 }
 0x46f   : > { %v1721_v31 = vmax.f32 %v1713_v38, 0.0  ;;  %v1936_v0 = vpop.xlane.xlu2 %1935  ;;  %v2038_v25 = vmul.f32 %v3075_v15, %v2037_v52  ;;  %v1728_v52 = vsub.f32 %v4397_v56, %v4521_v1  ;;  %v2078_v56 = vmul.f32 %v2052_v13, %v1982_v3 }
 0x470   : > { %v1801_v58 = vmul.f32 0.5, %v1800_v42  ;;  %v1952_v6 = vmul.f32 0.03125, %v1936_v0  ;;  %v1853_v61 = vmax.f32 %v1845_v63, 0.0 }
 0x471   : > { %v4612_v50 = vadd.f32 1e-05, %v1721_v31  ;;  %v2042_v7 = vsel %vm2041_vm2, %v3075_v15, %v2038_v25  ;;  %v3079_v27 = vpop.eup %3078  ;;  %v2086_v3 = vmul.f32 %v4415_v23, %v2078_v56 }
 0x472   : > { %v1802_v5 = vsub.f32 1.5, %v1801_v58  ;;  %v1968_v35 = vsub.f32 %v1952_v6, %v1960_v55  ;;  %v2077_v37 = vmul.f32 %v2042_v7, %v1981_v43  ;;  %v2054_v36 = vmul.f32 %v3079_v27, %v4580_v17  ;;  %2162 = vmatmul.f32.gmra.mxu0 %v1853_v61  ;;  %2411 = vmatmul.f32.gmra.mxu1 %v2100_v40 }
 0x473   : > { %3080 = vrsqrt.f32 %v4612_v50  ;;  %vm2060_vm8 = vweird.f32 %v3079_v27  ;;  %v1983_v17 = vsub.f32 %v4407_v46, %v4540_v41  ;;  %vm1814_vm12 = vweird.f32 %v4612_v50 }
 0x474   : > { %v1976_v26 = vmax.f32 %v1968_v35, 0.0  ;;  %v2085_v32 = vmul.f32 %v4415_v23, %v2077_v37  ;;  %v2055_v24 = vmul.f32 %v3079_v27, %v2054_v36  ;;  %v1803_v21 = vmul.f32 %v4584_v45, %v1802_v5  ;;  %vm4647_vm10 = vmor %vm2059_vm9, %vm2060_vm8 }
 0x475   : > { %v1729_v41 = vsub.f32 %v4429_v54, %v4570_v14  ;;  %v1984_v54 = vsub.f32 %v4425_v16, %v4593_v59 }
 0x476   : > { %v1992_v38 = vadd.f32 1e-05, %v1976_v26  ;;  %v2093_v4 = vadd.f32 %v4422_v18, %v2085_v32  ;;  %v2056_v43 = vmul.f32 0.5, %v2055_v24  ;;  %v1807_v42 = vsel %vm1806_vm7, %v4584_v45, %v1803_v21 }
 0x477   : > { %v1824_v33 = vmul.f32 %v1807_v42, %v1728_v52 }
 0x478   : > { %v2148_v39 = vpop.f32.mrf.mxu0  ;;  %3082 = vrsqrt.f32 %v1992_v38  ;;  %v2057_v31 = vsub.f32 1.5, %v2056_v43  ;;  %v2101_v51 = vmax.f32 %v2093_v4, 0.0  ;;  %vm2069_vm15 = vweird.f32 %v1992_v38 }
 0x479   : > { %v4628_v48 = vadd.f32 %v4610_v57, %v2148_v39  ;;  %v3081_v1 = vpop.eup %3080  ;;  %v1835_v8 = vmul.f32 %v4415_v23, %v1824_v33  ;;  %v2094_v39 = vadd.f32 %v4422_v18, %v2086_v3 }
 0x47a   : > { %v1809_v0 = vmul.f32 %v3081_v1, %v4612_v50  ;;  %v2058_v25 = vmul.f32 %v3079_v27, %v2057_v31  ;;  %2414 = vmatmul.f32.gmra.mxu1 %v2101_v51  ;;  %vm1815_vm11 = vweird.f32 %v3081_v1 }
 0x47b   : > { %v2188_v53 = vmul.f32 %v4628_v48, %v4628_v48  ;;  %2172 = vadd.xlane.f32.xlu0 %v4628_v48  ;;  %v1846_v55 = vadd.f32 %v4422_v18, %v1835_v8  ;;  %vm1816_vm13 = vmor %vm1814_vm12, %vm1815_vm11  ;;  %v2102_v61 = vmax.f32 %v2094_v39, 0.0 }
 0x47c   : > { %v1810_v45 = vmul.f32 %v3081_v1, %v1809_v0  ;;  %v2062_v7 = vsel %vm4647_vm10, %v3079_v27, %v2058_v25 }
 0x47d   : > { %2196 = vadd.xlane.f32.xlu2 %v2188_v53  ;;  %v1854_v35 = vmax.f32 %v1846_v55, 0.0  ;;  %v2079_v15 = vmul.f32 %v2062_v7, %v1983_v17  ;;  %v2663_v17 = vld [vmem:[%s5161_s7 + $0x60] sm:$0xff] }
 0x47e   : > { %v3083_v11 = vpop.eup %3082  ;;  %v1811_v5 = vmul.f32 0.5, %v1810_v45  ;;  %v2665_v45 = vld [vmem:[%s5161_s7 + $0x70] sm:$0xff] }
 0x47f   : > { %v2064_v37 = vmul.f32 %v3083_v11, %v1992_v38  ;;  %2165 = vmatmul.f32.gmra.mxu0 %v1854_v35  ;;  %v2087_v32 = vmul.f32 %v4415_v23, %v2079_v15  ;;  %vm2070_vm14 = vweird.f32 %v3083_v11 }
 0x480   : > { %v2151_v6 = vpop.f32.mrf.mxu0  ;;  %v1812_v40 = vsub.f32 1.5, %v1811_v5  ;;  %vm2071_vm0 = vmor %vm2069_vm15, %vm2070_vm14  ;;  %v2662_v5 = vld [vmem:[%s5161_s7 + $0x58] sm:$0xff] }
 0x481   : > { %v4654_v63 = vadd.f32 %v4610_v57, %v2151_v6  ;;  %v2065_v27 = vmul.f32 %v3083_v11, %v2064_v37  ;;  %v2095_v14 = vadd.f32 %v4422_v18, %v2087_v32  ;;  %v2661_v37 = vld [vmem:[%s5161_s7 + $0x50] sm:$0xff]  ;;  %v2659_v32 = vld [vmem:[%s5161_s7 + $0x40] sm:$0xff] }
 0x482   : > { %v1813_v46 = vmul.f32 %v3081_v1, %v1812_v40  ;;  %2417 = vmatmul.f32.gmra.mxu1 %v2102_v61 }
 0x483   : > { %2174 = vadd.xlane.f32.xlu1 %v4654_v63  ;;  %v2189_v36 = vmul.f32 %v4654_v63, %v4654_v63  ;;  %v2066_v26 = vmul.f32 0.5, %v2065_v27 }
 0x484   : > { %v1817_v24 = vsel %vm1816_vm13, %v3081_v1, %v1813_v46  ;;  %v2103_v1 = vmax.f32 %v2095_v14, 0.0 }
 0x485   : > { %2198 = vadd.xlane.f32.xlu0 %v2189_v36  ;;  %v2067_v21 = vsub.f32 1.5, %v2066_v26  ;;  %v1825_v13 = vmul.f32 %v1817_v24, %v1729_v41  ;;  %v2660_v41 = vld [vmem:[%s5161_s7 + $0x48] sm:$0xff] }
 0x487   : > { %v1836_v50 = vmul.f32 %v4415_v23, %v1825_v13  ;;  %v2068_v53 = vmul.f32 %v3083_v11, %v2067_v21  ;;  %v2658_v21 = vld [vmem:[%s5161_s7 + $0x38] sm:$0xff] }
 0x488   : > { %v2154_v52 = vpop.f32.mrf.mxu0 }
 0x489   : > { %v4669_v4 = vadd.f32 %v4610_v57, %v2154_v52  ;;  %v1847_v42 = vadd.f32 %v4422_v18, %v1836_v50  ;;  %v2072_v33 = vsel %vm2071_vm0, %v3083_v11, %v2068_v53  ;;  %v2664_v11 = vld [vmem:[%s5161_s7 + $0x68] sm:$0xff]  ;;  %v2657_v50 = vld [vmem:[%s5161_s7 + $0x30] sm:$0xff] }
 0x48a   : > { %v2080_v56 = vmul.f32 %v2072_v33, %v1984_v54  ;;  %2420 = vmatmul.f32.gmra.mxu1 %v2103_v1 }
 0x48b   : > { %2176 = vadd.xlane.f32.xlu2 %v4669_v4  ;;  %v2190_v43 = vmul.f32 %v4669_v4, %v4669_v4  ;;  %v1855_v38 = vmax.f32 %v1847_v42, 0.0 }
 0x48c   : > { %v2088_v31 = vmul.f32 %v4415_v23, %v2080_v56 }
 0x48d   : > { %2200 = vadd.xlane.f32.xlu1 %v2190_v43  ;;  %2168 = vmatmul.f32.gmra.mxu0 %v1855_v38  ;;  %v2656_v38 = vld [vmem:[%s5161_s7 + $0x28] sm:$0xff] }
 0x48e   : > { %v2096_v16 = vadd.f32 %v4422_v18, %v2088_v31  ;;  %v2666_v18 = vld [vmem:[%s5161_s7 + $0x78] sm:$0xff] }
 0x48f   : > { %2671 = vmatpush.msra.mxu2 %v2666_v18  ;;  %2740 = vmatpush.msra.mxu3 %v2666_v18  ;;  %v2652_v18 = vld [vmem:[%s5161_s7 + $0x8] sm:$0xff] }
 0x490   : > { %v2104_v59 = vmax.f32 %v2096_v16, 0.0 }
 0x491   : > { %2672 = vmatpush.msra.mxu2 %v2665_v45  ;;  %2741 = vmatpush.msra.mxu3 %v2665_v45 }
 0x492   : > { %2423 = vmatmul.f32.gmra.mxu1 %v2104_v59  ;;  %v2655_v59 = vld [vmem:[%s5161_s7 + $0x20] sm:$0xff] }
 0x493   : > { %2673 = vmatpush.msra.mxu2 %v2664_v11  ;;  %2742 = vmatpush.msra.mxu3 %v2664_v11 }
 0x495   : > { %2674 = vmatpush.msra.mxu2 %v2663_v17  ;;  %2743 = vmatpush.msra.mxu3 %v2663_v17 }
 0x497   : > { %2675 = vmatpush.msra.mxu2 %v2662_v5  ;;  %2744 = vmatpush.msra.mxu3 %v2662_v5 }
 0x499   : > { %2676 = vmatpush.msra.mxu2 %v2661_v37  ;;  %2745 = vmatpush.msra.mxu3 %v2661_v37  ;;  %v2651_v37 = vld [vmem:[%s5161_s7] sm:$0xff] }
 0x49b   : > { %2677 = vmatpush.msra.mxu2 %v2660_v41  ;;  %2746 = vmatpush.msra.mxu3 %v2660_v41 }
 0x49d   : > { %2678 = vmatpush.msra.mxu2 %v2659_v32  ;;  %2747 = vmatpush.msra.mxu3 %v2659_v32 }
 0x49f   : > { %2679 = vmatpush.msra.mxu2 %v2658_v21  ;;  %2748 = vmatpush.msra.mxu3 %v2658_v21 }
 0x4a1   : > { %2680 = vmatpush.msra.mxu2 %v2657_v50  ;;  %2749 = vmatpush.msra.mxu3 %v2657_v50 }
 0x4a3   : > { %2681 = vmatpush.msra.mxu2 %v2656_v38  ;;  %2750 = vmatpush.msra.mxu3 %v2656_v38 }
 0x4a5   : > { %2682 = vmatpush.msra.mxu2 %v2655_v59  ;;  %2751 = vmatpush.msra.mxu3 %v2655_v59 }
 0x4c1   : > { %v2157_v0 = vpop.f32.mrf.mxu0 }
 0x4c2   : > { %v4682_v51 = vadd.f32 %v4610_v57, %v2157_v0  ;;  %v2654_v0 = vld [vmem:[%s5161_s7 + $0x18] sm:$0xff] }
 0x4c3   : > { %2683 = vmatpush.msra.mxu2 %v2654_v0  ;;  %2752 = vmatpush.msra.mxu3 %v2654_v0 }
 0x4c4   : > { %2178 = vadd.xlane.f32.xlu0 %v4682_v51  ;;  %v2191_v8 = vmul.f32 %v4682_v51, %v4682_v51 }
 0x4c6   : > { %2202 = vadd.xlane.f32.xlu2 %v2191_v8 }
 0x4c8   : > { %v2403_v25 = vpop.f32.mrf.mxu1 }
 0x4c9   : > { %v4688_v58 = vadd.f32 %v4610_v57, %v2403_v25  ;;  %v2653_v25 = vld [vmem:[%s5161_s7 + $0x10] sm:$0xff] }
 0x4ca   : > { %2684 = vmatpush.msra.mxu2 %v2653_v25  ;;  %2753 = vmatpush.msra.mxu3 %v2653_v25 }
 0x4cb   : > { %2427 = vadd.xlane.f32.xlu1 %v4688_v58  ;;  %v2443_v23 = vmul.f32 %v4688_v58, %v4688_v58 }
 0x4cc   : > { %2685 = vmatpush.msra.mxu2 %v2652_v18  ;;  %2754 = vmatpush.msra.mxu3 %v2652_v18 }
 0x4cd   : > { %2451 = vadd.xlane.f32.xlu0 %v2443_v23 }
 0x4ce   : > { %2686 = vmatpush.msra.mxu2 %v2651_v37  ;;  %2755 = vmatpush.msra.mxu3 %v2651_v37 }
 0x4df   : > { %v2406_v55 = vpop.f32.mrf.mxu1 }
 0x4e0   : > { %v4700_v6 = vadd.f32 %v4610_v57, %v2406_v55 }
 0x4e2   : > { %v2160_v3 = vpop.f32.mrf.mxu0  ;;  %2429 = vadd.xlane.f32.xlu2 %v4700_v6  ;;  %v2444_v27 = vmul.f32 %v4700_v6, %v4700_v6 }
 0x4e3   : > { %v4703_v7 = vadd.f32 %v4610_v57, %v2160_v3 }
 0x4e5   : > { %2180 = vadd.xlane.f32.xlu1 %v4703_v7  ;;  %v2192_v33 = vmul.f32 %v4703_v7, %v4703_v7 }
 0x4e7   : > { %v2409_v36 = vpop.f32.mrf.mxu1 }
 0x4e8   : > { %v4722_v15 = vadd.f32 %v4610_v57, %v2409_v36 }
 0x4ea   : > { %2431 = vadd.xlane.f32.xlu0 %v4722_v15  ;;  %v2445_v61 = vmul.f32 %v4722_v15, %v4722_v15 }
 0x4ec   : > { %2455 = vadd.xlane.f32.xlu2 %v2445_v61 }
 0x4ed   : > { %2453 = vadd.xlane.f32.xlu1 %v2444_v27 }
 0x4ee   : > { %v2173_v35 = vpop.xlane.xlu0 %2172 }
 0x4ef   : > { %v4719_v40 = vmul.f32 0.03125, %v2173_v35  ;;  %v2163_v53 = vpop.f32.mrf.mxu0  ;;  %v2412_v54 = vpop.f32.mrf.mxu1 }
 0x4f0   : > { %v2197_v39 = vpop.xlane.xlu2 %2196  ;;  %v4748_v42 = vadd.f32 %v4610_v57, %v2412_v54  ;;  %v4759_v31 = vadd.f32 %v4610_v57, %v2163_v53 }
 0x4f1   : > { %v2220_v46 = vmul.f32 0.03125, %v2197_v39  ;;  %v2228_v26 = vmul.f32 %v4719_v40, %v4719_v40 }
 0x4f2   : > { %2204 = vadd.xlane.f32.xlu0 %v2192_v33  ;;  %v2446_v17 = vmul.f32 %v4748_v42, %v4748_v42  ;;  %v2193_v5 = vmul.f32 %v4759_v31, %v4759_v31  ;;  %v2252_v33 = vsub.f32 %v4628_v48, %v4719_v40  ;;  %v4810_v48 = vld [vmem:[%s5160_s6 + $0x3] ss:$0 sm:$0xff] }
 0x4f3   : > { %v2236_v24 = vsub.f32 %v2220_v46, %v2228_v26 }
 0x4f4   : > { %2182 = vadd.xlane.f32.xlu2 %v4759_v31 }
 0x4f5   : > { %v2244_v13 = vmax.f32 %v2236_v24, 0.0  ;;  %2433 = vadd.xlane.f32.xlu1 %v4748_v42 }
 0x4f6   : > { %v2175_v52 = vpop.xlane.xlu1 %2174 }
 0x4f7   : > { %v4743_v14 = vadd.f32 1e-05, %v2244_v13  ;;  %v4745_v43 = vmul.f32 0.03125, %v2175_v52  ;;  %v2415_v55 = vpop.f32.mrf.mxu1 }
 0x4f8   : > { %v2199_v56 = vpop.xlane.xlu0 %2198  ;;  %v4786_v46 = vadd.f32 %v4610_v57, %v2415_v55 }
 0x4f9   : > { %3084 = vrsqrt.f32 %v4743_v14  ;;  %v2229_v1 = vmul.f32 %v4745_v43, %v4745_v43  ;;  %v2221_v16 = vmul.f32 0.03125, %v2199_v56  ;;  %vm2274_vm2 = vweird.f32 %v4743_v14 }
 0x4fa   : > { %2457 = vadd.xlane.f32.xlu0 %v2446_v17  ;;  %v2447_v54 = vmul.f32 %v4786_v46, %v4786_v46  ;;  %v2253_v37 = vsub.f32 %v4654_v63, %v4745_v43 }
 0x4fb   : > { %v2237_v8 = vsub.f32 %v2221_v16, %v2229_v1  ;;  %v4802_v1 = vld [vmem:[%s5159_s5 + $0x3] ss:$0 sm:$0xff] }
 0x4fc   : > { %2435 = vadd.xlane.f32.xlu2 %v4786_v46  ;;  %v2166_v0 = vpop.f32.mrf.mxu0 }
 0x4fd   : > { %v2245_v23 = vmax.f32 %v2237_v8, 0.0  ;;  %2206 = vadd.xlane.f32.xlu1 %v2193_v5 }
 0x4fe   : > { %v2177_v3 = vpop.xlane.xlu2 %2176 }
 0x4ff   : > { %v3085_v45 = vpop.eup %3084  ;;  %v2261_v35 = vadd.f32 1e-05, %v2245_v23  ;;  %v4783_v36 = vmul.f32 0.03125, %v2177_v3  ;;  %v2418_v21 = vpop.f32.mrf.mxu1  ;;  %v4814_v23 = vadd.f32 %v4610_v57, %v2166_v0 }
 0x500   : > { %v2269_v11 = vmul.f32 %v3085_v45, %v4743_v14  ;;  %v2201_v39 = vpop.xlane.xlu1 %2200  ;;  %vm2275_vm1 = vweird.f32 %v3085_v45  ;;  %v4793_v53 = vadd.f32 %v4610_v57, %v2418_v21 }
 0x501   : > { %3086 = vrsqrt.f32 %v2261_v35  ;;  %v2230_v41 = vmul.f32 %v4783_v36, %v4783_v36  ;;  %v2222_v26 = vmul.f32 0.03125, %v2201_v39  ;;  %vm2276_vm3 = vmor %vm2274_vm2, %vm2275_vm1  ;;  %vm2284_vm5 = vweird.f32 %v2261_v35 }
 0x502   : > { %v2270_v27 = vmul.f32 %v3085_v45, %v2269_v11  ;;  %2437 = vadd.xlane.f32.xlu0 %v4793_v53  ;;  %v2448_v14 = vmul.f32 %v4793_v53, %v4793_v53 }
 0x503   : > { %v2238_v32 = vsub.f32 %v2222_v26, %v2230_v41 }
 0x504   : > { %v2271_v61 = vmul.f32 0.5, %v2270_v27  ;;  %2461 = vadd.xlane.f32.xlu2 %v2448_v14  ;;  %v2194_v27 = vmul.f32 %v4814_v23, %v4814_v23 }
 0x505   : > { %v2246_v13 = vmax.f32 %v2238_v32, 0.0  ;;  %2459 = vadd.xlane.f32.xlu1 %v2447_v54 }
 0x506   : > { %v2272_v24 = vsub.f32 1.5, %v2271_v61 }
 0x507   : > { %v3087_v52 = vpop.eup %3086  ;;  %v2262_v38 = vadd.f32 1e-05, %v2246_v13 }
 0x508   : > { %v2273_v50 = vmul.f32 %v3085_v45, %v2272_v24  ;;  %v2279_v56 = vmul.f32 %v3087_v52, %v2261_v35  ;;  %vm2285_vm4 = vweird.f32 %v3087_v52 }
 0x509   : > { %3088 = vrsqrt.f32 %v2262_v38  ;;  %vm2286_vm6 = vmor %vm2284_vm5, %vm2285_vm4  ;;  %vm2294_vm8 = vweird.f32 %v2262_v38 }
 0x50a   : > { %v2277_v16 = vsel %vm2276_vm3, %v3085_v45, %v2273_v50  ;;  %v2280_v8 = vmul.f32 %v3087_v52, %v2279_v56  ;;  %v2421_v45 = vpop.f32.mrf.mxu1  ;;  %2184 = vadd.xlane.f32.xlu0 %v4814_v23  ;;  %v2169_v32 = vpop.f32.mrf.mxu0  ;;  %v2254_v56 = vsub.f32 %v4669_v4, %v4783_v36 }
 0x50b   : > { %v2348_v59 = vmul.f32 %v2277_v16, %v2252_v33  ;;  %v4818_v3 = vadd.f32 %v4610_v57, %v2421_v45  ;;  %v4829_v43 = vadd.f32 %v4610_v57, %v2169_v32 }
 0x50c   : > { %v2281_v40 = vmul.f32 0.5, %v2280_v8  ;;  %2208 = vadd.xlane.f32.xlu2 %v2194_v27 }
 0x50d   : > { %v2359_v25 = vmul.f32 %v4802_v1, %v2348_v59  ;;  %2439 = vadd.xlane.f32.xlu1 %v4818_v3  ;;  %v2449_v50 = vmul.f32 %v4818_v3, %v4818_v3 }
 0x50e   : > { %v2282_v18 = vsub.f32 1.5, %v2281_v40 }
 0x50f   : > { %v2370_v55 = vadd.f32 %v4810_v48, %v2359_v25  ;;  %v3089_v11 = vpop.eup %3088 }
 0x510   : > { %v2283_v17 = vmul.f32 %v3087_v52, %v2282_v18  ;;  %v2289_v39 = vmul.f32 %v3089_v11, %v2262_v38  ;;  %vm2295_vm7 = vweird.f32 %v3089_v11 }
 0x511   : > { %v2378_v5 = vmax.f32 %v2370_v55, 0.0  ;;  %vm2296_vm9 = vmor %vm2294_vm8, %vm2295_vm7 }
 0x512   : > { %v2287_v26 = vsel %vm2286_vm6, %v3087_v52, %v2283_v17  ;;  %v2290_v61 = vmul.f32 %v3089_v11, %v2289_v39  ;;  %v2424_v21 = vpop.f32.mrf.mxu1  ;;  %2463 = vadd.xlane.f32.xlu0 %v2449_v50 }
 0x513   : > { %v2635_v41 = vadd.f32 %v2378_v5, %v3983_v44  ;;  %v2349_v35 = vmul.f32 %v2287_v26, %v2253_v37  ;;  %v4835_v54 = vadd.f32 %v4610_v57, %v2424_v21  ;;  %v2195_v57 = vmul.f32 %v4829_v43, %v4829_v43 }
 0x514   : > { %v2291_v24 = vmul.f32 0.5, %v2290_v61 }
 0x515   : > { %2687 = vmatmul.f32.vlgmr.msra.gmra.mxu2 %v2635_v41  ;;  %v2360_v63 = vmul.f32 %v4802_v1, %v2349_v35  ;;  %2186 = vadd.xlane.f32.xlu1 %v4829_v43  ;;  %v2450_v0 = vmul.f32 %v4835_v54, %v4835_v54 }
 0x516   : > { %v2292_v13 = vsub.f32 1.5, %v2291_v24  ;;  %2441 = vadd.xlane.f32.xlu2 %v4835_v54 }
 0x517   : > { %v2371_v44 = vadd.f32 %v4810_v48, %v2360_v63 }
 0x518   : > { %v2293_v52 = vmul.f32 %v3089_v11, %v2292_v13 }
 0x519   : > { %v2379_v33 = vmax.f32 %v2371_v44, 0.0 }
 0x51a   : > { %v2297_v14 = vsel %vm2296_vm9, %v3089_v11, %v2293_v52  ;;  %2210 = vadd.xlane.f32.xlu0 %v2195_v57 }
 0x51b   : > { %v2636_v16 = vadd.f32 %v2379_v33, %v3991_v22  ;;  %v2350_v59 = vmul.f32 %v2297_v14, %v2254_v56 }
 0x51d   : > { %2690 = vmatmul.f32.gmra.mxu2 %v2636_v16  ;;  %v2361_v38 = vmul.f32 %v4802_v1, %v2350_v59  ;;  %2465 = vadd.xlane.f32.xlu1 %v2450_v0 }
 0x51f   : > { %v2372_v8 = vadd.f32 %v4810_v48, %v2361_v38 }
 0x521   : > { %v2380_v4 = vmax.f32 %v2372_v8, 0.0 }
 0x523   : > { %v2637_v36 = vadd.f32 %v2380_v4, %v3998_v20 }
 0x525   : > { %2693 = vmatmul.f32.gmra.mxu2 %v2637_v36 }
 0x537   : > { %v2179_v22 = vpop.xlane.xlu0 %2178 }
 0x538   : > { %v2215_v40 = vmul.f32 0.03125, %v2179_v22 }
 0x539   : > { %v2203_v25 = vpop.xlane.xlu2 %2202 }
 0x53a   : > { %v2231_v18 = vmul.f32 %v2215_v40, %v2215_v40  ;;  %v2223_v45 = vmul.f32 0.03125, %v2203_v25  ;;  %v2255_v44 = vsub.f32 %v4682_v51, %v2215_v40 }
 0x53c   : > { %v2239_v55 = vsub.f32 %v2223_v45, %v2231_v18 }
 0x53e   : > { %v2247_v11 = vmax.f32 %v2239_v55, 0.0  ;;  %v2428_v5 = vpop.xlane.xlu1 %2427 }
 0x53f   : > { %v2467_v37 = vmul.f32 0.03125, %v2428_v5 }
 0x540   : > { %v2263_v17 = vadd.f32 1e-05, %v2247_v11  ;;  %v2452_v39 = vpop.xlane.xlu0 %2451 }
 0x541   : > { %v2483_v27 = vmul.f32 %v2467_v37, %v2467_v37  ;;  %v2475_v41 = vmul.f32 0.03125, %v2452_v39  ;;  %v2507_v36 = vsub.f32 %v4688_v58, %v2467_v37 }
 0x542   : > { %3090 = vrsqrt.f32 %v2263_v17  ;;  %vm2304_vm11 = vweird.f32 %v2263_v17 }
 0x543   : > { %v2491_v26 = vsub.f32 %v2475_v41, %v2483_v27 }
 0x545   : > { %v2499_v61 = vmax.f32 %v2491_v26, 0.0 }
 0x547   : > { %v2515_v20 = vadd.f32 1e-05, %v2499_v61 }
 0x548   : > { %v3091_v32 = vpop.eup %3090 }
 0x549   : > { %v2299_v35 = vmul.f32 %v3091_v32, %v2263_v17  ;;  %3092 = vrsqrt.f32 %v2515_v20  ;;  %vm2305_vm10 = vweird.f32 %v3091_v32  ;;  %vm2529_vm14 = vweird.f32 %v2515_v20 }
 0x54a   : > { %vm2306_vm12 = vmor %vm2304_vm11, %vm2305_vm10 }
 0x54b   : > { %v2300_v24 = vmul.f32 %v3091_v32, %v2299_v35 }
 0x54d   : > { %v2301_v63 = vmul.f32 0.5, %v2300_v24 }
 0x54f   : > { %v2302_v21 = vsub.f32 1.5, %v2301_v63  ;;  %v3093_v13 = vpop.eup %3092 }
 0x550   : > { %v2524_v52 = vmul.f32 %v3093_v13, %v2515_v20  ;;  %vm2530_vm13 = vweird.f32 %v3093_v13 }
 0x551   : > { %v2303_v50 = vmul.f32 %v3091_v32, %v2302_v21  ;;  %vm2531_vm15 = vmor %vm2529_vm14, %vm2530_vm13 }
 0x552   : > { %v2525_v56 = vmul.f32 %v3093_v13, %v2524_v52 }
 0x553   : > { %v2307_v33 = vsel %vm2306_vm12, %v3091_v32, %v2303_v50 }
 0x554   : > { %v2351_v16 = vmul.f32 %v2307_v33, %v2255_v44  ;;  %v2526_v14 = vmul.f32 0.5, %v2525_v56 }
 0x555   : > { %v2430_v51 = vpop.xlane.xlu2 %2429 }
 0x556   : > { %v2362_v59 = vmul.f32 %v4802_v1, %v2351_v16  ;;  %v2527_v38 = vsub.f32 1.5, %v2526_v14  ;;  %v4854_v18 = vmul.f32 0.03125, %v2430_v51 }
 0x558   : > { %v2373_v57 = vadd.f32 %v4810_v48, %v2362_v59  ;;  %v2181_v0 = vpop.xlane.xlu1 %2180  ;;  %v2528_v8 = vmul.f32 %v3093_v13, %v2527_v38  ;;  %v2484_v5 = vmul.f32 %v4854_v18, %v4854_v18 }
 0x559   : > { %v4865_v32 = vmul.f32 0.03125, %v2181_v0 }
 0x55a   : > { %v2381_v4 = vmax.f32 %v2373_v57, 0.0  ;;  %v2532_v22 = vsel %vm2531_vm15, %v3093_v13, %v2528_v8 }
 0x55b   : > { %v2603_v40 = vmul.f32 %v2532_v22, %v2507_v36  ;;  %v2232_v50 = vmul.f32 %v4865_v32, %v4865_v32 }
 0x55c   : > { %v2638_v25 = vadd.f32 %v2381_v4, %v4064_v19 }
 0x55d   : > { %v2611_v45 = vmul.f32 %v4802_v1, %v2603_v40  ;;  %v2432_v55 = vpop.xlane.xlu0 %2431 }
 0x55e   : > { %2696 = vmatmul.f32.gmra.mxu2 %v2638_v25  ;;  %v4860_v39 = vmul.f32 0.03125, %v2432_v55 }
 0x55f   : > { %v2619_v17 = vadd.f32 %v4810_v48, %v2611_v45  ;;  %v2456_v37 = vpop.xlane.xlu2 %2455 }
 0x560   : > { %v2454_v11 = vpop.xlane.xlu1 %2453  ;;  %v2485_v19 = vmul.f32 %v4860_v39, %v4860_v39  ;;  %v2477_v26 = vmul.f32 0.03125, %v2456_v37 }
 0x561   : > { %v2476_v58 = vmul.f32 0.03125, %v2454_v11  ;;  %v2627_v27 = vmax.f32 %v2619_v17, 0.0 }
 0x562   : > { %v2493_v20 = vsub.f32 %v2477_v26, %v2485_v19 }
 0x563   : > { %v2492_v41 = vsub.f32 %v2476_v58, %v2484_v5  ;;  %v2643_v61 = vadd.f32 %v2627_v27, %v4098_v34 }
 0x564   : > { %v2501_v63 = vmax.f32 %v2493_v20, 0.0 }
 0x565   : > { %v2500_v35 = vmax.f32 %v2492_v41, 0.0  ;;  %2756 = vmatmul.f32.vlgmr.msra.gmra.mxu3 %v2643_v61  ;;  %v2205_v21 = vpop.xlane.xlu0 %2204 }
 0x566   : > { %v2517_v44 = vadd.f32 1e-05, %v2501_v63  ;;  %v2224_v52 = vmul.f32 0.03125, %v2205_v21 }
 0x567   : > { %v2516_v24 = vadd.f32 1e-05, %v2500_v35  ;;  %v2183_v33 = vpop.xlane.xlu2 %2182  ;;  %v2508_v35 = vsub.f32 %v4700_v6, %v4854_v18 }
 0x568   : > { %v2434_v13 = vpop.xlane.xlu1 %2433  ;;  %v2240_v56 = vsub.f32 %v2224_v52, %v2232_v50  ;;  %v4871_v14 = vmul.f32 0.03125, %v2183_v33  ;;  %vm2549_vm4 = vweird.f32 %v2517_v44 }
 0x569   : > { %3094 = vrsqrt.f32 %v2516_v24  ;;  %v4869_v16 = vmul.f32 0.03125, %v2434_v13  ;;  %vm2539_vm1 = vweird.f32 %v2516_v24 }
 0x56a   : > { %3096 = vrsqrt.f32 %v2517_v44  ;;  %v2248_v34 = vmax.f32 %v2240_v56, 0.0  ;;  %v2233_v51 = vmul.f32 %v4871_v14, %v4871_v14 }
 0x56b   : > { %v2486_v0 = vmul.f32 %v4869_v16, %v4869_v16 }
 0x56c   : > { %v4873_v38 = vadd.f32 1e-05, %v2248_v34 }
 0x56d   : > { %v2458_v8 = vpop.xlane.xlu0 %2457 }
 0x56e   : > { %3098 = vrsqrt.f32 %v4873_v38  ;;  %v2478_v22 = vmul.f32 0.03125, %v2458_v8  ;;  %vm2314_vm7 = vweird.f32 %v4873_v38 }
 0x56f   : > { %v3095_v59 = vpop.eup %3094  ;;  %v2436_v55 = vpop.xlane.xlu2 %2435 }
 0x570   : > { %v2534_v57 = vmul.f32 %v3095_v59, %v2516_v24  ;;  %v2207_v4 = vpop.xlane.xlu1 %2206  ;;  %v3097_v36 = vpop.eup %3096  ;;  %v2494_v11 = vsub.f32 %v2478_v22, %v2486_v0  ;;  %v4880_v19 = vmul.f32 0.03125, %v2436_v55  ;;  %vm2540_vm0 = vweird.f32 %v3095_v59 }
 0x571   : > { %v2225_v40 = vmul.f32 0.03125, %v2207_v4  ;;  %v2544_v45 = vmul.f32 %v3097_v36, %v2517_v44  ;;  %vm2550_vm2 = vweird.f32 %v3097_v36  ;;  %vm2541_vm3 = vmor %vm2539_vm1, %vm2540_vm0 }
 0x572   : > { %v2535_v25 = vmul.f32 %v3095_v59, %v2534_v57  ;;  %v2502_v37 = vmax.f32 %v2494_v11, 0.0  ;;  %v2487_v56 = vmul.f32 %v4880_v19, %v4880_v19  ;;  %vm4901_vm5 = vmor %vm2549_vm4, %vm2550_vm2  ;;  %v2509_v11 = vsub.f32 %v4722_v15, %v4860_v39 }
 0x573   : > { %v2241_v17 = vsub.f32 %v2225_v40, %v2233_v51  ;;  %v2545_v58 = vmul.f32 %v3097_v36, %v2544_v45  ;;  %v2511_v51 = vsub.f32 %v4786_v46, %v4880_v19 }
 0x574   : > { %v2536_v5 = vmul.f32 0.5, %v2535_v25  ;;  %v4882_v61 = vpop.eup %3098  ;;  %v4886_v20 = vadd.f32 1e-05, %v2502_v37 }
 0x575   : > { %v2249_v27 = vmax.f32 %v2241_v17, 0.0  ;;  %v2546_v26 = vmul.f32 0.5, %v2545_v58  ;;  %v2309_v50 = vmul.f32 %v4882_v61, %v4873_v38  ;;  %v2438_v52 = vpop.xlane.xlu0 %2437  ;;  %vm2315_vm6 = vweird.f32 %v4882_v61 }
 0x576   : > { %v2537_v41 = vsub.f32 1.5, %v2536_v5  ;;  %3100 = vrsqrt.f32 %v4886_v20  ;;  %v4895_v6 = vmul.f32 0.03125, %v2438_v52  ;;  %vm2316_vm8 = vmor %vm2314_vm7, %vm2315_vm6  ;;  %vm2559_vm9 = vweird.f32 %v4886_v20 }
 0x577   : > { %v4888_v63 = vadd.f32 1e-05, %v2249_v27  ;;  %v2547_v13 = vsub.f32 1.5, %v2546_v26  ;;  %v2310_v34 = vmul.f32 %v4882_v61, %v2309_v50  ;;  %v2462_v57 = vpop.xlane.xlu2 %2461  ;;  %v2256_v50 = vsub.f32 %v4703_v7, %v4865_v32 }
 0x578   : > { %v2538_v21 = vmul.f32 %v3095_v59, %v2537_v41  ;;  %v2460_v33 = vpop.xlane.xlu1 %2459  ;;  %v2488_v0 = vmul.f32 %v4895_v6, %v4895_v6  ;;  %v2480_v8 = vmul.f32 0.03125, %v2462_v57  ;;  %v2510_v7 = vsub.f32 %v4748_v42, %v4869_v16 }
 0x579   : > { %v2548_v18 = vmul.f32 %v3097_v36, %v2547_v13  ;;  %3102 = vrsqrt.f32 %v4888_v63  ;;  %v2479_v24 = vmul.f32 0.03125, %v2460_v33  ;;  %v2311_v22 = vmul.f32 0.5, %v2310_v34 }
 0x57a   : > { %v2542_v4 = vsel %vm2541_vm3, %v3095_v59, %v2538_v21  ;;  %v2496_v45 = vsub.f32 %v2480_v8, %v2488_v0  ;;  %vm2324_vm10 = vweird.f32 %v4888_v63  ;;  %v2512_v19 = vsub.f32 %v4793_v53, %v4895_v6 }
 0x57b   : > { %v2495_v40 = vsub.f32 %v2479_v24, %v2487_v56  ;;  %v2604_v25 = vmul.f32 %v2542_v4, %v2508_v35  ;;  %v2552_v55 = vsel %vm4901_vm5, %v3097_v36, %v2548_v18  ;;  %v2312_v44 = vsub.f32 1.5, %v2311_v22 }
 0x57c   : > { %v4909_v5 = vpop.eup %3100  ;;  %v2504_v59 = vmax.f32 %v2496_v45, 0.0  ;;  %v2605_v35 = vmul.f32 %v2552_v55, %v2509_v11  ;;  %v2257_v4 = vsub.f32 %v4759_v31, %v4871_v14 }
 0x57d   : > { %v2503_v17 = vmax.f32 %v2495_v40, 0.0  ;;  %v2554_v37 = vmul.f32 %v4909_v5, %v4886_v20  ;;  %v2185_v41 = vpop.xlane.xlu0 %2184  ;;  %v2612_v36 = vmul.f32 %v4802_v1, %v2604_v25  ;;  %v2313_v15 = vmul.f32 %v4882_v61, %v2312_v44 }
 0x57e   : > { %v4922_v21 = vadd.f32 1e-05, %v2504_v59  ;;  %v4924_v13 = vmul.f32 0.03125, %v2185_v41  ;;  %v2613_v24 = vmul.f32 %v4802_v1, %v2605_v35  ;;  %vm2560_vm11 = vweird.f32 %v4909_v5 }
 0x57f   : > { %v4912_v58 = vpop.eup %3102  ;;  %v4916_v27 = vadd.f32 1e-05, %v2503_v17  ;;  %v2555_v52 = vmul.f32 %v4909_v5, %v2554_v37  ;;  %v2209_v33 = vpop.xlane.xlu2 %2208  ;;  %v2620_v0 = vadd.f32 %v4810_v48, %v2612_v36  ;;  %v2317_v8 = vsel %vm2316_vm8, %v4882_v61, %v2313_v15  ;;  %vm4990_vm0 = vmor %vm2559_vm9, %vm2560_vm11 }
 0x580   : > { %v2440_v26 = vpop.xlane.xlu1 %2439  ;;  %v2319_v39 = vmul.f32 %v4912_v58, %v4888_v63  ;;  %v2234_v18 = vmul.f32 %v4924_v13, %v4924_v13  ;;  %v2226_v38 = vmul.f32 0.03125, %v2209_v33  ;;  %v2352_v22 = vmul.f32 %v2317_v8, %v2256_v50 }
 0x581   : > { %3104 = vrsqrt.f32 %v4916_v27  ;;  %v2556_v32 = vmul.f32 0.5, %v2555_v52  ;;  %v4939_v34 = vmul.f32 0.03125, %v2440_v26  ;;  %v2628_v45 = vmax.f32 %v2620_v0, 0.0 }
 0x582   : > { %v2320_v56 = vmul.f32 %v4912_v58, %v2319_v39  ;;  %3106 = vrsqrt.f32 %v4922_v21  ;;  %v2242_v25 = vsub.f32 %v2226_v38, %v2234_v18  ;;  %vm2325_vm12 = vweird.f32 %v4912_v58 }
 0x583   : > { %v2557_v11 = vsub.f32 1.5, %v2556_v32  ;;  %v2363_v14 = vmul.f32 %v4802_v1, %v2352_v22  ;;  %v2489_v59 = vmul.f32 %v4939_v34, %v4939_v34  ;;  %v2621_v41 = vadd.f32 %v4810_v48, %v2613_v24  ;;  %vm2326_vm14 = vmor %vm2324_vm10, %vm2325_vm12 }
 0x584   : > { %v2321_v57 = vmul.f32 0.5, %v2320_v56  ;;  %v2250_v37 = vmax.f32 %v2242_v25, 0.0  ;;  %v2644_v35 = vadd.f32 %v2628_v45, %v4158_v30  ;;  %vm2569_vm13 = vweird.f32 %v4916_v27 }
 0x585   : > { %v2464_v61 = vpop.xlane.xlu0 %2463  ;;  %v2558_v18 = vmul.f32 %v4909_v5, %v2557_v11  ;;  %v2629_v38 = vmax.f32 %v2621_v41, 0.0  ;;  %vm2579_vm3 = vweird.f32 %v4922_v21 }
 0x586   : > { %v2322_v40 = vsub.f32 1.5, %v2321_v57  ;;  %v2481_v15 = vmul.f32 0.03125, %v2464_v61  ;;  %v4967_v52 = vadd.f32 1e-05, %v2250_v37  ;;  %2759 = vmatmul.f32.gmra.mxu3 %v2644_v35  ;;  %v2374_v57 = vadd.f32 %v4810_v48, %v2363_v14 }
 0x587   : > { %v4950_v55 = vpop.eup %3104  ;;  %v2562_v20 = vsel %vm4990_vm0, %v4909_v5, %v2558_v18 }
 0x588   : > { %v2187_v31 = vpop.xlane.xlu1 %2186  ;;  %v4955_v44 = vpop.eup %3106  ;;  %v2564_v17 = vmul.f32 %v4950_v55, %v4916_v27  ;;  %v2323_v26 = vmul.f32 %v4912_v58, %v2322_v40  ;;  %v2497_v24 = vsub.f32 %v2481_v15, %v2489_v59  ;;  %3108 = vrsqrt.f32 %v4967_v52 }
 0x589   : > { %v2574_v36 = vmul.f32 %v4955_v44, %v4922_v21  ;;  %v2442_v39 = vpop.xlane.xlu2 %2441  ;;  %v4969_v33 = vmul.f32 0.03125, %v2187_v31  ;;  %vm2570_vm15 = vweird.f32 %v4950_v55  ;;  %v2382_v45 = vmax.f32 %v2374_v57, 0.0 }
 0x58a   : > { %v2565_v50 = vmul.f32 %v4950_v55, %v2564_v17  ;;  %v4971_v56 = vmul.f32 0.03125, %v2442_v39  ;;  %v2505_v8 = vmax.f32 %v2497_v24, 0.0  ;;  %v2327_v11 = vsel %vm2326_vm14, %v4912_v58, %v2323_v26  ;;  %v5009_v58 = vld [vmem:[%s5162_s8] ss:$0 sm:$0xff]  ;;  %vm5015_vm1 = vmor %vm2569_vm13, %vm2570_vm15 }
 0x58b   : > { %v2575_v32 = vmul.f32 %v4955_v44, %v2574_v36  ;;  %v2235_v22 = vmul.f32 %v4969_v33, %v4969_v33  ;;  %v2353_v59 = vmul.f32 %v2327_v11, %v2257_v4  ;;  %v2639_v41 = vadd.f32 %v2382_v45, %v4200_v10 }
 0x58c   : > { %v2566_v30 = vmul.f32 0.5, %v2565_v50  ;;  %v2490_v63 = vmul.f32 %v4971_v56, %v4971_v56  ;;  %v4997_v31 = vadd.f32 1e-05, %v2505_v8  ;;  %vm2580_vm2 = vweird.f32 %v4955_v44 }
 0x58d   : > { %v2576_v0 = vmul.f32 0.5, %v2575_v32  ;;  %v2211_v14 = vpop.xlane.xlu0 %2210  ;;  %v2645_v10 = vadd.f32 %v2629_v38, %v4209_v28  ;;  %v2364_v5 = vmul.f32 %v4802_v1, %v2353_v59  ;;  %2699 = vmatmul.f32.gmra.mxu2 %v2639_v41  ;;  %v2606_v27 = vmul.f32 %v2562_v20, %v2510_v7  ;;  %vm5051_vm4 = vmor %vm2579_vm3, %vm2580_vm2 }
 0x58e   : > { %v2567_v25 = vsub.f32 1.5, %v2566_v30  ;;  %v2227_v36 = vmul.f32 0.03125, %v2211_v14  ;;  %3110 = vrsqrt.f32 %v4997_v31  ;;  %v3109_v26 = vpop.eup %3108  ;;  %vm2334_vm6 = vweird.f32 %v4967_v52 }
 0x58f   : > { %v2577_v61 = vsub.f32 1.5, %v2576_v0  ;;  %v2329_v24 = vmul.f32 %v3109_v26, %v4967_v52  ;;  %2762 = vmatmul.f32.gmra.mxu3 %v2645_v10  ;;  %v2375_v28 = vadd.f32 %v4810_v48, %v2364_v5  ;;  %v2614_v42 = vmul.f32 %v4802_v1, %v2606_v27 }
 0x590   : > { %v2466_v17 = vpop.xlane.xlu1 %2465  ;;  %v2568_v37 = vmul.f32 %v4950_v55, %v2567_v25  ;;  %v2243_v15 = vsub.f32 %v2227_v36, %v2235_v22  ;;  %vm2335_vm5 = vweird.f32 %v3109_v26  ;;  %v2258_v20 = vsub.f32 %v4814_v23, %v4924_v13 }
 0x591   : > { %v2482_v35 = vmul.f32 0.03125, %v2466_v17  ;;  %v2578_v32 = vmul.f32 %v4955_v44, %v2577_v61  ;;  %v2330_v7 = vmul.f32 %v3109_v26, %v2329_v24  ;;  %v2622_v40 = vadd.f32 %v4810_v48, %v2614_v42  ;;  %vm2336_vm7 = vmor %vm2334_vm6, %vm2335_vm5 }
 0x592   : > { %v2572_v50 = vsel %vm5015_vm1, %v4950_v55, %v2568_v37  ;;  %v2251_v30 = vmax.f32 %v2243_v15, 0.0  ;;  %v2383_v55 = vmax.f32 %v2375_v28, 0.0  ;;  %vm2589_vm9 = vweird.f32 %v4997_v31 }
 0x593   : > { %v2498_v39 = vsub.f32 %v2482_v35, %v2490_v63  ;;  %v2607_v57 = vmul.f32 %v2572_v50, %v2511_v51  ;;  %v2331_v21 = vmul.f32 0.5, %v2330_v7  ;;  %v2582_v45 = vsel %vm5051_vm4, %v4955_v44, %v2578_v32 }
 0x594   : > { %v5039_v8 = vadd.f32 1e-05, %v2251_v30  ;;  %v3111_v46 = vpop.eup %3110  ;;  %v2640_v25 = vadd.f32 %v2383_v55, %v4247_v9  ;;  %v2630_v53 = vmax.f32 %v2622_v40, 0.0  ;;  %v2608_v17 = vmul.f32 %v2582_v45, %v2512_v19 }
 0x595   : > { %v2506_v38 = vmax.f32 %v2498_v39, 0.0  ;;  %v2615_v0 = vmul.f32 %v4802_v1, %v2607_v57  ;;  %v2584_v63 = vmul.f32 %v3111_v46, %v4997_v31  ;;  %v2332_v11 = vsub.f32 1.5, %v2331_v21 }
 0x596   : > { %3112 = vrsqrt.f32 %v5039_v8  ;;  %2702 = vmatmul.f32.gmra.mxu2 %v2640_v25  ;;  %v2646_v9 = vadd.f32 %v2630_v53, %v4255_v60  ;;  %vm2590_vm8 = vweird.f32 %v3111_v46  ;;  %v2616_v5 = vmul.f32 %v4802_v1, %v2608_v17 }
 0x597   : > { %v5041_v22 = vadd.f32 1e-05, %v2506_v38  ;;  %v2623_v6 = vadd.f32 %v4810_v48, %v2615_v0  ;;  %v2585_v61 = vmul.f32 %v3111_v46, %v2584_v63  ;;  %v2333_v14 = vmul.f32 %v3109_v26, %v2332_v11  ;;  %vm2591_vm10 = vmor %vm2589_vm9, %vm2590_vm8 }
 0x598   : > { %v2688_v18 = vpop.f32.mrf.mxu2  ;;  %2765 = vmatmul.f32.gmra.mxu3 %v2646_v9  ;;  %v2624_v28 = vadd.f32 %v4810_v48, %v2616_v5  ;;  %vm2344_vm13 = vweird.f32 %v5039_v8  ;;  %v2259_v0 = vsub.f32 %v4829_v43, %v4969_v33 }
 0x599   : > { %v2689_v16 = vadd.f32 %v5009_v58, %v2688_v18  ;;  %3114 = vrsqrt.f32 %v5041_v22  ;;  %v2586_v44 = vmul.f32 0.5, %v2585_v61  ;;  %v2631_v41 = vmax.f32 %v2623_v6, 0.0 }
 0x59a   : > { %v2337_v36 = vsel %vm2336_vm7, %v3109_v26, %v2333_v14  ;;  %v2513_v26 = vsub.f32 %v4818_v3, %v4939_v34  ;;  %v2632_v7 = vmax.f32 %v2624_v28, 0.0  ;;  %vm2599_vm15 = vweird.f32 %v5041_v22 }
 0x59b   : > { %2712 = vst [vmem:[%s5044_s27] sm:$0xff] %v2689_v16  ;;  %v2587_v4 = vsub.f32 1.5, %v2586_v44  ;;  %v2354_v10 = vmul.f32 %v2337_v36, %v2258_v20  ;;  %v2647_v27 = vadd.f32 %v2631_v41, %v4271_v12 }
 0x59c   : > { %v3113_v35 = vpop.eup %3112 }
 0x59d   : > { %v2339_v60 = vmul.f32 %v3113_v35, %v5039_v8  ;;  %v2588_v15 = vmul.f32 %v3111_v46, %v2587_v4  ;;  %v2365_v13 = vmul.f32 %v4802_v1, %v2354_v10  ;;  %vm2345_vm11 = vweird.f32 %v3113_v35 }
 0x59e   : > { %vm2346_vm14 = vmor %vm2344_vm13, %vm2345_vm11  ;;  %v2648_v8 = vadd.f32 %v2632_v7, %v4288_v49 }
 0x59f   : > { %v3115_v52 = vpop.eup %3114  ;;  %v2340_v39 = vmul.f32 %v3113_v35, %v2339_v60  ;;  %v2376_v18 = vadd.f32 %v4810_v48, %v2365_v13  ;;  %v2592_v32 = vsel %vm2591_vm10, %v3111_v46, %v2588_v15  ;;  %v2514_v46 = vsub.f32 %v4835_v54, %v4971_v56 }
 0x5a0   : > { %v2691_v59 = vpop.f32.mrf.mxu2  ;;  %v2594_v23 = vmul.f32 %v3115_v52, %v5041_v22  ;;  %v2609_v31 = vmul.f32 %v2592_v32, %v2513_v26  ;;  %2768 = vmatmul.f32.gmra.mxu3 %v2647_v27  ;;  %vm2600_vm12 = vweird.f32 %v3115_v52 }
 0x5a1   : > { %v2692_v37 = vadd.f32 %v5009_v58, %v2691_v59  ;;  %v2341_v24 = vmul.f32 0.5, %v2340_v39  ;;  %v2384_v30 = vmax.f32 %v2376_v18, 0.0  ;;  %vm2601_vm0 = vmor %vm2599_vm15, %vm2600_vm12 }
 0x5a2   : > { %v2595_v50 = vmul.f32 %v3115_v52, %v2594_v23  ;;  %v2617_v55 = vmul.f32 %v4802_v1, %v2609_v31 }
 0x5a3   : > { %2713 = vst [vmem:[%s5044_s27 + $0x8] sm:$0xff] %v2692_v37  ;;  %v2342_v42 = vsub.f32 1.5, %v2341_v24  ;;  %v2641_v12 = vadd.f32 %v2384_v30, %v4276_v62 }
 0x5a4   : > { %v2596_v57 = vmul.f32 0.5, %v2595_v50  ;;  %v2625_v21 = vadd.f32 %v4810_v48, %v2617_v55 }
 0x5a5   : > { %v2343_v16 = vmul.f32 %v3113_v35, %v2342_v42  ;;  %2705 = vmatmul.f32.gmra.mxu2 %v2641_v12 }
 0x5a6   : > { %v2597_v34 = vsub.f32 1.5, %v2596_v57  ;;  %v2633_v22 = vmax.f32 %v2625_v21, 0.0 }
 0x5a7   : > { %v2347_v62 = vsel %vm2346_vm14, %v3113_v35, %v2343_v16 }
 0x5a8   : > { %v2694_v38 = vpop.f32.mrf.mxu2  ;;  %v2598_v40 = vmul.f32 %v3115_v52, %v2597_v34  ;;  %v2355_v19 = vmul.f32 %v2347_v62, %v2259_v0  ;;  %2771 = vmatmul.f32.gmra.mxu3 %v2648_v8  ;;  %v2649_v49 = vadd.f32 %v2633_v22, %v4313_v47 }
 0x5a9   : > { %v2695_v3 = vadd.f32 %v5009_v58, %v2694_v38 }
 0x5aa   : > { %v2602_v51 = vsel %vm2601_vm0, %v3115_v52, %v2598_v40  ;;  %v2366_v63 = vmul.f32 %v4802_v1, %v2355_v19 }
 0x5ab   : > { %2714 = vst [vmem:[%s5044_s27 + $0x10] sm:$0xff] %v2695_v3  ;;  %v2610_v25 = vmul.f32 %v2602_v51, %v2514_v46 }
 0x5ac   : > { %v2377_v33 = vadd.f32 %v4810_v48, %v2366_v63 }
 0x5ad   : > { %v2618_v43 = vmul.f32 %v4802_v1, %v2610_v25 }
 0x5ae   : > { %v2385_v54 = vmax.f32 %v2377_v33, 0.0 }
 0x5af   : > { %v2626_v56 = vadd.f32 %v4810_v48, %v2618_v43 }
 0x5b0   : > { %v2642_v45 = vadd.f32 %v2385_v54, %v4306_v29  ;;  %2774 = vmatmul.f32.gmra.mxu3 %v2649_v49  ;;  %v2987_v29 = vld [vmem:[%s5162_s8] ss:$0 sm:$0xff] }
 0x5b1   : > { %v2634_v11 = vmax.f32 %v2626_v56, 0.0 }
 0x5b2   : > { %2708 = vmatmul.f32.gmra.mxu2 %v2642_v45 }
 0x5b3   : > { %v2650_v53 = vadd.f32 %v2634_v11, %v4319_v2 }
 0x5b8   : > { %2777 = vmatmul.f32.gmra.mxu3 %v2650_v53 }
 0x5e1   : > { %v2697_v1 = vpop.f32.mrf.mxu2 }
 0x5e2   : > { %v2698_v6 = vadd.f32 %v5009_v58, %v2697_v1 }
 0x5e4   : > { %2715 = vst [vmem:[%s5044_s27 + $0x18] sm:$0xff] %v2698_v6 }
 0x5e8   : > { %v2757_v48 = vpop.f32.mrf.mxu3 }
 0x5e9   : > { %v2758_v61 = vadd.f32 %v2987_v29, %v2757_v48 }
 0x5eb   : > { %2781 = vst [vmem:[%s5044_s27 + $0x40] sm:$0xff] %v2758_v61 }
 0x609   : > { %v2760_v47 = vpop.f32.mrf.mxu3 }
 0x60a   : > { %v2761_v14 = vadd.f32 %v2987_v29, %v2760_v47 }
 0x60c   : > { %2782 = vst [vmem:[%s5044_s27 + $0x48] sm:$0xff] %v2761_v14 }
 0x610   : > { %v2700_v2 = vpop.f32.mrf.mxu2 }
 0x611   : > { %v2701_v9 = vadd.f32 %v5009_v58, %v2700_v2 }
 0x612   : > { %v2763_v17 = vpop.f32.mrf.mxu3 }
 0x613   : > { %v2764_v59 = vadd.f32 %v2987_v29, %v2763_v17  ;;  %2716 = vst [vmem:[%s5044_s27 + $0x20] sm:$0xff] %v2701_v9 }
 0x615   : > { %2783 = vst [vmem:[%s5044_s27 + $0x50] sm:$0xff] %v2764_v59 }
 0x619   : > { %v2703_v20 = vpop.f32.mrf.mxu2 }
 0x61a   : > { %v2704_v44 = vadd.f32 %v5009_v58, %v2703_v20 }
 0x61b   : > { %v2766_v37 = vpop.f32.mrf.mxu3 }
 0x61c   : > { %2717 = vst [vmem:[%s5044_s27 + $0x28] sm:$0xff] %v2704_v44  ;;  %v2767_v41 = vadd.f32 %v2987_v29, %v2766_v37 }
 0x61e   : > { %2784 = vst [vmem:[%s5044_s27 + $0x58] sm:$0xff] %v2767_v41 }
 0x623   : > { %v2769_v36 = vpop.f32.mrf.mxu3 }
 0x624   : > { %v2770_v35 = vadd.f32 %v2987_v29, %v2769_v36 }
 0x626   : > { %2785 = vst [vmem:[%s5044_s27 + $0x60] sm:$0xff] %v2770_v35 }
 0x628   : > { %v2706_v4 = vpop.f32.mrf.mxu2 }
 0x629   : > { %v2707_v10 = vadd.f32 %v5009_v58, %v2706_v4 }
 0x62b   : > { %2718 = vst [vmem:[%s5044_s27 + $0x30] sm:$0xff] %v2707_v10  ;;  %v2772_v52 = vpop.f32.mrf.mxu3 }
 0x62c   : > { %v2773_v60 = vadd.f32 %v2987_v29, %v2772_v52 }
 0x62e   : > { %2786 = vst [vmem:[%s5044_s27 + $0x68] sm:$0xff] %v2773_v60 }
 0x633   : > { %v2775_v15 = vpop.f32.mrf.mxu3 }
 0x634   : > { %v2776_v13 = vadd.f32 %v2987_v29, %v2775_v15 }
 0x635   : > { %v2709_v5 = vpop.f32.mrf.mxu2 }
 0x636   : > { %v2710_v23 = vadd.f32 %v5009_v58, %v2709_v5  ;;  %2787 = vst [vmem:[%s5044_s27 + $0x70] sm:$0xff] %v2776_v13 }
 0x638   : > { %2719 = vst [vmem:[%s5044_s27 + $0x38] sm:$0xff] %v2710_v23 }
 0x63b   : > { %v2778_v26 = vpop.f32.mrf.mxu3 }
 0x63c   : > { %v2779_v39 = vadd.f32 %v2987_v29, %v2778_v26 }
 0x63e   : > { %2788 = vst [vmem:[%s5044_s27 + $0x78] sm:$0xff] %v2779_v39 }
 0x63f   : > { %3173 = shalt.err (!%p3170_p8)
}
 0x640   : > { %s3217_s23 = smov 128   ;;  %s3218_s27 = smov 8  }
 0x641   : > { %2923 = dma.vmem_to_hbm [thread:$0]  (%p3307_p5), %s2803_s22, 2048, %s2805_s24, %s2790_s13, %s3217_s23, %s3217_s23, %s3218_s27  }
 0x642 PF: > { %p2935_p9 = scmp.ge.s32.totalorder %s3212_s12, 2  ;;  %s2819_s21 = sand.u32 1, %s3200_s30  }
 0x643   : > { %s2820_s28 = scalar_lea.sflag [#allocation4], %s2819_s21 }
 0x644   : > { %p2930_p10 = pnand %p2935_p9, %p3311_p6 }
 0x646   : > { %p2931_p11 = pneg %p2930_p10 }
 0x648   : > { %3195 = dma.done.wait (%p2931_p11), %s2820_s28, 2048  }
 0x649   : > { %3197 = vsyncadd (%p2931_p11), %s2820_s28, 4294965248  ;;  %p20_p12 = scmp.ge.s32.totalorder %s3294_s15, 4   ;;  %s5242_s30 = smov %s3204_s10 }
 0x64a   : > { %s5243_s10 = smov %s3208_s11  ;;  %s5244_s11 = smov %s3305_s18 }
 0x64b   : > { %s5245_s12 = smov %s3294_s15  ;;  %22 = sbr.rel (!%p20_p12) target bundleno = 4 (0x4), region = 108 }
 0x650   :  { %2826 = vsyncpa [#allocation3], 1 }
 0x651   :  { %2828 = vsyncpa [#allocation3 + $0x1], 1 }
 0x652   :  { %2829 = vsyncpa [#allocation4], 1 }
 0x653   :  { %2831 = vsyncpa [#allocation4 + $0x1], 1 }

</bundles_post_ra>
